<compile_context>
chip_gen: v7x
topology: tpu7x:2x2x1
jax: 0.10.0
libtpu: 0.0.40
codegen_flags: <defaults>
</compile_context>

<pallas_src>
import jax
import jax.numpy as jnp
from jax import lax
from jax.experimental import pallas as pl
from jax.experimental.pallas import tpu as pltpu

_LANE = 128


def _lstsq_kernel(a_ref, b_ref, x_ref):
    # a_ref: (S, M, N, 128)
    # b_ref: (S, M, 128)      when K == 1 (RHS squeezed)
    #        (S, M, K, 128)   otherwise
    # x_ref: (S, N, 128) / (S, N, K, 128)
    S, M, N, L = a_ref.shape
    squeezed = (b_ref.ndim == 3)
    K = 1 if squeezed else b_ref.shape[2]
    f32 = jnp.float32

    @pl.loop(0, S)
    def _(s):
        a_s = a_ref.at[s]          # (M, N, L) view — no load yet
        b_s = b_ref.at[s]

        # --- fused normal equations: G = A^T A, c = A^T b -----------------
        # Lane-parallel VPU multiply-accumulate over the M rows; one row of
        # A / b is loaded per iteration so only G stays live.
        G = jnp.zeros((N, N, L), f32)
        c = jnp.zeros((N, L) if squeezed else (N, K, L), f32)
        for m in range(M):
            a_m = a_s[m].astype(f32)                       # (N, L)
            G = G + a_m[:, None, :] * a_m[None, :, :]
            if squeezed:
                b_m = b_s[m].astype(f32)                   # (L,)
                c = c + a_m * b_m[None, :]
            else:
                b_m = b_s[m].astype(f32)                   # (K, L)
                c = c + a_m[:, None, :] * b_m[None, :, :]

        # --- Gauss-Jordan, fully unrolled ---------------------------------
        # G is SPD for full-rank A, so no pivoting.  Rows are separate
        # (N, L)/(K, L) values: row k is only scaled (never eliminated),
        # no full-tensor select, no captured constants.
        G_rows = [G[n] for n in range(N)]                          # (N, L)
        if squeezed:
            c_rows = [c[n][None, :] for n in range(N)]             # (1, L)
        else:
            c_rows = [c[n] for n in range(N)]                      # (K, L)

        for k in range(N):
            pivot = G_rows[k][k:k + 1, :]                          # (1, L)
            inv_p = pl.reciprocal(pivot, approx=True)              # EUP slot
            inv_p = inv_p * (2.0 - pivot * inv_p)                  # Newton 1
            inv_p = inv_p * (2.0 - pivot * inv_p)                  # Newton 2
            g_k = G_rows[k] * inv_p                                # (N, L)
            c_k = c_rows[k] * inv_p
            G_rows[k] = g_k
            c_rows[k] = c_k
            for r in range(N):
                if r == k:
                    continue
                f = G_rows[r][k:k + 1, :]                          # (1, L)
                G_rows[r] = G_rows[r] - f * g_k
                c_rows[r] = c_rows[r] - f * c_k

        if squeezed:
            x = jnp.concatenate(c_rows, axis=0)                    # (N, L)
        else:
            x = jnp.stack(c_rows, axis=0)                          # (N, K, L)
        x_ref[s] = x.astype(x_ref.dtype)                           # lane-dense store


def _round_up(x, m):
    return -(-x // m) * m


def lstsq_pallas(A, b, block_b=1024, min_grid_steps=2):
    """Batched least squares: x minimizing ||A_i x_i - b_i|| per batch item.

    A: (B, M, N); b: (B, M, K) or (B, M).  Returns (B, N, K) / (B, N).
    """
    assert A.ndim == 3, "expected batched A of shape (B, M, N)"
    squeeze_rhs = False
    if b.ndim == A.ndim - 1:          # torch.linalg.lstsq also accepts (B, M)
        b = b[..., None]
        squeeze_rhs = True

    B, M, N = A.shape
    Bb, Mb, K = b.shape
    assert B == Bb and M == Mb, "A and b batch/row dims must match"
    out_dtype = jnp.promote_types(A.dtype, b.dtype)

    # --- lane chunking: batch -> (chunks, ..., 128), batch on lanes --------
    C = pl.cdiv(B, _LANE)
    # Chunks per grid step: amortize per-step overhead, but keep at least
    # `min_grid_steps` steps so both v7x TensorCores get work, bounded by
    # block_b lanes of VMEM per step.
    S = max(1, min(block_b // _LANE, max(1, C // min_grid_steps)))
    Cp = _round_up(C, S)
    Bp = Cp * _LANE
    if Bp != B:
        # Padded lanes solve an all-zero (singular) system; their inf/NaN
        # results are sliced off below before anything user-visible.
        A = jnp.pad(A, ((0, Bp - B), (0, 0), (0, 0)))
        b = jnp.pad(b, ((0, Bp - B), (0, 0), (0, 0)))

    # Batch-minor ("lane-dense") layout.  No dtype upcast here: the kernel
    # promotes per-row to f32, so bf16/f16 inputs stay half-width in HBM.
    # TODO(synk): if the producer (e.g. a Gauss-Newton Jacobian kernel) emits
    # batch-minor layout directly, these transposes (one extra HBM pass over
    # A/b/x each) disappear.
    A_c = jnp.transpose(A.reshape(Cp, _LANE, M, N), (0, 2, 3, 1))        # (Cp,M,N,128)
    if K == 1:
        b_c = jnp.transpose(b[..., 0].reshape(Cp, _LANE, M), (0, 2, 1))  # (Cp,M,128)
        b_spec = pl.BlockSpec((S, M, _LANE), lambda i: (i, 0, 0))
        out_shape = jax.ShapeDtypeStruct((Cp, N, _LANE), out_dtype)
        out_spec = pl.BlockSpec((S, N, _LANE), lambda i: (i, 0, 0))
    else:
        b_c = jnp.transpose(b.reshape(Cp, _LANE, M, K), (0, 2, 3, 1))    # (Cp,M,K,128)
        b_spec = pl.BlockSpec((S, M, K, _LANE), lambda i: (i, 0, 0, 0))
        out_shape = jax.ShapeDtypeStruct((Cp, N, K, _LANE), out_dtype)
        out_spec = pl.BlockSpec((S, N, K, _LANE), lambda i: (i, 0, 0, 0))

    x_c = pl.pallas_call(
        _lstsq_kernel,
        out_shape=out_shape,
        grid=(Cp // S,),
        in_specs=[pl.BlockSpec((S, M, N, _LANE), lambda i: (i, 0, 0, 0)),
                  b_spec],
        out_specs=out_spec,
        compiler_params=pltpu.CompilerParams(
            dimension_semantics=("parallel",)),   # shard batch blocks across TCs
    )(A_c, b_c)

    if K == 1:
        x = jnp.transpose(x_c, (0, 2, 1)).reshape(Bp, N)[:B][..., None]  # (B,N,1)
    else:
        x = jnp.transpose(x_c, (0, 3, 1, 2)).reshape(Bp, N, K)[:B]       # (B,N,K)
    if squeeze_rhs:
        x = x[..., 0]
    return x


class LSTSQ:
    """JAX/Pallas counterpart of pypose.optim.solver.LSTSQ.

    rcond / driver are accepted for API parity; the kernel always solves the
    full-rank normal equations (equivalent to driver='gels').
    """
    # TODO(synk): rcond-based rank truncation (gelsy/gelsd/gelss SVD paths)
    # and complex inputs have no clean Pallas equivalent; only full-rank real
    # 'gels' semantics are covered.

    def __init__(self, rcond=None, driver=None):
        self.rcond, self.driver = rcond, driver

    def __call__(self, A, b, check_nan=False):
        x = lstsq_pallas(A, b)
        # The torch module asserts on NaNs eagerly, forcing a device->host
        # sync every call; kept opt-in here per earlier perf feedback.
        if check_nan:
            assert not bool(jnp.any(jnp.isnan(x))), \
                'Linear Solver Failed Using LSTSQ. Using PINV() instead'
        return x


if __name__ == "__main__":
    key = jax.random.PRNGKey(0)
    ka, kb = jax.random.split(key)

    # Batched over-determined systems: A (B, M, N), b (B, M, K).
    B, M, N, K = 256, 16, 8, 1
    A = jax.random.normal(ka, (B, M, N), dtype=jnp.float32)
    b = jax.random.normal(kb, (B, M, K), dtype=jnp.float32)

    solver = LSTSQ(driver="gels")
    x = jax.block_until_ready(solver(A, b))
    assert x.shape == (B, N, K)

    # Reference: least squares via normal equations in plain JAX (f32).
    At = jnp.swapaxes(A, -1, -2)
    G = jnp.matmul(At, A, precision=lax.Precision.HIGHEST)
    c = jnp.matmul(At, b, precision=lax.Precision.HIGHEST)
    x_ref = jnp.linalg.solve(G, c)
    err = float(jnp.max(jnp.abs(x - x_ref)))
    assert jnp.allclose(x, x_ref, rtol=2e-3, atol=2e-3), f"max abs err {err}"

    # Small-batch path (pads to one 128-lane chunk) + implicit-K (B, M) RHS.
    B2 = 2
    A2 = jax.random.normal(jax.random.PRNGKey(1), (B2, M, N), dtype=jnp.float32)
    b2 = jax.random.normal(jax.random.PRNGKey(2), (B2, M), dtype=jnp.float32)
    x2 = jax.block_until_ready(solver(A2, b2))
    assert x2.shape == (B2, N)
    At2 = jnp.swapaxes(A2, -1, -2)
    x2_ref = jnp.linalg.solve(
        jnp.matmul(At2, A2, precision=lax.Precision.HIGHEST),
        jnp.matmul(At2, b2[..., None], precision=lax.Precision.HIGHEST))[..., 0]
    assert jnp.allclose(x2, x2_ref, rtol=2e-3, atol=2e-3)

    # Multi-RHS path (K > 1).
    B3, K3 = 3, 2
    A3 = jax.random.normal(jax.random.PRNGKey(3), (B3, M, N), dtype=jnp.float32)
    b3 = jax.random.normal(jax.random.PRNGKey(4), (B3, M, K3), dtype=jnp.float32)
    x3 = jax.block_until_ready(solver(A3, b3))
    assert x3.shape == (B3, N, K3)
    At3 = jnp.swapaxes(A3, -1, -2)
    x3_ref = jnp.linalg.solve(
        jnp.matmul(At3, A3, precision=lax.Precision.HIGHEST),
        jnp.matmul(At3, b3, precision=lax.Precision.HIGHEST))
    assert jnp.allclose(x3, x3_ref, rtol=2e-3, atol=2e-3)

    print("KERNEL_OK")
</pallas_src>

<mosaic_0001>
module attributes {stable_mosaic.version = 11 : i64} {
  func.func @_lstsq_kernel(%arg0: i32, %arg1: memref<1x16x8x128xf32, #tpu.memory_space<vmem>>, %arg2: memref<1x16x128xf32, #tpu.memory_space<vmem>>, %arg3: memref<1x8x128xf32, #tpu.memory_space<vmem>>) attributes {dimension_semantics = [#tpu.dimension_semantics<parallel>], iteration_bounds = array<i64: 2>, scalar_prefetch = 0 : i64, scratch_operands = 0 : i64, tpu.core_type = #tpu.core_type<tc>, window_params = [{transform_indices = @transform_0, window_bounds = array<i64: 1, 16, 8, 128>}, {transform_indices = @transform_1, window_bounds = array<i64: 1, 16, 128>}, {transform_indices = @transform_2, window_bounds = array<i64: 1, 8, 128>}]} {
    %c0_i32 = arith.constant 0 : i32
    %c1_i32 = arith.constant 1 : i32
    %0 = arith.muli %c0_i32, %c1_i32 : i32
    %c0_i32_0 = arith.constant 0 : i32
    %1 = arith.addi %c0_i32_0, %0 : i32
    %cst = arith.constant 0.000000e+00 : f32
    %2 = vector.broadcast %cst : f32 to vector<8x8x128xf32>
    %cst_1 = arith.constant 0.000000e+00 : f32
    %3 = vector.broadcast %cst_1 : f32 to vector<8x128xf32>
    %c0_i32_2 = arith.constant 0 : i32
    %c0_i32_3 = arith.constant 0 : i32
    %c0_i32_4 = arith.constant 0 : i32
    %4 = tpu.memref_slice %arg1[%1, %c0_i32_2, %c0_i32_3, %c0_i32_4] : memref<1x16x8x128xf32, #tpu.memory_space<vmem>> -> memref<1x16x8x128xf32, #tpu.memory_space<vmem>>
    %5 = tpu.memref_squeeze %4 : memref<1x16x8x128xf32, #tpu.memory_space<vmem>> -> memref<16x8x128xf32, #tpu.memory_space<vmem>>
    %c0 = arith.constant 0 : index
    %c0_5 = arith.constant 0 : index
    %c0_6 = arith.constant 0 : index
    %6 = vector.load %5[%c0, %c0_5, %c0_6] : memref<16x8x128xf32, #tpu.memory_space<vmem>>, vector<1x8x128xf32>
    %7 = vector.shape_cast %6 : vector<1x8x128xf32> to vector<8x128xf32>
    %8 = vector.shape_cast %7 : vector<8x128xf32> to vector<8x1x128xf32>
    %9 = vector.shape_cast %7 : vector<8x128xf32> to vector<1x8x128xf32>
    %10 = vector.broadcast %8 : vector<8x1x128xf32> to vector<8x8x128xf32>
    %11 = vector.broadcast %9 : vector<1x8x128xf32> to vector<8x8x128xf32>
    %12 = arith.mulf %10, %11 : vector<8x8x128xf32>
    %13 = arith.addf %2, %12 : vector<8x8x128xf32>
    %c0_i32_7 = arith.constant 0 : i32
    %c0_i32_8 = arith.constant 0 : i32
    %14 = tpu.memref_slice %arg2[%1, %c0_i32_7, %c0_i32_8] : memref<1x16x128xf32, #tpu.memory_space<vmem>> -> memref<1x16x128xf32, #tpu.memory_space<vmem>>
    %15 = tpu.memref_squeeze %14 : memref<1x16x128xf32, #tpu.memory_space<vmem>> -> memref<16x128xf32, #tpu.memory_space<vmem>>
    %c0_9 = arith.constant 0 : index
    %c0_10 = arith.constant 0 : index
    %16 = vector.load %15[%c0_9, %c0_10] : memref<16x128xf32, #tpu.memory_space<vmem>>, vector<1x128xf32>
    %17 = vector.shape_cast %16 : vector<1x128xf32> to vector<128xf32>
    %18 = vector.shape_cast %17 : vector<128xf32> to vector<1x128xf32>
    %19 = vector.broadcast %18 : vector<1x128xf32> to vector<8x128xf32>
    %20 = arith.mulf %7, %19 : vector<8x128xf32>
    %21 = arith.addf %3, %20 : vector<8x128xf32>
    %c0_i32_11 = arith.constant 0 : i32
    %c0_i32_12 = arith.constant 0 : i32
    %c0_i32_13 = arith.constant 0 : i32
    %22 = tpu.memref_slice %arg1[%1, %c0_i32_11, %c0_i32_12, %c0_i32_13] : memref<1x16x8x128xf32, #tpu.memory_space<vmem>> -> memref<1x16x8x128xf32, #tpu.memory_space<vmem>>
    %23 = tpu.memref_squeeze %22 : memref<1x16x8x128xf32, #tpu.memory_space<vmem>> -> memref<16x8x128xf32, #tpu.memory_space<vmem>>
    %c1 = arith.constant 1 : index
    %c0_14 = arith.constant 0 : index
    %c0_15 = arith.constant 0 : index
    %24 = vector.load %23[%c1, %c0_14, %c0_15] : memref<16x8x128xf32, #tpu.memory_space<vmem>>, vector<1x8x128xf32>
    %25 = vector.shape_cast %24 : vector<1x8x128xf32> to vector<8x128xf32>
    %26 = vector.shape_cast %25 : vector<8x128xf32> to vector<8x1x128xf32>
    %27 = vector.shape_cast %25 : vector<8x128xf32> to vector<1x8x128xf32>
    %28 = vector.broadcast %26 : vector<8x1x128xf32> to vector<8x8x128xf32>
    %29 = vector.broadcast %27 : vector<1x8x128xf32> to vector<8x8x128xf32>
    %30 = arith.mulf %28, %29 : vector<8x8x128xf32>
    %31 = arith.addf %13, %30 : vector<8x8x128xf32>
    %c0_i32_16 = arith.constant 0 : i32
    %c0_i32_17 = arith.constant 0 : i32
    %32 = tpu.memref_slice %arg2[%1, %c0_i32_16, %c0_i32_17] : memref<1x16x128xf32, #tpu.memory_space<vmem>> -> memref<1x16x128xf32, #tpu.memory_space<vmem>>
    %33 = tpu.memref_squeeze %32 : memref<1x16x128xf32, #tpu.memory_space<vmem>> -> memref<16x128xf32, #tpu.memory_space<vmem>>
    %c1_18 = arith.constant 1 : index
    %c0_19 = arith.constant 0 : index
    %34 = vector.load %33[%c1_18, %c0_19] : memref<16x128xf32, #tpu.memory_space<vmem>>, vector<1x128xf32>
    %35 = vector.shape_cast %34 : vector<1x128xf32> to vector<128xf32>
    %36 = vector.shape_cast %35 : vector<128xf32> to vector<1x128xf32>
    %37 = vector.broadcast %36 : vector<1x128xf32> to vector<8x128xf32>
    %38 = arith.mulf %25, %37 : vector<8x128xf32>
    %39 = arith.addf %21, %38 : vector<8x128xf32>
    %c0_i32_20 = arith.constant 0 : i32
    %c0_i32_21 = arith.constant 0 : i32
    %c0_i32_22 = arith.constant 0 : i32
    %40 = tpu.memref_slice %arg1[%1, %c0_i32_20, %c0_i32_21, %c0_i32_22] : memref<1x16x8x128xf32, #tpu.memory_space<vmem>> -> memref<1x16x8x128xf32, #tpu.memory_space<vmem>>
    %41 = tpu.memref_squeeze %40 : memref<1x16x8x128xf32, #tpu.memory_space<vmem>> -> memref<16x8x128xf32, #tpu.memory_space<vmem>>
    %c2 = arith.constant 2 : index
    %c0_23 = arith.constant 0 : index
    %c0_24 = arith.constant 0 : index
    %42 = vector.load %41[%c2, %c0_23, %c0_24] : memref<16x8x128xf32, #tpu.memory_space<vmem>>, vector<1x8x128xf32>
    %43 = vector.shape_cast %42 : vector<1x8x128xf32> to vector<8x128xf32>
    %44 = vector.shape_cast %43 : vector<8x128xf32> to vector<8x1x128xf32>
    %45 = vector.shape_cast %43 : vector<8x128xf32> to vector<1x8x128xf32>
    %46 = vector.broadcast %44 : vector<8x1x128xf32> to vector<8x8x128xf32>
    %47 = vector.broadcast %45 : vector<1x8x128xf32> to vector<8x8x128xf32>
    %48 = arith.mulf %46, %47 : vector<8x8x128xf32>
    %49 = arith.addf %31, %48 : vector<8x8x128xf32>
    %c0_i32_25 = arith.constant 0 : i32
    %c0_i32_26 = arith.constant 0 : i32
    %50 = tpu.memref_slice %arg2[%1, %c0_i32_25, %c0_i32_26] : memref<1x16x128xf32, #tpu.memory_space<vmem>> -> memref<1x16x128xf32, #tpu.memory_space<vmem>>
    %51 = tpu.memref_squeeze %50 : memref<1x16x128xf32, #tpu.memory_space<vmem>> -> memref<16x128xf32, #tpu.memory_space<vmem>>
    %c2_27 = arith.constant 2 : index
    %c0_28 = arith.constant 0 : index
    %52 = vector.load %51[%c2_27, %c0_28] : memref<16x128xf32, #tpu.memory_space<vmem>>, vector<1x128xf32>
    %53 = vector.shape_cast %52 : vector<1x128xf32> to vector<128xf32>
    %54 = vector.shape_cast %53 : vector<128xf32> to vector<1x128xf32>
    %55 = vector.broadcast %54 : vector<1x128xf32> to vector<8x128xf32>
    %56 = arith.mulf %43, %55 : vector<8x128xf32>
    %57 = arith.addf %39, %56 : vector<8x128xf32>
    %c0_i32_29 = arith.constant 0 : i32
    %c0_i32_30 = arith.constant 0 : i32
    %c0_i32_31 = arith.constant 0 : i32
    %58 = tpu.memref_slice %arg1[%1, %c0_i32_29, %c0_i32_30, %c0_i32_31] : memref<1x16x8x128xf32, #tpu.memory_space<vmem>> -> memref<1x16x8x128xf32, #tpu.memory_space<vmem>>
    %59 = tpu.memref_squeeze %58 : memref<1x16x8x128xf32, #tpu.memory_space<vmem>> -> memref<16x8x128xf32, #tpu.memory_space<vmem>>
    %c3 = arith.constant 3 : index
    %c0_32 = arith.constant 0 : index
    %c0_33 = arith.constant 0 : index
    %60 = vector.load %59[%c3, %c0_32, %c0_33] : memref<16x8x128xf32, #tpu.memory_space<vmem>>, vector<1x8x128xf32>
    %61 = vector.shape_cast %60 : vector<1x8x128xf32> to vector<8x128xf32>
    %62 = vector.shape_cast %61 : vector<8x128xf32> to vector<8x1x128xf32>
    %63 = vector.shape_cast %61 : vector<8x128xf32> to vector<1x8x128xf32>
    %64 = vector.broadcast %62 : vector<8x1x128xf32> to vector<8x8x128xf32>
    %65 = vector.broadcast %63 : vector<1x8x128xf32> to vector<8x8x128xf32>
    %66 = arith.mulf %64, %65 : vector<8x8x128xf32>
    %67 = arith.addf %49, %66 : vector<8x8x128xf32>
    %c0_i32_34 = arith.constant 0 : i32
    %c0_i32_35 = arith.constant 0 : i32
    %68 = tpu.memref_slice %arg2[%1, %c0_i32_34, %c0_i32_35] : memref<1x16x128xf32, #tpu.memory_space<vmem>> -> memref<1x16x128xf32, #tpu.memory_space<vmem>>
    %69 = tpu.memref_squeeze %68 : memref<1x16x128xf32, #tpu.memory_space<vmem>> -> memref<16x128xf32, #tpu.memory_space<vmem>>
    %c3_36 = arith.constant 3 : index
    %c0_37 = arith.constant 0 : index
    %70 = vector.load %69[%c3_36, %c0_37] : memref<16x128xf32, #tpu.memory_space<vmem>>, vector<1x128xf32>
    %71 = vector.shape_cast %70 : vector<1x128xf32> to vector<128xf32>
    %72 = vector.shape_cast %71 : vector<128xf32> to vector<1x128xf32>
    %73 = vector.broadcast %72 : vector<1x128xf32> to vector<8x128xf32>
    %74 = arith.mulf %61, %73 : vector<8x128xf32>
    %75 = arith.addf %57, %74 : vector<8x128xf32>
    %c0_i32_38 = arith.constant 0 : i32
    %c0_i32_39 = arith.constant 0 : i32
    %c0_i32_40 = arith.constant 0 : i32
    %76 = tpu.memref_slice %arg1[%1, %c0_i32_38, %c0_i32_39, %c0_i32_40] : memref<1x16x8x128xf32, #tpu.memory_space<vmem>> -> memref<1x16x8x128xf32, #tpu.memory_space<vmem>>
    %77 = tpu.memref_squeeze %76 : memref<1x16x8x128xf32, #tpu.memory_space<vmem>> -> memref<16x8x128xf32, #tpu.memory_space<vmem>>
    %c4 = arith.constant 4 : index
    %c0_41 = arith.constant 0 : index
    %c0_42 = arith.constant 0 : index
    %78 = vector.load %77[%c4, %c0_41, %c0_42] : memref<16x8x128xf32, #tpu.memory_space<vmem>>, vector<1x8x128xf32>
    %79 = vector.shape_cast %78 : vector<1x8x128xf32> to vector<8x128xf32>
    %80 = vector.shape_cast %79 : vector<8x128xf32> to vector<8x1x128xf32>
    %81 = vector.shape_cast %79 : vector<8x128xf32> to vector<1x8x128xf32>
    %82 = vector.broadcast %80 : vector<8x1x128xf32> to vector<8x8x128xf32>
    %83 = vector.broadcast %81 : vector<1x8x128xf32> to vector<8x8x128xf32>
    %84 = arith.mulf %82, %83 : vector<8x8x128xf32>
    %85 = arith.addf %67, %84 : vector<8x8x128xf32>
    %c0_i32_43 = arith.constant 0 : i32
    %c0_i32_44 = arith.constant 0 : i32
    %86 = tpu.memref_slice %arg2[%1, %c0_i32_43, %c0_i32_44] : memref<1x16x128xf32, #tpu.memory_space<vmem>> -> memref<1x16x128xf32, #tpu.memory_space<vmem>>
    %87 = tpu.memref_squeeze %86 : memref<1x16x128xf32, #tpu.memory_space<vmem>> -> memref<16x128xf32, #tpu.memory_space<vmem>>
    %c4_45 = arith.constant 4 : index
    %c0_46 = arith.constant 0 : index
    %88 = vector.load %87[%c4_45, %c0_46] : memref<16x128xf32, #tpu.memory_space<vmem>>, vector<1x128xf32>
    %89 = vector.shape_cast %88 : vector<1x128xf32> to vector<128xf32>
    %90 = vector.shape_cast %89 : vector<128xf32> to vector<1x128xf32>
    %91 = vector.broadcast %90 : vector<1x128xf32> to vector<8x128xf32>
    %92 = arith.mulf %79, %91 : vector<8x128xf32>
    %93 = arith.addf %75, %92 : vector<8x128xf32>
    %c0_i32_47 = arith.constant 0 : i32
    %c0_i32_48 = arith.constant 0 : i32
    %c0_i32_49 = arith.constant 0 : i32
    %94 = tpu.memref_slice %arg1[%1, %c0_i32_47, %c0_i32_48, %c0_i32_49] : memref<1x16x8x128xf32, #tpu.memory_space<vmem>> -> memref<1x16x8x128xf32, #tpu.memory_space<vmem>>
    %95 = tpu.memref_squeeze %94 : memref<1x16x8x128xf32, #tpu.memory_space<vmem>> -> memref<16x8x128xf32, #tpu.memory_space<vmem>>
    %c5 = arith.constant 5 : index
    %c0_50 = arith.constant 0 : index
    %c0_51 = arith.constant 0 : index
    %96 = vector.load %95[%c5, %c0_50, %c0_51] : memref<16x8x128xf32, #tpu.memory_space<vmem>>, vector<1x8x128xf32>
    %97 = vector.shape_cast %96 : vector<1x8x128xf32> to vector<8x128xf32>
    %98 = vector.shape_cast %97 : vector<8x128xf32> to vector<8x1x128xf32>
    %99 = vector.shape_cast %97 : vector<8x128xf32> to vector<1x8x128xf32>
    %100 = vector.broadcast %98 : vector<8x1x128xf32> to vector<8x8x128xf32>
    %101 = vector.broadcast %99 : vector<1x8x128xf32> to vector<8x8x128xf32>
    %102 = arith.mulf %100, %101 : vector<8x8x128xf32>
    %103 = arith.addf %85, %102 : vector<8x8x128xf32>
    %c0_i32_52 = arith.constant 0 : i32
    %c0_i32_53 = arith.constant 0 : i32
    %104 = tpu.memref_slice %arg2[%1, %c0_i32_52, %c0_i32_53] : memref<1x16x128xf32, #tpu.memory_space<vmem>> -> memref<1x16x128xf32, #tpu.memory_space<vmem>>
    %105 = tpu.memref_squeeze %104 : memref<1x16x128xf32, #tpu.memory_space<vmem>> -> memref<16x128xf32, #tpu.memory_space<vmem>>
    %c5_54 = arith.constant 5 : index
    %c0_55 = arith.constant 0 : index
    %106 = vector.load %105[%c5_54, %c0_55] : memref<16x128xf32, #tpu.memory_space<vmem>>, vector<1x128xf32>
    %107 = vector.shape_cast %106 : vector<1x128xf32> to vector<128xf32>
    %108 = vector.shape_cast %107 : vector<128xf32> to vector<1x128xf32>
    %109 = vector.broadcast %108 : vector<1x128xf32> to vector<8x128xf32>
    %110 = arith.mulf %97, %109 : vector<8x128xf32>
    %111 = arith.addf %93, %110 : vector<8x128xf32>
    %c0_i32_56 = arith.constant 0 : i32
    %c0_i32_57 = arith.constant 0 : i32
    %c0_i32_58 = arith.constant 0 : i32
    %112 = tpu.memref_slice %arg1[%1, %c0_i32_56, %c0_i32_57, %c0_i32_58] : memref<1x16x8x128xf32, #tpu.memory_space<vmem>> -> memref<1x16x8x128xf32, #tpu.memory_space<vmem>>
    %113 = tpu.memref_squeeze %112 : memref<1x16x8x128xf32, #tpu.memory_space<vmem>> -> memref<16x8x128xf32, #tpu.memory_space<vmem>>
    %c6 = arith.constant 6 : index
    %c0_59 = arith.constant 0 : index
    %c0_60 = arith.constant 0 : index
    %114 = vector.load %113[%c6, %c0_59, %c0_60] : memref<16x8x128xf32, #tpu.memory_space<vmem>>, vector<1x8x128xf32>
    %115 = vector.shape_cast %114 : vector<1x8x128xf32> to vector<8x128xf32>
    %116 = vector.shape_cast %115 : vector<8x128xf32> to vector<8x1x128xf32>
    %117 = vector.shape_cast %115 : vector<8x128xf32> to vector<1x8x128xf32>
    %118 = vector.broadcast %116 : vector<8x1x128xf32> to vector<8x8x128xf32>
    %119 = vector.broadcast %117 : vector<1x8x128xf32> to vector<8x8x128xf32>
    %120 = arith.mulf %118, %119 : vector<8x8x128xf32>
    %121 = arith.addf %103, %120 : vector<8x8x128xf32>
    %c0_i32_61 = arith.constant 0 : i32
    %c0_i32_62 = arith.constant 0 : i32
    %122 = tpu.memref_slice %arg2[%1, %c0_i32_61, %c0_i32_62] : memref<1x16x128xf32, #tpu.memory_space<vmem>> -> memref<1x16x128xf32, #tpu.memory_space<vmem>>
    %123 = tpu.memref_squeeze %122 : memref<1x16x128xf32, #tpu.memory_space<vmem>> -> memref<16x128xf32, #tpu.memory_space<vmem>>
    %c6_63 = arith.constant 6 : index
    %c0_64 = arith.constant 0 : index
    %124 = vector.load %123[%c6_63, %c0_64] : memref<16x128xf32, #tpu.memory_space<vmem>>, vector<1x128xf32>
    %125 = vector.shape_cast %124 : vector<1x128xf32> to vector<128xf32>
    %126 = vector.shape_cast %125 : vector<128xf32> to vector<1x128xf32>
    %127 = vector.broadcast %126 : vector<1x128xf32> to vector<8x128xf32>
    %128 = arith.mulf %115, %127 : vector<8x128xf32>
    %129 = arith.addf %111, %128 : vector<8x128xf32>
    %c0_i32_65 = arith.constant 0 : i32
    %c0_i32_66 = arith.constant 0 : i32
    %c0_i32_67 = arith.constant 0 : i32
    %130 = tpu.memref_slice %arg1[%1, %c0_i32_65, %c0_i32_66, %c0_i32_67] : memref<1x16x8x128xf32, #tpu.memory_space<vmem>> -> memref<1x16x8x128xf32, #tpu.memory_space<vmem>>
    %131 = tpu.memref_squeeze %130 : memref<1x16x8x128xf32, #tpu.memory_space<vmem>> -> memref<16x8x128xf32, #tpu.memory_space<vmem>>
    %c7 = arith.constant 7 : index
    %c0_68 = arith.constant 0 : index
    %c0_69 = arith.constant 0 : index
    %132 = vector.load %131[%c7, %c0_68, %c0_69] : memref<16x8x128xf32, #tpu.memory_space<vmem>>, vector<1x8x128xf32>
    %133 = vector.shape_cast %132 : vector<1x8x128xf32> to vector<8x128xf32>
    %134 = vector.shape_cast %133 : vector<8x128xf32> to vector<8x1x128xf32>
    %135 = vector.shape_cast %133 : vector<8x128xf32> to vector<1x8x128xf32>
    %136 = vector.broadcast %134 : vector<8x1x128xf32> to vector<8x8x128xf32>
    %137 = vector.broadcast %135 : vector<1x8x128xf32> to vector<8x8x128xf32>
    %138 = arith.mulf %136, %137 : vector<8x8x128xf32>
    %139 = arith.addf %121, %138 : vector<8x8x128xf32>
    %c0_i32_70 = arith.constant 0 : i32
    %c0_i32_71 = arith.constant 0 : i32
    %140 = tpu.memref_slice %arg2[%1, %c0_i32_70, %c0_i32_71] : memref<1x16x128xf32, #tpu.memory_space<vmem>> -> memref<1x16x128xf32, #tpu.memory_space<vmem>>
    %141 = tpu.memref_squeeze %140 : memref<1x16x128xf32, #tpu.memory_space<vmem>> -> memref<16x128xf32, #tpu.memory_space<vmem>>
    %c7_72 = arith.constant 7 : index
    %c0_73 = arith.constant 0 : index
    %142 = vector.load %141[%c7_72, %c0_73] : memref<16x128xf32, #tpu.memory_space<vmem>>, vector<1x128xf32>
    %143 = vector.shape_cast %142 : vector<1x128xf32> to vector<128xf32>
    %144 = vector.shape_cast %143 : vector<128xf32> to vector<1x128xf32>
    %145 = vector.broadcast %144 : vector<1x128xf32> to vector<8x128xf32>
    %146 = arith.mulf %133, %145 : vector<8x128xf32>
    %147 = arith.addf %129, %146 : vector<8x128xf32>
    %c0_i32_74 = arith.constant 0 : i32
    %c0_i32_75 = arith.constant 0 : i32
    %c0_i32_76 = arith.constant 0 : i32
    %148 = tpu.memref_slice %arg1[%1, %c0_i32_74, %c0_i32_75, %c0_i32_76] : memref<1x16x8x128xf32, #tpu.memory_space<vmem>> -> memref<1x16x8x128xf32, #tpu.memory_space<vmem>>
    %149 = tpu.memref_squeeze %148 : memref<1x16x8x128xf32, #tpu.memory_space<vmem>> -> memref<16x8x128xf32, #tpu.memory_space<vmem>>
    %c8 = arith.constant 8 : index
    %c0_77 = arith.constant 0 : index
    %c0_78 = arith.constant 0 : index
    %150 = vector.load %149[%c8, %c0_77, %c0_78] : memref<16x8x128xf32, #tpu.memory_space<vmem>>, vector<1x8x128xf32>
    %151 = vector.shape_cast %150 : vector<1x8x128xf32> to vector<8x128xf32>
    %152 = vector.shape_cast %151 : vector<8x128xf32> to vector<8x1x128xf32>
    %153 = vector.shape_cast %151 : vector<8x128xf32> to vector<1x8x128xf32>
    %154 = vector.broadcast %152 : vector<8x1x128xf32> to vector<8x8x128xf32>
    %155 = vector.broadcast %153 : vector<1x8x128xf32> to vector<8x8x128xf32>
    %156 = arith.mulf %154, %155 : vector<8x8x128xf32>
    %157 = arith.addf %139, %156 : vector<8x8x128xf32>
    %c0_i32_79 = arith.constant 0 : i32
    %c0_i32_80 = arith.constant 0 : i32
    %158 = tpu.memref_slice %arg2[%1, %c0_i32_79, %c0_i32_80] : memref<1x16x128xf32, #tpu.memory_space<vmem>> -> memref<1x16x128xf32, #tpu.memory_space<vmem>>
    %159 = tpu.memref_squeeze %158 : memref<1x16x128xf32, #tpu.memory_space<vmem>> -> memref<16x128xf32, #tpu.memory_space<vmem>>
    %c8_81 = arith.constant 8 : index
    %c0_82 = arith.constant 0 : index
    %160 = vector.load %159[%c8_81, %c0_82] : memref<16x128xf32, #tpu.memory_space<vmem>>, vector<1x128xf32>
    %161 = vector.shape_cast %160 : vector<1x128xf32> to vector<128xf32>
    %162 = vector.shape_cast %161 : vector<128xf32> to vector<1x128xf32>
    %163 = vector.broadcast %162 : vector<1x128xf32> to vector<8x128xf32>
    %164 = arith.mulf %151, %163 : vector<8x128xf32>
    %165 = arith.addf %147, %164 : vector<8x128xf32>
    %c0_i32_83 = arith.constant 0 : i32
    %c0_i32_84 = arith.constant 0 : i32
    %c0_i32_85 = arith.constant 0 : i32
    %166 = tpu.memref_slice %arg1[%1, %c0_i32_83, %c0_i32_84, %c0_i32_85] : memref<1x16x8x128xf32, #tpu.memory_space<vmem>> -> memref<1x16x8x128xf32, #tpu.memory_space<vmem>>
    %167 = tpu.memref_squeeze %166 : memref<1x16x8x128xf32, #tpu.memory_space<vmem>> -> memref<16x8x128xf32, #tpu.memory_space<vmem>>
    %c9 = arith.constant 9 : index
    %c0_86 = arith.constant 0 : index
    %c0_87 = arith.constant 0 : index
    %168 = vector.load %167[%c9, %c0_86, %c0_87] : memref<16x8x128xf32, #tpu.memory_space<vmem>>, vector<1x8x128xf32>
    %169 = vector.shape_cast %168 : vector<1x8x128xf32> to vector<8x128xf32>
    %170 = vector.shape_cast %169 : vector<8x128xf32> to vector<8x1x128xf32>
    %171 = vector.shape_cast %169 : vector<8x128xf32> to vector<1x8x128xf32>
    %172 = vector.broadcast %170 : vector<8x1x128xf32> to vector<8x8x128xf32>
    %173 = vector.broadcast %171 : vector<1x8x128xf32> to vector<8x8x128xf32>
    %174 = arith.mulf %172, %173 : vector<8x8x128xf32>
    %175 = arith.addf %157, %174 : vector<8x8x128xf32>
    %c0_i32_88 = arith.constant 0 : i32
    %c0_i32_89 = arith.constant 0 : i32
    %176 = tpu.memref_slice %arg2[%1, %c0_i32_88, %c0_i32_89] : memref<1x16x128xf32, #tpu.memory_space<vmem>> -> memref<1x16x128xf32, #tpu.memory_space<vmem>>
    %177 = tpu.memref_squeeze %176 : memref<1x16x128xf32, #tpu.memory_space<vmem>> -> memref<16x128xf32, #tpu.memory_space<vmem>>
    %c9_90 = arith.constant 9 : index
    %c0_91 = arith.constant 0 : index
    %178 = vector.load %177[%c9_90, %c0_91] : memref<16x128xf32, #tpu.memory_space<vmem>>, vector<1x128xf32>
    %179 = vector.shape_cast %178 : vector<1x128xf32> to vector<128xf32>
    %180 = vector.shape_cast %179 : vector<128xf32> to vector<1x128xf32>
    %181 = vector.broadcast %180 : vector<1x128xf32> to vector<8x128xf32>
    %182 = arith.mulf %169, %181 : vector<8x128xf32>
    %183 = arith.addf %165, %182 : vector<8x128xf32>
    %c0_i32_92 = arith.constant 0 : i32
    %c0_i32_93 = arith.constant 0 : i32
    %c0_i32_94 = arith.constant 0 : i32
    %184 = tpu.memref_slice %arg1[%1, %c0_i32_92, %c0_i32_93, %c0_i32_94] : memref<1x16x8x128xf32, #tpu.memory_space<vmem>> -> memref<1x16x8x128xf32, #tpu.memory_space<vmem>>
    %185 = tpu.memref_squeeze %184 : memref<1x16x8x128xf32, #tpu.memory_space<vmem>> -> memref<16x8x128xf32, #tpu.memory_space<vmem>>
    %c10 = arith.constant 10 : index
    %c0_95 = arith.constant 0 : index
    %c0_96 = arith.constant 0 : index
    %186 = vector.load %185[%c10, %c0_95, %c0_96] : memref<16x8x128xf32, #tpu.memory_space<vmem>>, vector<1x8x128xf32>
    %187 = vector.shape_cast %186 : vector<1x8x128xf32> to vector<8x128xf32>
    %188 = vector.shape_cast %187 : vector<8x128xf32> to vector<8x1x128xf32>
    %189 = vector.shape_cast %187 : vector<8x128xf32> to vector<1x8x128xf32>
    %190 = vector.broadcast %188 : vector<8x1x128xf32> to vector<8x8x128xf32>
    %191 = vector.broadcast %189 : vector<1x8x128xf32> to vector<8x8x128xf32>
    %192 = arith.mulf %190, %191 : vector<8x8x128xf32>
    %193 = arith.addf %175, %192 : vector<8x8x128xf32>
    %c0_i32_97 = arith.constant 0 : i32
    %c0_i32_98 = arith.constant 0 : i32
    %194 = tpu.memref_slice %arg2[%1, %c0_i32_97, %c0_i32_98] : memref<1x16x128xf32, #tpu.memory_space<vmem>> -> memref<1x16x128xf32, #tpu.memory_space<vmem>>
    %195 = tpu.memref_squeeze %194 : memref<1x16x128xf32, #tpu.memory_space<vmem>> -> memref<16x128xf32, #tpu.memory_space<vmem>>
    %c10_99 = arith.constant 10 : index
    %c0_100 = arith.constant 0 : index
    %196 = vector.load %195[%c10_99, %c0_100] : memref<16x128xf32, #tpu.memory_space<vmem>>, vector<1x128xf32>
    %197 = vector.shape_cast %196 : vector<1x128xf32> to vector<128xf32>
    %198 = vector.shape_cast %197 : vector<128xf32> to vector<1x128xf32>
    %199 = vector.broadcast %198 : vector<1x128xf32> to vector<8x128xf32>
    %200 = arith.mulf %187, %199 : vector<8x128xf32>
    %201 = arith.addf %183, %200 : vector<8x128xf32>
    %c0_i32_101 = arith.constant 0 : i32
    %c0_i32_102 = arith.constant 0 : i32
    %c0_i32_103 = arith.constant 0 : i32
    %202 = tpu.memref_slice %arg1[%1, %c0_i32_101, %c0_i32_102, %c0_i32_103] : memref<1x16x8x128xf32, #tpu.memory_space<vmem>> -> memref<1x16x8x128xf32, #tpu.memory_space<vmem>>
    %203 = tpu.memref_squeeze %202 : memref<1x16x8x128xf32, #tpu.memory_space<vmem>> -> memref<16x8x128xf32, #tpu.memory_space<vmem>>
    %c11 = arith.constant 11 : index
    %c0_104 = arith.constant 0 : index
    %c0_105 = arith.constant 0 : index
    %204 = vector.load %203[%c11, %c0_104, %c0_105] : memref<16x8x128xf32, #tpu.memory_space<vmem>>, vector<1x8x128xf32>
    %205 = vector.shape_cast %204 : vector<1x8x128xf32> to vector<8x128xf32>
    %206 = vector.shape_cast %205 : vector<8x128xf32> to vector<8x1x128xf32>
    %207 = vector.shape_cast %205 : vector<8x128xf32> to vector<1x8x128xf32>
    %208 = vector.broadcast %206 : vector<8x1x128xf32> to vector<8x8x128xf32>
    %209 = vector.broadcast %207 : vector<1x8x128xf32> to vector<8x8x128xf32>
    %210 = arith.mulf %208, %209 : vector<8x8x128xf32>
    %211 = arith.addf %193, %210 : vector<8x8x128xf32>
    %c0_i32_106 = arith.constant 0 : i32
    %c0_i32_107 = arith.constant 0 : i32
    %212 = tpu.memref_slice %arg2[%1, %c0_i32_106, %c0_i32_107] : memref<1x16x128xf32, #tpu.memory_space<vmem>> -> memref<1x16x128xf32, #tpu.memory_space<vmem>>
    %213 = tpu.memref_squeeze %212 : memref<1x16x128xf32, #tpu.memory_space<vmem>> -> memref<16x128xf32, #tpu.memory_space<vmem>>
    %c11_108 = arith.constant 11 : index
    %c0_109 = arith.constant 0 : index
    %214 = vector.load %213[%c11_108, %c0_109] : memref<16x128xf32, #tpu.memory_space<vmem>>, vector<1x128xf32>
    %215 = vector.shape_cast %214 : vector<1x128xf32> to vector<128xf32>
    %216 = vector.shape_cast %215 : vector<128xf32> to vector<1x128xf32>
    %217 = vector.broadcast %216 : vector<1x128xf32> to vector<8x128xf32>
    %218 = arith.mulf %205, %217 : vector<8x128xf32>
    %219 = arith.addf %201, %218 : vector<8x128xf32>
    %c0_i32_110 = arith.constant 0 : i32
    %c0_i32_111 = arith.constant 0 : i32
    %c0_i32_112 = arith.constant 0 : i32
    %220 = tpu.memref_slice %arg1[%1, %c0_i32_110, %c0_i32_111, %c0_i32_112] : memref<1x16x8x128xf32, #tpu.memory_space<vmem>> -> memref<1x16x8x128xf32, #tpu.memory_space<vmem>>
    %221 = tpu.memref_squeeze %220 : memref<1x16x8x128xf32, #tpu.memory_space<vmem>> -> memref<16x8x128xf32, #tpu.memory_space<vmem>>
    %c12 = arith.constant 12 : index
    %c0_113 = arith.constant 0 : index
    %c0_114 = arith.constant 0 : index
    %222 = vector.load %221[%c12, %c0_113, %c0_114] : memref<16x8x128xf32, #tpu.memory_space<vmem>>, vector<1x8x128xf32>
    %223 = vector.shape_cast %222 : vector<1x8x128xf32> to vector<8x128xf32>
    %224 = vector.shape_cast %223 : vector<8x128xf32> to vector<8x1x128xf32>
    %225 = vector.shape_cast %223 : vector<8x128xf32> to vector<1x8x128xf32>
    %226 = vector.broadcast %224 : vector<8x1x128xf32> to vector<8x8x128xf32>
    %227 = vector.broadcast %225 : vector<1x8x128xf32> to vector<8x8x128xf32>
    %228 = arith.mulf %226, %227 : vector<8x8x128xf32>
    %229 = arith.addf %211, %228 : vector<8x8x128xf32>
    %c0_i32_115 = arith.constant 0 : i32
    %c0_i32_116 = arith.constant 0 : i32
    %230 = tpu.memref_slice %arg2[%1, %c0_i32_115, %c0_i32_116] : memref<1x16x128xf32, #tpu.memory_space<vmem>> -> memref<1x16x128xf32, #tpu.memory_space<vmem>>
    %231 = tpu.memref_squeeze %230 : memref<1x16x128xf32, #tpu.memory_space<vmem>> -> memref<16x128xf32, #tpu.memory_space<vmem>>
    %c12_117 = arith.constant 12 : index
    %c0_118 = arith.constant 0 : index
    %232 = vector.load %231[%c12_117, %c0_118] : memref<16x128xf32, #tpu.memory_space<vmem>>, vector<1x128xf32>
    %233 = vector.shape_cast %232 : vector<1x128xf32> to vector<128xf32>
    %234 = vector.shape_cast %233 : vector<128xf32> to vector<1x128xf32>
    %235 = vector.broadcast %234 : vector<1x128xf32> to vector<8x128xf32>
    %236 = arith.mulf %223, %235 : vector<8x128xf32>
    %237 = arith.addf %219, %236 : vector<8x128xf32>
    %c0_i32_119 = arith.constant 0 : i32
    %c0_i32_120 = arith.constant 0 : i32
    %c0_i32_121 = arith.constant 0 : i32
    %238 = tpu.memref_slice %arg1[%1, %c0_i32_119, %c0_i32_120, %c0_i32_121] : memref<1x16x8x128xf32, #tpu.memory_space<vmem>> -> memref<1x16x8x128xf32, #tpu.memory_space<vmem>>
    %239 = tpu.memref_squeeze %238 : memref<1x16x8x128xf32, #tpu.memory_space<vmem>> -> memref<16x8x128xf32, #tpu.memory_space<vmem>>
    %c13 = arith.constant 13 : index
    %c0_122 = arith.constant 0 : index
    %c0_123 = arith.constant 0 : index
    %240 = vector.load %239[%c13, %c0_122, %c0_123] : memref<16x8x128xf32, #tpu.memory_space<vmem>>, vector<1x8x128xf32>
    %241 = vector.shape_cast %240 : vector<1x8x128xf32> to vector<8x128xf32>
    %242 = vector.shape_cast %241 : vector<8x128xf32> to vector<8x1x128xf32>
    %243 = vector.shape_cast %241 : vector<8x128xf32> to vector<1x8x128xf32>
    %244 = vector.broadcast %242 : vector<8x1x128xf32> to vector<8x8x128xf32>
    %245 = vector.broadcast %243 : vector<1x8x128xf32> to vector<8x8x128xf32>
    %246 = arith.mulf %244, %245 : vector<8x8x128xf32>
    %247 = arith.addf %229, %246 : vector<8x8x128xf32>
    %c0_i32_124 = arith.constant 0 : i32
    %c0_i32_125 = arith.constant 0 : i32
    %248 = tpu.memref_slice %arg2[%1, %c0_i32_124, %c0_i32_125] : memref<1x16x128xf32, #tpu.memory_space<vmem>> -> memref<1x16x128xf32, #tpu.memory_space<vmem>>
    %249 = tpu.memref_squeeze %248 : memref<1x16x128xf32, #tpu.memory_space<vmem>> -> memref<16x128xf32, #tpu.memory_space<vmem>>
    %c13_126 = arith.constant 13 : index
    %c0_127 = arith.constant 0 : index
    %250 = vector.load %249[%c13_126, %c0_127] : memref<16x128xf32, #tpu.memory_space<vmem>>, vector<1x128xf32>
    %251 = vector.shape_cast %250 : vector<1x128xf32> to vector<128xf32>
    %252 = vector.shape_cast %251 : vector<128xf32> to vector<1x128xf32>
    %253 = vector.broadcast %252 : vector<1x128xf32> to vector<8x128xf32>
    %254 = arith.mulf %241, %253 : vector<8x128xf32>
    %255 = arith.addf %237, %254 : vector<8x128xf32>
    %c0_i32_128 = arith.constant 0 : i32
    %c0_i32_129 = arith.constant 0 : i32
    %c0_i32_130 = arith.constant 0 : i32
    %256 = tpu.memref_slice %arg1[%1, %c0_i32_128, %c0_i32_129, %c0_i32_130] : memref<1x16x8x128xf32, #tpu.memory_space<vmem>> -> memref<1x16x8x128xf32, #tpu.memory_space<vmem>>
    %257 = tpu.memref_squeeze %256 : memref<1x16x8x128xf32, #tpu.memory_space<vmem>> -> memref<16x8x128xf32, #tpu.memory_space<vmem>>
    %c14 = arith.constant 14 : index
    %c0_131 = arith.constant 0 : index
    %c0_132 = arith.constant 0 : index
    %258 = vector.load %257[%c14, %c0_131, %c0_132] : memref<16x8x128xf32, #tpu.memory_space<vmem>>, vector<1x8x128xf32>
    %259 = vector.shape_cast %258 : vector<1x8x128xf32> to vector<8x128xf32>
    %260 = vector.shape_cast %259 : vector<8x128xf32> to vector<8x1x128xf32>
    %261 = vector.shape_cast %259 : vector<8x128xf32> to vector<1x8x128xf32>
    %262 = vector.broadcast %260 : vector<8x1x128xf32> to vector<8x8x128xf32>
    %263 = vector.broadcast %261 : vector<1x8x128xf32> to vector<8x8x128xf32>
    %264 = arith.mulf %262, %263 : vector<8x8x128xf32>
    %265 = arith.addf %247, %264 : vector<8x8x128xf32>
    %c0_i32_133 = arith.constant 0 : i32
    %c0_i32_134 = arith.constant 0 : i32
    %266 = tpu.memref_slice %arg2[%1, %c0_i32_133, %c0_i32_134] : memref<1x16x128xf32, #tpu.memory_space<vmem>> -> memref<1x16x128xf32, #tpu.memory_space<vmem>>
    %267 = tpu.memref_squeeze %266 : memref<1x16x128xf32, #tpu.memory_space<vmem>> -> memref<16x128xf32, #tpu.memory_space<vmem>>
    %c14_135 = arith.constant 14 : index
    %c0_136 = arith.constant 0 : index
    %268 = vector.load %267[%c14_135, %c0_136] : memref<16x128xf32, #tpu.memory_space<vmem>>, vector<1x128xf32>
    %269 = vector.shape_cast %268 : vector<1x128xf32> to vector<128xf32>
    %270 = vector.shape_cast %269 : vector<128xf32> to vector<1x128xf32>
    %271 = vector.broadcast %270 : vector<1x128xf32> to vector<8x128xf32>
    %272 = arith.mulf %259, %271 : vector<8x128xf32>
    %273 = arith.addf %255, %272 : vector<8x128xf32>
    %c0_i32_137 = arith.constant 0 : i32
    %c0_i32_138 = arith.constant 0 : i32
    %c0_i32_139 = arith.constant 0 : i32
    %274 = tpu.memref_slice %arg1[%1, %c0_i32_137, %c0_i32_138, %c0_i32_139] : memref<1x16x8x128xf32, #tpu.memory_space<vmem>> -> memref<1x16x8x128xf32, #tpu.memory_space<vmem>>
    %275 = tpu.memref_squeeze %274 : memref<1x16x8x128xf32, #tpu.memory_space<vmem>> -> memref<16x8x128xf32, #tpu.memory_space<vmem>>
    %c15 = arith.constant 15 : index
    %c0_140 = arith.constant 0 : index
    %c0_141 = arith.constant 0 : index
    %276 = vector.load %275[%c15, %c0_140, %c0_141] : memref<16x8x128xf32, #tpu.memory_space<vmem>>, vector<1x8x128xf32>
    %277 = vector.shape_cast %276 : vector<1x8x128xf32> to vector<8x128xf32>
    %278 = vector.shape_cast %277 : vector<8x128xf32> to vector<8x1x128xf32>
    %279 = vector.shape_cast %277 : vector<8x128xf32> to vector<1x8x128xf32>
    %280 = vector.broadcast %278 : vector<8x1x128xf32> to vector<8x8x128xf32>
    %281 = vector.broadcast %279 : vector<1x8x128xf32> to vector<8x8x128xf32>
    %282 = arith.mulf %280, %281 : vector<8x8x128xf32>
    %283 = arith.addf %265, %282 : vector<8x8x128xf32>
    %c0_i32_142 = arith.constant 0 : i32
    %c0_i32_143 = arith.constant 0 : i32
    %284 = tpu.memref_slice %arg2[%1, %c0_i32_142, %c0_i32_143] : memref<1x16x128xf32, #tpu.memory_space<vmem>> -> memref<1x16x128xf32, #tpu.memory_space<vmem>>
    %285 = tpu.memref_squeeze %284 : memref<1x16x128xf32, #tpu.memory_space<vmem>> -> memref<16x128xf32, #tpu.memory_space<vmem>>
    %c15_144 = arith.constant 15 : index
    %c0_145 = arith.constant 0 : index
    %286 = vector.load %285[%c15_144, %c0_145] : memref<16x128xf32, #tpu.memory_space<vmem>>, vector<1x128xf32>
    %287 = vector.shape_cast %286 : vector<1x128xf32> to vector<128xf32>
    %288 = vector.shape_cast %287 : vector<128xf32> to vector<1x128xf32>
    %289 = vector.broadcast %288 : vector<1x128xf32> to vector<8x128xf32>
    %290 = arith.mulf %277, %289 : vector<8x128xf32>
    %291 = arith.addf %273, %290 : vector<8x128xf32>
    %292 = vector.extract_strided_slice %283 {offsets = [0, 0, 0], sizes = [1, 8, 128], strides = [1, 1, 1]} : vector<8x8x128xf32> to vector<1x8x128xf32>
    %293 = vector.shape_cast %292 : vector<1x8x128xf32> to vector<8x128xf32>
    %294 = vector.extract_strided_slice %283 {offsets = [1, 0, 0], sizes = [1, 8, 128], strides = [1, 1, 1]} : vector<8x8x128xf32> to vector<1x8x128xf32>
    %295 = vector.shape_cast %294 : vector<1x8x128xf32> to vector<8x128xf32>
    %296 = vector.extract_strided_slice %283 {offsets = [2, 0, 0], sizes = [1, 8, 128], strides = [1, 1, 1]} : vector<8x8x128xf32> to vector<1x8x128xf32>
    %297 = vector.shape_cast %296 : vector<1x8x128xf32> to vector<8x128xf32>
    %298 = vector.extract_strided_slice %283 {offsets = [3, 0, 0], sizes = [1, 8, 128], strides = [1, 1, 1]} : vector<8x8x128xf32> to vector<1x8x128xf32>
    %299 = vector.shape_cast %298 : vector<1x8x128xf32> to vector<8x128xf32>
    %300 = vector.extract_strided_slice %283 {offsets = [4, 0, 0], sizes = [1, 8, 128], strides = [1, 1, 1]} : vector<8x8x128xf32> to vector<1x8x128xf32>
    %301 = vector.shape_cast %300 : vector<1x8x128xf32> to vector<8x128xf32>
    %302 = vector.extract_strided_slice %283 {offsets = [5, 0, 0], sizes = [1, 8, 128], strides = [1, 1, 1]} : vector<8x8x128xf32> to vector<1x8x128xf32>
    %303 = vector.shape_cast %302 : vector<1x8x128xf32> to vector<8x128xf32>
    %304 = vector.extract_strided_slice %283 {offsets = [6, 0, 0], sizes = [1, 8, 128], strides = [1, 1, 1]} : vector<8x8x128xf32> to vector<1x8x128xf32>
    %305 = vector.shape_cast %304 : vector<1x8x128xf32> to vector<8x128xf32>
    %306 = vector.extract_strided_slice %283 {offsets = [7, 0, 0], sizes = [1, 8, 128], strides = [1, 1, 1]} : vector<8x8x128xf32> to vector<1x8x128xf32>
    %307 = vector.shape_cast %306 : vector<1x8x128xf32> to vector<8x128xf32>
    %308 = vector.extract_strided_slice %291 {offsets = [0, 0], sizes = [1, 128], strides = [1, 1]} : vector<8x128xf32> to vector<1x128xf32>
    %309 = vector.shape_cast %308 : vector<1x128xf32> to vector<128xf32>
    %310 = vector.shape_cast %309 : vector<128xf32> to vector<1x128xf32>
    %311 = vector.extract_strided_slice %291 {offsets = [1, 0], sizes = [1, 128], strides = [1, 1]} : vector<8x128xf32> to vector<1x128xf32>
    %312 = vector.shape_cast %311 : vector<1x128xf32> to vector<128xf32>
    %313 = vector.shape_cast %312 : vector<128xf32> to vector<1x128xf32>
    %314 = vector.extract_strided_slice %291 {offsets = [2, 0], sizes = [1, 128], strides = [1, 1]} : vector<8x128xf32> to vector<1x128xf32>
    %315 = vector.shape_cast %314 : vector<1x128xf32> to vector<128xf32>
    %316 = vector.shape_cast %315 : vector<128xf32> to vector<1x128xf32>
    %317 = vector.extract_strided_slice %291 {offsets = [3, 0], sizes = [1, 128], strides = [1, 1]} : vector<8x128xf32> to vector<1x128xf32>
    %318 = vector.shape_cast %317 : vector<1x128xf32> to vector<128xf32>
    %319 = vector.shape_cast %318 : vector<128xf32> to vector<1x128xf32>
    %320 = vector.extract_strided_slice %291 {offsets = [4, 0], sizes = [1, 128], strides = [1, 1]} : vector<8x128xf32> to vector<1x128xf32>
    %321 = vector.shape_cast %320 : vector<1x128xf32> to vector<128xf32>
    %322 = vector.shape_cast %321 : vector<128xf32> to vector<1x128xf32>
    %323 = vector.extract_strided_slice %291 {offsets = [5, 0], sizes = [1, 128], strides = [1, 1]} : vector<8x128xf32> to vector<1x128xf32>
    %324 = vector.shape_cast %323 : vector<1x128xf32> to vector<128xf32>
    %325 = vector.shape_cast %324 : vector<128xf32> to vector<1x128xf32>
    %326 = vector.extract_strided_slice %291 {offsets = [6, 0], sizes = [1, 128], strides = [1, 1]} : vector<8x128xf32> to vector<1x128xf32>
    %327 = vector.shape_cast %326 : vector<1x128xf32> to vector<128xf32>
    %328 = vector.shape_cast %327 : vector<128xf32> to vector<1x128xf32>
    %329 = vector.extract_strided_slice %291 {offsets = [7, 0], sizes = [1, 128], strides = [1, 1]} : vector<8x128xf32> to vector<1x128xf32>
    %330 = vector.shape_cast %329 : vector<1x128xf32> to vector<128xf32>
    %331 = vector.shape_cast %330 : vector<128xf32> to vector<1x128xf32>
    %332 = vector.extract_strided_slice %293 {offsets = [0, 0], sizes = [1, 128], strides = [1, 1]} : vector<8x128xf32> to vector<1x128xf32>
    %333 = tpu.reciprocal %332 {approx = true} : vector<1x128xf32> -> vector<1x128xf32>
    %334 = arith.mulf %332, %333 : vector<1x128xf32>
    %cst_146 = arith.constant 2.000000e+00 : f32
    %335 = vector.broadcast %cst_146 : f32 to vector<1x128xf32>
    %336 = arith.subf %335, %334 : vector<1x128xf32>
    %337 = arith.mulf %333, %336 : vector<1x128xf32>
    %338 = arith.mulf %332, %337 : vector<1x128xf32>
    %cst_147 = arith.constant 2.000000e+00 : f32
    %339 = vector.broadcast %cst_147 : f32 to vector<1x128xf32>
    %340 = arith.subf %339, %338 : vector<1x128xf32>
    %341 = arith.mulf %337, %340 : vector<1x128xf32>
    %342 = vector.broadcast %341 : vector<1x128xf32> to vector<8x128xf32>
    %343 = arith.mulf %293, %342 : vector<8x128xf32>
    %344 = arith.mulf %310, %341 : vector<1x128xf32>
    %345 = vector.extract_strided_slice %295 {offsets = [0, 0], sizes = [1, 128], strides = [1, 1]} : vector<8x128xf32> to vector<1x128xf32>
    %346 = vector.broadcast %345 : vector<1x128xf32> to vector<8x128xf32>
    %347 = arith.mulf %346, %343 : vector<8x128xf32>
    %348 = arith.subf %295, %347 : vector<8x128xf32>
    %349 = arith.mulf %345, %344 : vector<1x128xf32>
    %350 = arith.subf %313, %349 : vector<1x128xf32>
    %351 = vector.extract_strided_slice %297 {offsets = [0, 0], sizes = [1, 128], strides = [1, 1]} : vector<8x128xf32> to vector<1x128xf32>
    %352 = vector.broadcast %351 : vector<1x128xf32> to vector<8x128xf32>
    %353 = arith.mulf %352, %343 : vector<8x128xf32>
    %354 = arith.subf %297, %353 : vector<8x128xf32>
    %355 = arith.mulf %351, %344 : vector<1x128xf32>
    %356 = arith.subf %316, %355 : vector<1x128xf32>
    %357 = vector.extract_strided_slice %299 {offsets = [0, 0], sizes = [1, 128], strides = [1, 1]} : vector<8x128xf32> to vector<1x128xf32>
    %358 = vector.broadcast %357 : vector<1x128xf32> to vector<8x128xf32>
    %359 = arith.mulf %358, %343 : vector<8x128xf32>
    %360 = arith.subf %299, %359 : vector<8x128xf32>
    %361 = arith.mulf %357, %344 : vector<1x128xf32>
    %362 = arith.subf %319, %361 : vector<1x128xf32>
    %363 = vector.extract_strided_slice %301 {offsets = [0, 0], sizes = [1, 128], strides = [1, 1]} : vector<8x128xf32> to vector<1x128xf32>
    %364 = vector.broadcast %363 : vector<1x128xf32> to vector<8x128xf32>
    %365 = arith.mulf %364, %343 : vector<8x128xf32>
    %366 = arith.subf %301, %365 : vector<8x128xf32>
    %367 = arith.mulf %363, %344 : vector<1x128xf32>
    %368 = arith.subf %322, %367 : vector<1x128xf32>
    %369 = vector.extract_strided_slice %303 {offsets = [0, 0], sizes = [1, 128], strides = [1, 1]} : vector<8x128xf32> to vector<1x128xf32>
    %370 = vector.broadcast %369 : vector<1x128xf32> to vector<8x128xf32>
    %371 = arith.mulf %370, %343 : vector<8x128xf32>
    %372 = arith.subf %303, %371 : vector<8x128xf32>
    %373 = arith.mulf %369, %344 : vector<1x128xf32>
    %374 = arith.subf %325, %373 : vector<1x128xf32>
    %375 = vector.extract_strided_slice %305 {offsets = [0, 0], sizes = [1, 128], strides = [1, 1]} : vector<8x128xf32> to vector<1x128xf32>
    %376 = vector.broadcast %375 : vector<1x128xf32> to vector<8x128xf32>
    %377 = arith.mulf %376, %343 : vector<8x128xf32>
    %378 = arith.subf %305, %377 : vector<8x128xf32>
    %379 = arith.mulf %375, %344 : vector<1x128xf32>
    %380 = arith.subf %328, %379 : vector<1x128xf32>
    %381 = vector.extract_strided_slice %307 {offsets = [0, 0], sizes = [1, 128], strides = [1, 1]} : vector<8x128xf32> to vector<1x128xf32>
    %382 = vector.broadcast %381 : vector<1x128xf32> to vector<8x128xf32>
    %383 = arith.mulf %382, %343 : vector<8x128xf32>
    %384 = arith.subf %307, %383 : vector<8x128xf32>
    %385 = arith.mulf %381, %344 : vector<1x128xf32>
    %386 = arith.subf %331, %385 : vector<1x128xf32>
    %387 = vector.extract_strided_slice %348 {offsets = [1, 0], sizes = [1, 128], strides = [1, 1]} : vector<8x128xf32> to vector<1x128xf32>
    %388 = tpu.reciprocal %387 {approx = true} : vector<1x128xf32> -> vector<1x128xf32>
    %389 = arith.mulf %387, %388 : vector<1x128xf32>
    %cst_148 = arith.constant 2.000000e+00 : f32
    %390 = vector.broadcast %cst_148 : f32 to vector<1x128xf32>
    %391 = arith.subf %390, %389 : vector<1x128xf32>
    %392 = arith.mulf %388, %391 : vector<1x128xf32>
    %393 = arith.mulf %387, %392 : vector<1x128xf32>
    %cst_149 = arith.constant 2.000000e+00 : f32
    %394 = vector.broadcast %cst_149 : f32 to vector<1x128xf32>
    %395 = arith.subf %394, %393 : vector<1x128xf32>
    %396 = arith.mulf %392, %395 : vector<1x128xf32>
    %397 = vector.broadcast %396 : vector<1x128xf32> to vector<8x128xf32>
    %398 = arith.mulf %348, %397 : vector<8x128xf32>
    %399 = arith.mulf %350, %396 : vector<1x128xf32>
    %400 = vector.extract_strided_slice %343 {offsets = [1, 0], sizes = [1, 128], strides = [1, 1]} : vector<8x128xf32> to vector<1x128xf32>
    %401 = vector.broadcast %400 : vector<1x128xf32> to vector<8x128xf32>
    %402 = arith.mulf %401, %398 : vector<8x128xf32>
    %403 = arith.subf %343, %402 : vector<8x128xf32>
    %404 = arith.mulf %400, %399 : vector<1x128xf32>
    %405 = arith.subf %344, %404 : vector<1x128xf32>
    %406 = vector.extract_strided_slice %354 {offsets = [1, 0], sizes = [1, 128], strides = [1, 1]} : vector<8x128xf32> to vector<1x128xf32>
    %407 = vector.broadcast %406 : vector<1x128xf32> to vector<8x128xf32>
    %408 = arith.mulf %407, %398 : vector<8x128xf32>
    %409 = arith.subf %354, %408 : vector<8x128xf32>
    %410 = arith.mulf %406, %399 : vector<1x128xf32>
    %411 = arith.subf %356, %410 : vector<1x128xf32>
    %412 = vector.extract_strided_slice %360 {offsets = [1, 0], sizes = [1, 128], strides = [1, 1]} : vector<8x128xf32> to vector<1x128xf32>
    %413 = vector.broadcast %412 : vector<1x128xf32> to vector<8x128xf32>
    %414 = arith.mulf %413, %398 : vector<8x128xf32>
    %415 = arith.subf %360, %414 : vector<8x128xf32>
    %416 = arith.mulf %412, %399 : vector<1x128xf32>
    %417 = arith.subf %362, %416 : vector<1x128xf32>
    %418 = vector.extract_strided_slice %366 {offsets = [1, 0], sizes = [1, 128], strides = [1, 1]} : vector<8x128xf32> to vector<1x128xf32>
    %419 = vector.broadcast %418 : vector<1x128xf32> to vector<8x128xf32>
    %420 = arith.mulf %419, %398 : vector<8x128xf32>
    %421 = arith.subf %366, %420 : vector<8x128xf32>
    %422 = arith.mulf %418, %399 : vector<1x128xf32>
    %423 = arith.subf %368, %422 : vector<1x128xf32>
    %424 = vector.extract_strided_slice %372 {offsets = [1, 0], sizes = [1, 128], strides = [1, 1]} : vector<8x128xf32> to vector<1x128xf32>
    %425 = vector.broadcast %424 : vector<1x128xf32> to vector<8x128xf32>
    %426 = arith.mulf %425, %398 : vector<8x128xf32>
    %427 = arith.subf %372, %426 : vector<8x128xf32>
    %428 = arith.mulf %424, %399 : vector<1x128xf32>
    %429 = arith.subf %374, %428 : vector<1x128xf32>
    %430 = vector.extract_strided_slice %378 {offsets = [1, 0], sizes = [1, 128], strides = [1, 1]} : vector<8x128xf32> to vector<1x128xf32>
    %431 = vector.broadcast %430 : vector<1x128xf32> to vector<8x128xf32>
    %432 = arith.mulf %431, %398 : vector<8x128xf32>
    %433 = arith.subf %378, %432 : vector<8x128xf32>
    %434 = arith.mulf %430, %399 : vector<1x128xf32>
    %435 = arith.subf %380, %434 : vector<1x128xf32>
    %436 = vector.extract_strided_slice %384 {offsets = [1, 0], sizes = [1, 128], strides = [1, 1]} : vector<8x128xf32> to vector<1x128xf32>
    %437 = vector.broadcast %436 : vector<1x128xf32> to vector<8x128xf32>
    %438 = arith.mulf %437, %398 : vector<8x128xf32>
    %439 = arith.subf %384, %438 : vector<8x128xf32>
    %440 = arith.mulf %436, %399 : vector<1x128xf32>
    %441 = arith.subf %386, %440 : vector<1x128xf32>
    %442 = vector.extract_strided_slice %409 {offsets = [2, 0], sizes = [1, 128], strides = [1, 1]} : vector<8x128xf32> to vector<1x128xf32>
    %443 = tpu.reciprocal %442 {approx = true} : vector<1x128xf32> -> vector<1x128xf32>
    %444 = arith.mulf %442, %443 : vector<1x128xf32>
    %cst_150 = arith.constant 2.000000e+00 : f32
    %445 = vector.broadcast %cst_150 : f32 to vector<1x128xf32>
    %446 = arith.subf %445, %444 : vector<1x128xf32>
    %447 = arith.mulf %443, %446 : vector<1x128xf32>
    %448 = arith.mulf %442, %447 : vector<1x128xf32>
    %cst_151 = arith.constant 2.000000e+00 : f32
    %449 = vector.broadcast %cst_151 : f32 to vector<1x128xf32>
    %450 = arith.subf %449, %448 : vector<1x128xf32>
    %451 = arith.mulf %447, %450 : vector<1x128xf32>
    %452 = vector.broadcast %451 : vector<1x128xf32> to vector<8x128xf32>
    %453 = arith.mulf %409, %452 : vector<8x128xf32>
    %454 = arith.mulf %411, %451 : vector<1x128xf32>
    %455 = vector.extract_strided_slice %403 {offsets = [2, 0], sizes = [1, 128], strides = [1, 1]} : vector<8x128xf32> to vector<1x128xf32>
    %456 = vector.broadcast %455 : vector<1x128xf32> to vector<8x128xf32>
    %457 = arith.mulf %456, %453 : vector<8x128xf32>
    %458 = arith.subf %403, %457 : vector<8x128xf32>
    %459 = arith.mulf %455, %454 : vector<1x128xf32>
    %460 = arith.subf %405, %459 : vector<1x128xf32>
    %461 = vector.extract_strided_slice %398 {offsets = [2, 0], sizes = [1, 128], strides = [1, 1]} : vector<8x128xf32> to vector<1x128xf32>
    %462 = vector.broadcast %461 : vector<1x128xf32> to vector<8x128xf32>
    %463 = arith.mulf %462, %453 : vector<8x128xf32>
    %464 = arith.subf %398, %463 : vector<8x128xf32>
    %465 = arith.mulf %461, %454 : vector<1x128xf32>
    %466 = arith.subf %399, %465 : vector<1x128xf32>
    %467 = vector.extract_strided_slice %415 {offsets = [2, 0], sizes = [1, 128], strides = [1, 1]} : vector<8x128xf32> to vector<1x128xf32>
    %468 = vector.broadcast %467 : vector<1x128xf32> to vector<8x128xf32>
    %469 = arith.mulf %468, %453 : vector<8x128xf32>
    %470 = arith.subf %415, %469 : vector<8x128xf32>
    %471 = arith.mulf %467, %454 : vector<1x128xf32>
    %472 = arith.subf %417, %471 : vector<1x128xf32>
    %473 = vector.extract_strided_slice %421 {offsets = [2, 0], sizes = [1, 128], strides = [1, 1]} : vector<8x128xf32> to vector<1x128xf32>
    %474 = vector.broadcast %473 : vector<1x128xf32> to vector<8x128xf32>
    %475 = arith.mulf %474, %453 : vector<8x128xf32>
    %476 = arith.subf %421, %475 : vector<8x128xf32>
    %477 = arith.mulf %473, %454 : vector<1x128xf32>
    %478 = arith.subf %423, %477 : vector<1x128xf32>
    %479 = vector.extract_strided_slice %427 {offsets = [2, 0], sizes = [1, 128], strides = [1, 1]} : vector<8x128xf32> to vector<1x128xf32>
    %480 = vector.broadcast %479 : vector<1x128xf32> to vector<8x128xf32>
    %481 = arith.mulf %480, %453 : vector<8x128xf32>
    %482 = arith.subf %427, %481 : vector<8x128xf32>
    %483 = arith.mulf %479, %454 : vector<1x128xf32>
    %484 = arith.subf %429, %483 : vector<1x128xf32>
    %485 = vector.extract_strided_slice %433 {offsets = [2, 0], sizes = [1, 128], strides = [1, 1]} : vector<8x128xf32> to vector<1x128xf32>
    %486 = vector.broadcast %485 : vector<1x128xf32> to vector<8x128xf32>
    %487 = arith.mulf %486, %453 : vector<8x128xf32>
    %488 = arith.subf %433, %487 : vector<8x128xf32>
    %489 = arith.mulf %485, %454 : vector<1x128xf32>
    %490 = arith.subf %435, %489 : vector<1x128xf32>
    %491 = vector.extract_strided_slice %439 {offsets = [2, 0], sizes = [1, 128], strides = [1, 1]} : vector<8x128xf32> to vector<1x128xf32>
    %492 = vector.broadcast %491 : vector<1x128xf32> to vector<8x128xf32>
    %493 = arith.mulf %492, %453 : vector<8x128xf32>
    %494 = arith.subf %439, %493 : vector<8x128xf32>
    %495 = arith.mulf %491, %454 : vector<1x128xf32>
    %496 = arith.subf %441, %495 : vector<1x128xf32>
    %497 = vector.extract_strided_slice %470 {offsets = [3, 0], sizes = [1, 128], strides = [1, 1]} : vector<8x128xf32> to vector<1x128xf32>
    %498 = tpu.reciprocal %497 {approx = true} : vector<1x128xf32> -> vector<1x128xf32>
    %499 = arith.mulf %497, %498 : vector<1x128xf32>
    %cst_152 = arith.constant 2.000000e+00 : f32
    %500 = vector.broadcast %cst_152 : f32 to vector<1x128xf32>
    %501 = arith.subf %500, %499 : vector<1x128xf32>
    %502 = arith.mulf %498, %501 : vector<1x128xf32>
    %503 = arith.mulf %497, %502 : vector<1x128xf32>
    %cst_153 = arith.constant 2.000000e+00 : f32
    %504 = vector.broadcast %cst_153 : f32 to vector<1x128xf32>
    %505 = arith.subf %504, %503 : vector<1x128xf32>
    %506 = arith.mulf %502, %505 : vector<1x128xf32>
    %507 = vector.broadcast %506 : vector<1x128xf32> to vector<8x128xf32>
    %508 = arith.mulf %470, %507 : vector<8x128xf32>
    %509 = arith.mulf %472, %506 : vector<1x128xf32>
    %510 = vector.extract_strided_slice %458 {offsets = [3, 0], sizes = [1, 128], strides = [1, 1]} : vector<8x128xf32> to vector<1x128xf32>
    %511 = vector.broadcast %510 : vector<1x128xf32> to vector<8x128xf32>
    %512 = arith.mulf %511, %508 : vector<8x128xf32>
    %513 = arith.subf %458, %512 : vector<8x128xf32>
    %514 = arith.mulf %510, %509 : vector<1x128xf32>
    %515 = arith.subf %460, %514 : vector<1x128xf32>
    %516 = vector.extract_strided_slice %464 {offsets = [3, 0], sizes = [1, 128], strides = [1, 1]} : vector<8x128xf32> to vector<1x128xf32>
    %517 = vector.broadcast %516 : vector<1x128xf32> to vector<8x128xf32>
    %518 = arith.mulf %517, %508 : vector<8x128xf32>
    %519 = arith.subf %464, %518 : vector<8x128xf32>
    %520 = arith.mulf %516, %509 : vector<1x128xf32>
    %521 = arith.subf %466, %520 : vector<1x128xf32>
    %522 = vector.extract_strided_slice %453 {offsets = [3, 0], sizes = [1, 128], strides = [1, 1]} : vector<8x128xf32> to vector<1x128xf32>
    %523 = vector.broadcast %522 : vector<1x128xf32> to vector<8x128xf32>
    %524 = arith.mulf %523, %508 : vector<8x128xf32>
    %525 = arith.subf %453, %524 : vector<8x128xf32>
    %526 = arith.mulf %522, %509 : vector<1x128xf32>
    %527 = arith.subf %454, %526 : vector<1x128xf32>
    %528 = vector.extract_strided_slice %476 {offsets = [3, 0], sizes = [1, 128], strides = [1, 1]} : vector<8x128xf32> to vector<1x128xf32>
    %529 = vector.broadcast %528 : vector<1x128xf32> to vector<8x128xf32>
    %530 = arith.mulf %529, %508 : vector<8x128xf32>
    %531 = arith.subf %476, %530 : vector<8x128xf32>
    %532 = arith.mulf %528, %509 : vector<1x128xf32>
    %533 = arith.subf %478, %532 : vector<1x128xf32>
    %534 = vector.extract_strided_slice %482 {offsets = [3, 0], sizes = [1, 128], strides = [1, 1]} : vector<8x128xf32> to vector<1x128xf32>
    %535 = vector.broadcast %534 : vector<1x128xf32> to vector<8x128xf32>
    %536 = arith.mulf %535, %508 : vector<8x128xf32>
    %537 = arith.subf %482, %536 : vector<8x128xf32>
    %538 = arith.mulf %534, %509 : vector<1x128xf32>
    %539 = arith.subf %484, %538 : vector<1x128xf32>
    %540 = vector.extract_strided_slice %488 {offsets = [3, 0], sizes = [1, 128], strides = [1, 1]} : vector<8x128xf32> to vector<1x128xf32>
    %541 = vector.broadcast %540 : vector<1x128xf32> to vector<8x128xf32>
    %542 = arith.mulf %541, %508 : vector<8x128xf32>
    %543 = arith.subf %488, %542 : vector<8x128xf32>
    %544 = arith.mulf %540, %509 : vector<1x128xf32>
    %545 = arith.subf %490, %544 : vector<1x128xf32>
    %546 = vector.extract_strided_slice %494 {offsets = [3, 0], sizes = [1, 128], strides = [1, 1]} : vector<8x128xf32> to vector<1x128xf32>
    %547 = vector.broadcast %546 : vector<1x128xf32> to vector<8x128xf32>
    %548 = arith.mulf %547, %508 : vector<8x128xf32>
    %549 = arith.subf %494, %548 : vector<8x128xf32>
    %550 = arith.mulf %546, %509 : vector<1x128xf32>
    %551 = arith.subf %496, %550 : vector<1x128xf32>
    %552 = vector.extract_strided_slice %531 {offsets = [4, 0], sizes = [1, 128], strides = [1, 1]} : vector<8x128xf32> to vector<1x128xf32>
    %553 = tpu.reciprocal %552 {approx = true} : vector<1x128xf32> -> vector<1x128xf32>
    %554 = arith.mulf %552, %553 : vector<1x128xf32>
    %cst_154 = arith.constant 2.000000e+00 : f32
    %555 = vector.broadcast %cst_154 : f32 to vector<1x128xf32>
    %556 = arith.subf %555, %554 : vector<1x128xf32>
    %557 = arith.mulf %553, %556 : vector<1x128xf32>
    %558 = arith.mulf %552, %557 : vector<1x128xf32>
    %cst_155 = arith.constant 2.000000e+00 : f32
    %559 = vector.broadcast %cst_155 : f32 to vector<1x128xf32>
    %560 = arith.subf %559, %558 : vector<1x128xf32>
    %561 = arith.mulf %557, %560 : vector<1x128xf32>
    %562 = vector.broadcast %561 : vector<1x128xf32> to vector<8x128xf32>
    %563 = arith.mulf %531, %562 : vector<8x128xf32>
    %564 = arith.mulf %533, %561 : vector<1x128xf32>
    %565 = vector.extract_strided_slice %513 {offsets = [4, 0], sizes = [1, 128], strides = [1, 1]} : vector<8x128xf32> to vector<1x128xf32>
    %566 = vector.broadcast %565 : vector<1x128xf32> to vector<8x128xf32>
    %567 = arith.mulf %566, %563 : vector<8x128xf32>
    %568 = arith.subf %513, %567 : vector<8x128xf32>
    %569 = arith.mulf %565, %564 : vector<1x128xf32>
    %570 = arith.subf %515, %569 : vector<1x128xf32>
    %571 = vector.extract_strided_slice %519 {offsets = [4, 0], sizes = [1, 128], strides = [1, 1]} : vector<8x128xf32> to vector<1x128xf32>
    %572 = vector.broadcast %571 : vector<1x128xf32> to vector<8x128xf32>
    %573 = arith.mulf %572, %563 : vector<8x128xf32>
    %574 = arith.subf %519, %573 : vector<8x128xf32>
    %575 = arith.mulf %571, %564 : vector<1x128xf32>
    %576 = arith.subf %521, %575 : vector<1x128xf32>
    %577 = vector.extract_strided_slice %525 {offsets = [4, 0], sizes = [1, 128], strides = [1, 1]} : vector<8x128xf32> to vector<1x128xf32>
    %578 = vector.broadcast %577 : vector<1x128xf32> to vector<8x128xf32>
    %579 = arith.mulf %578, %563 : vector<8x128xf32>
    %580 = arith.subf %525, %579 : vector<8x128xf32>
    %581 = arith.mulf %577, %564 : vector<1x128xf32>
    %582 = arith.subf %527, %581 : vector<1x128xf32>
    %583 = vector.extract_strided_slice %508 {offsets = [4, 0], sizes = [1, 128], strides = [1, 1]} : vector<8x128xf32> to vector<1x128xf32>
    %584 = vector.broadcast %583 : vector<1x128xf32> to vector<8x128xf32>
    %585 = arith.mulf %584, %563 : vector<8x128xf32>
    %586 = arith.subf %508, %585 : vector<8x128xf32>
    %587 = arith.mulf %583, %564 : vector<1x128xf32>
    %588 = arith.subf %509, %587 : vector<1x128xf32>
    %589 = vector.extract_strided_slice %537 {offsets = [4, 0], sizes = [1, 128], strides = [1, 1]} : vector<8x128xf32> to vector<1x128xf32>
    %590 = vector.broadcast %589 : vector<1x128xf32> to vector<8x128xf32>
    %591 = arith.mulf %590, %563 : vector<8x128xf32>
    %592 = arith.subf %537, %591 : vector<8x128xf32>
    %593 = arith.mulf %589, %564 : vector<1x128xf32>
    %594 = arith.subf %539, %593 : vector<1x128xf32>
    %595 = vector.extract_strided_slice %543 {offsets = [4, 0], sizes = [1, 128], strides = [1, 1]} : vector<8x128xf32> to vector<1x128xf32>
    %596 = vector.broadcast %595 : vector<1x128xf32> to vector<8x128xf32>
    %597 = arith.mulf %596, %563 : vector<8x128xf32>
    %598 = arith.subf %543, %597 : vector<8x128xf32>
    %599 = arith.mulf %595, %564 : vector<1x128xf32>
    %600 = arith.subf %545, %599 : vector<1x128xf32>
    %601 = vector.extract_strided_slice %549 {offsets = [4, 0], sizes = [1, 128], strides = [1, 1]} : vector<8x128xf32> to vector<1x128xf32>
    %602 = vector.broadcast %601 : vector<1x128xf32> to vector<8x128xf32>
    %603 = arith.mulf %602, %563 : vector<8x128xf32>
    %604 = arith.subf %549, %603 : vector<8x128xf32>
    %605 = arith.mulf %601, %564 : vector<1x128xf32>
    %606 = arith.subf %551, %605 : vector<1x128xf32>
    %607 = vector.extract_strided_slice %592 {offsets = [5, 0], sizes = [1, 128], strides = [1, 1]} : vector<8x128xf32> to vector<1x128xf32>
    %608 = tpu.reciprocal %607 {approx = true} : vector<1x128xf32> -> vector<1x128xf32>
    %609 = arith.mulf %607, %608 : vector<1x128xf32>
    %cst_156 = arith.constant 2.000000e+00 : f32
    %610 = vector.broadcast %cst_156 : f32 to vector<1x128xf32>
    %611 = arith.subf %610, %609 : vector<1x128xf32>
    %612 = arith.mulf %608, %611 : vector<1x128xf32>
    %613 = arith.mulf %607, %612 : vector<1x128xf32>
    %cst_157 = arith.constant 2.000000e+00 : f32
    %614 = vector.broadcast %cst_157 : f32 to vector<1x128xf32>
    %615 = arith.subf %614, %613 : vector<1x128xf32>
    %616 = arith.mulf %612, %615 : vector<1x128xf32>
    %617 = vector.broadcast %616 : vector<1x128xf32> to vector<8x128xf32>
    %618 = arith.mulf %592, %617 : vector<8x128xf32>
    %619 = arith.mulf %594, %616 : vector<1x128xf32>
    %620 = vector.extract_strided_slice %568 {offsets = [5, 0], sizes = [1, 128], strides = [1, 1]} : vector<8x128xf32> to vector<1x128xf32>
    %621 = vector.broadcast %620 : vector<1x128xf32> to vector<8x128xf32>
    %622 = arith.mulf %621, %618 : vector<8x128xf32>
    %623 = arith.subf %568, %622 : vector<8x128xf32>
    %624 = arith.mulf %620, %619 : vector<1x128xf32>
    %625 = arith.subf %570, %624 : vector<1x128xf32>
    %626 = vector.extract_strided_slice %574 {offsets = [5, 0], sizes = [1, 128], strides = [1, 1]} : vector<8x128xf32> to vector<1x128xf32>
    %627 = vector.broadcast %626 : vector<1x128xf32> to vector<8x128xf32>
    %628 = arith.mulf %627, %618 : vector<8x128xf32>
    %629 = arith.subf %574, %628 : vector<8x128xf32>
    %630 = arith.mulf %626, %619 : vector<1x128xf32>
    %631 = arith.subf %576, %630 : vector<1x128xf32>
    %632 = vector.extract_strided_slice %580 {offsets = [5, 0], sizes = [1, 128], strides = [1, 1]} : vector<8x128xf32> to vector<1x128xf32>
    %633 = vector.broadcast %632 : vector<1x128xf32> to vector<8x128xf32>
    %634 = arith.mulf %633, %618 : vector<8x128xf32>
    %635 = arith.subf %580, %634 : vector<8x128xf32>
    %636 = arith.mulf %632, %619 : vector<1x128xf32>
    %637 = arith.subf %582, %636 : vector<1x128xf32>
    %638 = vector.extract_strided_slice %586 {offsets = [5, 0], sizes = [1, 128], strides = [1, 1]} : vector<8x128xf32> to vector<1x128xf32>
    %639 = vector.broadcast %638 : vector<1x128xf32> to vector<8x128xf32>
    %640 = arith.mulf %639, %618 : vector<8x128xf32>
    %641 = arith.subf %586, %640 : vector<8x128xf32>
    %642 = arith.mulf %638, %619 : vector<1x128xf32>
    %643 = arith.subf %588, %642 : vector<1x128xf32>
    %644 = vector.extract_strided_slice %563 {offsets = [5, 0], sizes = [1, 128], strides = [1, 1]} : vector<8x128xf32> to vector<1x128xf32>
    %645 = vector.broadcast %644 : vector<1x128xf32> to vector<8x128xf32>
    %646 = arith.mulf %645, %618 : vector<8x128xf32>
    %647 = arith.subf %563, %646 : vector<8x128xf32>
    %648 = arith.mulf %644, %619 : vector<1x128xf32>
    %649 = arith.subf %564, %648 : vector<1x128xf32>
    %650 = vector.extract_strided_slice %598 {offsets = [5, 0], sizes = [1, 128], strides = [1, 1]} : vector<8x128xf32> to vector<1x128xf32>
    %651 = vector.broadcast %650 : vector<1x128xf32> to vector<8x128xf32>
    %652 = arith.mulf %651, %618 : vector<8x128xf32>
    %653 = arith.subf %598, %652 : vector<8x128xf32>
    %654 = arith.mulf %650, %619 : vector<1x128xf32>
    %655 = arith.subf %600, %654 : vector<1x128xf32>
    %656 = vector.extract_strided_slice %604 {offsets = [5, 0], sizes = [1, 128], strides = [1, 1]} : vector<8x128xf32> to vector<1x128xf32>
    %657 = vector.broadcast %656 : vector<1x128xf32> to vector<8x128xf32>
    %658 = arith.mulf %657, %618 : vector<8x128xf32>
    %659 = arith.subf %604, %658 : vector<8x128xf32>
    %660 = arith.mulf %656, %619 : vector<1x128xf32>
    %661 = arith.subf %606, %660 : vector<1x128xf32>
    %662 = vector.extract_strided_slice %653 {offsets = [6, 0], sizes = [1, 128], strides = [1, 1]} : vector<8x128xf32> to vector<1x128xf32>
    %663 = tpu.reciprocal %662 {approx = true} : vector<1x128xf32> -> vector<1x128xf32>
    %664 = arith.mulf %662, %663 : vector<1x128xf32>
    %cst_158 = arith.constant 2.000000e+00 : f32
    %665 = vector.broadcast %cst_158 : f32 to vector<1x128xf32>
    %666 = arith.subf %665, %664 : vector<1x128xf32>
    %667 = arith.mulf %663, %666 : vector<1x128xf32>
    %668 = arith.mulf %662, %667 : vector<1x128xf32>
    %cst_159 = arith.constant 2.000000e+00 : f32
    %669 = vector.broadcast %cst_159 : f32 to vector<1x128xf32>
    %670 = arith.subf %669, %668 : vector<1x128xf32>
    %671 = arith.mulf %667, %670 : vector<1x128xf32>
    %672 = vector.broadcast %671 : vector<1x128xf32> to vector<8x128xf32>
    %673 = arith.mulf %653, %672 : vector<8x128xf32>
    %674 = arith.mulf %655, %671 : vector<1x128xf32>
    %675 = vector.extract_strided_slice %623 {offsets = [6, 0], sizes = [1, 128], strides = [1, 1]} : vector<8x128xf32> to vector<1x128xf32>
    %676 = vector.broadcast %675 : vector<1x128xf32> to vector<8x128xf32>
    %677 = arith.mulf %676, %673 : vector<8x128xf32>
    %678 = arith.subf %623, %677 : vector<8x128xf32>
    %679 = arith.mulf %675, %674 : vector<1x128xf32>
    %680 = arith.subf %625, %679 : vector<1x128xf32>
    %681 = vector.extract_strided_slice %629 {offsets = [6, 0], sizes = [1, 128], strides = [1, 1]} : vector<8x128xf32> to vector<1x128xf32>
    %682 = vector.broadcast %681 : vector<1x128xf32> to vector<8x128xf32>
    %683 = arith.mulf %682, %673 : vector<8x128xf32>
    %684 = arith.subf %629, %683 : vector<8x128xf32>
    %685 = arith.mulf %681, %674 : vector<1x128xf32>
    %686 = arith.subf %631, %685 : vector<1x128xf32>
    %687 = vector.extract_strided_slice %635 {offsets = [6, 0], sizes = [1, 128], strides = [1, 1]} : vector<8x128xf32> to vector<1x128xf32>
    %688 = vector.broadcast %687 : vector<1x128xf32> to vector<8x128xf32>
    %689 = arith.mulf %688, %673 : vector<8x128xf32>
    %690 = arith.subf %635, %689 : vector<8x128xf32>
    %691 = arith.mulf %687, %674 : vector<1x128xf32>
    %692 = arith.subf %637, %691 : vector<1x128xf32>
    %693 = vector.extract_strided_slice %641 {offsets = [6, 0], sizes = [1, 128], strides = [1, 1]} : vector<8x128xf32> to vector<1x128xf32>
    %694 = vector.broadcast %693 : vector<1x128xf32> to vector<8x128xf32>
    %695 = arith.mulf %694, %673 : vector<8x128xf32>
    %696 = arith.subf %641, %695 : vector<8x128xf32>
    %697 = arith.mulf %693, %674 : vector<1x128xf32>
    %698 = arith.subf %643, %697 : vector<1x128xf32>
    %699 = vector.extract_strided_slice %647 {offsets = [6, 0], sizes = [1, 128], strides = [1, 1]} : vector<8x128xf32> to vector<1x128xf32>
    %700 = vector.broadcast %699 : vector<1x128xf32> to vector<8x128xf32>
    %701 = arith.mulf %700, %673 : vector<8x128xf32>
    %702 = arith.subf %647, %701 : vector<8x128xf32>
    %703 = arith.mulf %699, %674 : vector<1x128xf32>
    %704 = arith.subf %649, %703 : vector<1x128xf32>
    %705 = vector.extract_strided_slice %618 {offsets = [6, 0], sizes = [1, 128], strides = [1, 1]} : vector<8x128xf32> to vector<1x128xf32>
    %706 = vector.broadcast %705 : vector<1x128xf32> to vector<8x128xf32>
    %707 = arith.mulf %706, %673 : vector<8x128xf32>
    %708 = arith.subf %618, %707 : vector<8x128xf32>
    %709 = arith.mulf %705, %674 : vector<1x128xf32>
    %710 = arith.subf %619, %709 : vector<1x128xf32>
    %711 = vector.extract_strided_slice %659 {offsets = [6, 0], sizes = [1, 128], strides = [1, 1]} : vector<8x128xf32> to vector<1x128xf32>
    %712 = vector.broadcast %711 : vector<1x128xf32> to vector<8x128xf32>
    %713 = arith.mulf %712, %673 : vector<8x128xf32>
    %714 = arith.subf %659, %713 : vector<8x128xf32>
    %715 = arith.mulf %711, %674 : vector<1x128xf32>
    %716 = arith.subf %661, %715 : vector<1x128xf32>
    %717 = vector.extract_strided_slice %714 {offsets = [7, 0], sizes = [1, 128], strides = [1, 1]} : vector<8x128xf32> to vector<1x128xf32>
    %718 = tpu.reciprocal %717 {approx = true} : vector<1x128xf32> -> vector<1x128xf32>
    %719 = arith.mulf %717, %718 : vector<1x128xf32>
    %cst_160 = arith.constant 2.000000e+00 : f32
    %720 = vector.broadcast %cst_160 : f32 to vector<1x128xf32>
    %721 = arith.subf %720, %719 : vector<1x128xf32>
    %722 = arith.mulf %718, %721 : vector<1x128xf32>
    %723 = arith.mulf %717, %722 : vector<1x128xf32>
    %cst_161 = arith.constant 2.000000e+00 : f32
    %724 = vector.broadcast %cst_161 : f32 to vector<1x128xf32>
    %725 = arith.subf %724, %723 : vector<1x128xf32>
    %726 = arith.mulf %722, %725 : vector<1x128xf32>
    %727 = arith.mulf %716, %726 : vector<1x128xf32>
    %728 = vector.extract_strided_slice %678 {offsets = [7, 0], sizes = [1, 128], strides = [1, 1]} : vector<8x128xf32> to vector<1x128xf32>
    %729 = arith.mulf %728, %727 : vector<1x128xf32>
    %730 = arith.subf %680, %729 : vector<1x128xf32>
    %731 = vector.extract_strided_slice %684 {offsets = [7, 0], sizes = [1, 128], strides = [1, 1]} : vector<8x128xf32> to vector<1x128xf32>
    %732 = arith.mulf %731, %727 : vector<1x128xf32>
    %733 = arith.subf %686, %732 : vector<1x128xf32>
    %734 = vector.extract_strided_slice %690 {offsets = [7, 0], sizes = [1, 128], strides = [1, 1]} : vector<8x128xf32> to vector<1x128xf32>
    %735 = arith.mulf %734, %727 : vector<1x128xf32>
    %736 = arith.subf %692, %735 : vector<1x128xf32>
    %737 = vector.extract_strided_slice %696 {offsets = [7, 0], sizes = [1, 128], strides = [1, 1]} : vector<8x128xf32> to vector<1x128xf32>
    %738 = arith.mulf %737, %727 : vector<1x128xf32>
    %739 = arith.subf %698, %738 : vector<1x128xf32>
    %740 = vector.extract_strided_slice %702 {offsets = [7, 0], sizes = [1, 128], strides = [1, 1]} : vector<8x128xf32> to vector<1x128xf32>
    %741 = arith.mulf %740, %727 : vector<1x128xf32>
    %742 = arith.subf %704, %741 : vector<1x128xf32>
    %743 = vector.extract_strided_slice %708 {offsets = [7, 0], sizes = [1, 128], strides = [1, 1]} : vector<8x128xf32> to vector<1x128xf32>
    %744 = arith.mulf %743, %727 : vector<1x128xf32>
    %745 = arith.subf %710, %744 : vector<1x128xf32>
    %746 = vector.extract_strided_slice %673 {offsets = [7, 0], sizes = [1, 128], strides = [1, 1]} : vector<8x128xf32> to vector<1x128xf32>
    %747 = arith.mulf %746, %727 : vector<1x128xf32>
    %748 = arith.subf %674, %747 : vector<1x128xf32>
    %749 = tpu.concatenate %730, %733, %736, %739, %742, %745, %748, %727 in 0 : vector<1x128xf32>, vector<1x128xf32>, vector<1x128xf32>, vector<1x128xf32>, vector<1x128xf32>, vector<1x128xf32>, vector<1x128xf32>, vector<1x128xf32> -> vector<8x128xf32>
    %750 = arith.index_cast %1 : i32 to index
    %c0_162 = arith.constant 0 : index
    %c0_163 = arith.constant 0 : index
    %751 = vector.load %arg3[%750, %c0_162, %c0_163] : memref<1x8x128xf32, #tpu.memory_space<vmem>>, vector<1x8x128xf32>
    %752 = vector.shape_cast %751 : vector<1x8x128xf32> to vector<8x128xf32>
    %753 = vector.shape_cast %749 : vector<8x128xf32> to vector<1x8x128xf32>
    tpu.vector_store %arg3[%750, %c0_162, %c0_163], %753 {strides = array<i32>} : memref<1x8x128xf32, #tpu.memory_space<vmem>>, vector<1x8x128xf32>,
    %c1_i32_164 = arith.constant 1 : i32
    return
  }
  func.func @transform_0(%arg0: i32) -> (i32, i32, i32, i32) {
    %c0_i32 = arith.constant 0 : i32
    %c0_i32_0 = arith.constant 0 : i32
    %c0_i32_1 = arith.constant 0 : i32
    %c0_i32_2 = arith.constant 0 : i32
    return %arg0, %c0_i32, %c0_i32_0, %c0_i32_1 : i32, i32, i32, i32
  }
  func.func @transform_1(%arg0: i32) -> (i32, i32, i32) {
    %c0_i32 = arith.constant 0 : i32
    %c0_i32_0 = arith.constant 0 : i32
    %c0_i32_1 = arith.constant 0 : i32
    return %arg0, %c0_i32, %c0_i32_0 : i32, i32, i32
  }
  func.func @transform_2(%arg0: i32) -> (i32, i32, i32) {
    %c0_i32 = arith.constant 0 : i32
    %c0_i32_0 = arith.constant 0 : i32
    %c0_i32_1 = arith.constant 0 : i32
    return %arg0, %c0_i32, %c0_i32_0 : i32, i32, i32
  }
}

</mosaic_0001>

<bundles_post_ra>
// kernel: tpu_custom_call.1
= control target key start
LH: loop header
LB: loop body
LE: loop exit
PB: predicated region body
PF: predicated region fallthrough
CT: control target
= control target key end

     0   :  { %7 = vsyncpa [#allocation3], 0  ;;  %s4295_s0 = inlined_call_operand.hbm [shape: f32[2,16,8,128], index: 0, kind: input, shape index: {}]   ;;  %s4296_s1 = inlined_call_operand.hbm [shape: f32[2,16,128], index: 1, kind: input, shape index: {}]   ;;  %s4297_s2 = inlined_call_operand.hbm [shape: f32[2,8,128], index: 2, kind: output, shape index: {}]  }
   0x1   :  { %9 = vsyncpa [#allocation3 + $0x1], 0 }
   0x2   :  { %10 = vsyncpa [#allocation6], 0 }
   0x3   :  { %12 = vsyncpa [#allocation6 + $0x1], 0 }
   0x4   :  { %13 = vsyncpa [#allocation4], 0 }
   0x5   :  { %15 = vsyncpa [#allocation4 + $0x1], 0  ;;  %s3125_s9 = smov 0   ;;  %s3127_s10 = smov 0  }
   0x6   :  { %s3129_s11 = smov 0   ;;  %s3131_s12 = smov 0  }
   0x7 LB: > { %s3146_s13 = sadd.s32 4294967295, %s3102_s12   ;;  %s2836_s14 = sadd.s32 4294967294, %s3102_s12   ;;  %s3102_s12 = sphi %s3131_s12, %s4313_s12   ;;  %s3098_s11 = sphi %s3129_s11, %s4312_s11   ;;  %s3094_s10 = sphi %s3127_s10, %s4311_s10   ;;  %s3090_s9 = sphi %s3125_s9, %s4310_s9  }
   0x8   : > { %s3150_s15 = sadd.s32 1, %s3102_s12   ;;  %s28_s16 = sadd.s32 1, %s3098_s11 }
   0x9   : > { %s25_s17 = ssub.s32 %s3102_s12, %s3150_s15  ;;  %p35_p0 = scmp.ne.s32.totalorder %s3098_s11, %s3094_s10 }
   0xa   : > { %p26_p1 = scmp.eq.s32.totalorder %s25_s17, 0  ;;  %p36_p2 = scmp.eq.s32.totalorder %s3102_s12, 0 }
   0xb   : > { %p41_p3 = scmp.ne.s32.totalorder %s3094_s10, %s3090_s9  ;;  %p42_p4 = scmp.eq.s32.totalorder %s3146_s13, 0 }
   0xc   : > { %s3162_s18 = scalar_select %p26_p1, %s3098_s11, %s28_s16  }
   0xd   : > { %p3164_p5 = por %p36_p2, %p35_p0  ;;  %p3168_p6 = por %p42_p4, %p41_p3 }
   0xe   : > { %p91_p7 = scmp.eq.s32.totalorder %s3146_s13, 1  ;;  %p97_p8 = scmp.eq.s32.totalorder %s2836_s14, 1 }
   0xf   : > { %s4301_s20 = scalar_select %p3168_p6, 1, 0 }
  0x10   : > { %p2903_p10 = scmp.lt.s32.totalorder %s3102_s12, 2  ;;  %p3175_p11 = por %p91_p7, %p35_p0 }
  0x11   : > { %p3179_p12 = por %p97_p8, %p41_p3  ;;  %s3184_s23 = sand.u32 1, %s3098_s11  }
  0x12   : > { %s4302_s21 = scalar_select %p3175_p11, 1, 0 }
  0x13   : > { %s4303_s22 = scalar_select %p3179_p12, 1, 0 }
  0x14   : > { %s2884_s24 = sshll.u32 %s3102_s12, 11  ;;  %s2839_s25 = sshll.u32 %s3184_s23, 7 }
  0x15   : > { %s3191_s28 = scalar_lea.hbm %s4295_s0, %s2884_s24  ;;  %s121_s29 = scalar_lea.vmem [#allocation2], %s2839_s25 }
  0x16   : > { %s128_s30 = sshll.u32 %s121_s29, 4  ;;  %p3195_p13 = pnand %p2903_p10, %p3164_p5  ;;  %s3199_s30 = int_to_ptr.vmem [resolvable:$true] %s128_s30 }
  0x17   : > { %s118_s4 = scalar_lea.sflag [#allocation3], %s3184_s23  ;;  %s2972_s5 = scalar_lea.hbm %s3191_s28, 2048 }
  0x18   : > { %p2973_p0 = scmp.ne.s32.totalorder %s3191_s28, %s2972_s5  ;;  %p2974_p1 = pneg %p3195_p13 }
  0x19   : > { %s2977_s8 = scalar_lea.hbm %s4295_s0, 4096  ;;  %p2978_p4 = scmp.lt.u32.totalorder %s3191_s28, %s4295_s0 }
  0x1a   : > { %p2975_p2 = pnand %p2974_p1, %p2973_p0  ;;  %p2979_p5 = scmp.lt.u32.totalorder %s2977_s8, %s2972_s5 }
  0x1b   : > { %p2981_p8 = scmp.lt.u32.totalorder %s2972_s5, %s3191_s28 }
  0x1c   : > { %p2976_p3 = pneg %p2975_p2  ;;  %p2980_p7 = por %p2979_p5, %p2978_p4 }
  0x1e   : > { %p2982_p10 = por %p2981_p8, %p2980_p7 }
  0x20   : > { %p2983_p9 = pnand %p2982_p10, %p2976_p3 }
  0x22   : > { %2986 = shalt.err (!%p2983_p9)
}
  0x23   : > { %s2987_s17 = scalar_lea.vmem %s3199_s30, 2048  ;;  %s3104_s19 = smov [#allocation2]  }
  0x24   : > { %p2988_p0 = scmp.ne.s32.totalorder %s3199_s30, %s2987_s17  ;;  %s2992_s24 = sshll.u32 %s3104_s19, 4  ;;  %s2993_s24 = int_to_ptr.vmem [resolvable:$false] %s2992_s24 }
  0x25   : > { %s2994_s25 = scalar_lea.vmem %s2993_s24, 4096  ;;  %p2995_p11 = scmp.lt.s32.totalorder %s3199_s30, %s2993_s24 }
  0x26   : > { %p2990_p2 = pnand %p2988_p0, %p2974_p1  ;;  %p2996_p4 = scmp.lt.s32.totalorder %s2994_s25, %s2987_s17 }
  0x28   : > { %p2991_p12 = pneg %p2990_p2  ;;  %p2997_p5 = por %p2996_p4, %p2995_p11 }
  0x2a   : > { %p2998_p7 = pnand %p2997_p5, %p2991_p12 }
  0x2c   : > { %3001 = shalt.err (!%p2998_p7)
}
  0x2d   : > { %s3105_s26 = smov 128   ;;  %s3106_s27 = smov 8  }
  0x2e   : > { %2895 = dma.hbm_to_vmem [thread:$0]  (!%p3195_p13), %s3191_s28, 2048, %s3199_s30, %s118_s4, %s3105_s26, %s3105_s26, %s3106_s27  }
  0x2f   : > { %p2845_p9 = scmp.ge.s32.totalorder %s3102_s12, 1  ;;  %p157_p11 = scmp.lt.s32.totalorder %s3102_s12, 3 }
  0x30   : > { %s2842_s29 = sshll.u32 %s3184_s23, 4  ;;  %s2885_s6 = sshll.u32 %s3102_s12, 8 }
  0x31   : > { %p3235_p12 = pnand %p2845_p9, %p157_p11  ;;  %s142_s7 = scalar_lea.vmem [#allocation5], %s2842_s29 }
  0x32   : > { %s149_s8 = sshll.u32 %s142_s7, 4  ;;  %s3243_s17 = scalar_lea.hbm %s4296_s1, %s2885_s6  ;;  %s3245_s8 = int_to_ptr.vmem [resolvable:$true] %s149_s8 }
  0x33   : > { %s139_s28 = scalar_lea.sflag [#allocation6], %s3184_s23  ;;  %s3002_s30 = scalar_lea.hbm %s3243_s17, 256 }
  0x34   : > { %p3003_p3 = scmp.ne.s32.totalorder %s3243_s17, %s3002_s30  ;;  %s3007_s24 = scalar_lea.hbm %s4296_s1, 512 }
  0x35   : > { %p3008_p0 = scmp.lt.u32.totalorder %s3243_s17, %s4296_s1  ;;  %p3009_p2 = scmp.lt.u32.totalorder %s3007_s24, %s3002_s30 }
  0x36   : > { %p3005_p8 = pnand %p3003_p3, %p2974_p1  ;;  %p3011_p5 = scmp.lt.u32.totalorder %s3002_s30, %s3243_s17 }
  0x37   : > { %p3010_p4 = por %p3009_p2, %p3008_p0 }
  0x38   : > { %p3006_p10 = pneg %p3005_p8 }
  0x39   : > { %p3012_p7 = por %p3011_p5, %p3010_p4 }
  0x3b   : > { %p3013_p9 = pnand %p3012_p7, %p3006_p10 }
  0x3d   : > { %3016 = shalt.err (!%p3013_p9)
}
  0x3e   : > { %s3017_s6 = scalar_lea.vmem %s3245_s8, 256  ;;  %s3107_s7 = smov [#allocation5]  }
  0x3f   : > { %p3018_p11 = scmp.ne.s32.totalorder %s3245_s8, %s3017_s6  ;;  %s3022_s14 = sshll.u32 %s3107_s7, 4  ;;  %s3023_s14 = int_to_ptr.vmem [resolvable:$false] %s3022_s14 }
  0x40   : > { %s3024_s16 = scalar_lea.vmem %s3023_s14, 512  ;;  %p3025_p6 = scmp.lt.s32.totalorder %s3245_s8, %s3023_s14 }
  0x41   : > { %p3020_p3 = pnand %p3018_p11, %p2974_p1  ;;  %p3026_p0 = scmp.lt.s32.totalorder %s3024_s16, %s3017_s6 }
  0x43   : > { %p3021_p8 = pneg %p3020_p3  ;;  %p3027_p2 = por %p3026_p0, %p3025_p6 }
  0x45   : > { %p3028_p4 = pnand %p3027_p2, %p3021_p8 }
  0x47   : > { %3031 = shalt.err (!%p3028_p4)
}
  0x48   : > { %2898 = dma.hbm_to_vmem [thread:$0]  (!%p3195_p13), %s3243_s17, 256, %s3245_s8, %s139_s28, %s3105_s26, %s3105_s26, %s3106_s27  }
  0x49   : > { %161 = sbr.rel (%p3235_p12) target bundleno = 520 (0x208), region = 28  ;;  %s3279_s30 = sand.u32 (!%p3235_p12), 1, %s3094_s10  }
  0x4a   : > { %s2846_s4 = sshll.u32 (!%p3235_p12), %s3279_s30, 7  ;;  %s164_s19 = scalar_lea.sflag (!%p3235_p12), [#allocation3], %s3279_s30 }
  0x4b   : > { %s3283_s3 = scalar_lea.vmem (!%p3235_p12), [#allocation2], %s2846_s4  ;;  %p4306_p6 = scmp.ne.s32.totalorder (!%p3235_p12), %s4301_s20, 0 }
  0x50   : > { %3077 = dma.done.wait (%p4306_p6), %s164_s19, 2048  }
  0x51   : > { %3079 = vsyncadd (%p4306_p6), %s164_s19, 4294965248  ;;  %s2847_s23 = sshll.u32 %s3279_s30, 4  ;;  %s173_s26 = scalar_lea.sflag [#allocation6], %s3279_s30 }
  0x52   : > { %s3291_s27 = scalar_lea.vmem [#allocation5], %s2847_s23 }
  0x53   : > { %3081 = dma.done.wait (%p4306_p6), %s173_s26, 256  }
  0x54   : > { %3083 = vsyncadd (%p4306_p6), %s173_s26, 4294967040  ;;  %v208_v0 = vlaneseq  ;;  %v3108_v1 = vmov 1966171168   ;;  %v3303_v6 = vld [vmem:[%s3283_s3] sm:$0xff]  ;;  %v3307_v8 = vld [vmem:[%s3283_s3 + $0x8] sm:$0xff]  ;;  %vm2714_vm0 = vcmask 1040384  }
  0x55   : > { %v206_v2 = vunpack.c.l.s4 %v3108_v1  ;;  %v2849_v7 = vld [vmem:[%s3291_s27] ss:$0 sm:$0xff]  ;;  %v204_v9 = vcombine.high %v3303_v6, %v3303_v6  ;;  %v319_v12 = vcombine.high %v3307_v8, %v3307_v8  ;;  %v2851_v13 = vld [vmem:[%s3291_s27 + $0x1] ss:$0 sm:$0xff]  ;;  %v2853_v61 = vld [vmem:[%s3291_s27 + $0x2] ss:$0 sm:$0xff] }
  0x56   : > { %v3297_v3 = vshrl.u32 %v208_v0, 7  ;;  %v314_v11 = vmul.f32 %v2849_v7, %v3303_v6  ;;  %v429_v14 = vmul.f32 %v2851_v13, %v3307_v8  ;;  %v3342_v37 = vld [vmem:[%s3283_s3 + $0x10] sm:$0xff]  ;;  %s2848_s20 = sshll.u32 %s3279_s30, 3  ;;  %vm2716_vm1 = vcmask 1041408   ;;  %s2881_s5 = sshll.u32 %s3146_s13, 7 }
  0x57   : > { %v207_v4 = vunpack.c.0.s8 %v206_v2  ;;  %v434_v40 = vcombine.high %v3342_v37, %v3342_v37  ;;  %vm2718_vm2 = vcmask 1042432   ;;  %vm2720_vm3 = vcmask 1043456   ;;  %s201_s8 = scalar_lea.vmem [#allocation7], %s2848_s20  ;;  %s4251_s25 = scalar_lea.hbm %s4297_s2, %s2881_s5 }
  0x58   : > { %v430_v19 = vadd.f32 %v429_v14, %v314_v11  ;;  %v3327_v23 = vsub.s32 0, %v3297_v3  ;;  %v544_v11 = vmul.f32 %v2853_v61, %v3342_v37  ;;  %vm2722_vm4 = vcmask 1044480   ;;  %s2743_s17 = sshll.u32 %s201_s8, 4  ;;  %s2730_s29 = scalar_lea.sflag [#allocation4], %s3279_s30  ;;  %s4253_s17 = int_to_ptr.vmem [resolvable:$true] %s2743_s17 }
  0x59   : > { %v3300_v5 = vsub.s32 %v207_v4, %v3297_v3  ;;  %vm2724_vm5 = vcmask 1045504   ;;  %vm2726_vm6 = vcmask 1046528   ;;  %s3032_s13 = scalar_lea.vmem %s4253_s17, 128  ;;  %p4307_p1 = scmp.ne.s32.totalorder %s4302_s21, 0 }
  0x5a   : > { %p3033_p13 = scmp.ne.s32.totalorder %s4253_s17, %s3032_s13  ;;  %s3109_s6 = smov [#allocation7]  }
  0x5b   : > { %v211_v10 = vrot.slane %v3303_v6, %v3300_v5  ;;  %v218_v15 = vrot.slane %v204_v9, %v3300_v5  ;;  %v326_v17 = vrot.slane %v3307_v8, %v3300_v5  ;;  %v333_v18 = vrot.slane %v319_v12, %v3300_v5  ;;  %v3376_v12 = vld [vmem:[%s3283_s3 + $0x18] sm:$0xff]  ;;  %s3036_s7 = sshll.u32 %s3109_s6, 4  ;;  %s3037_s7 = int_to_ptr.vmem [resolvable:$false] %s3036_s7 }
  0x5c   : > { %v448_v54 = vrot.slane %v434_v40, %v3300_v5  ;;  %v3367_v60 = vrot.slane %v3342_v37, %v3300_v5  ;;  %p3034_p12 = pnand %p3033_p13, %p4307_p1  ;;  %s3038_s14 = scalar_lea.vmem %s3037_s7, 256 }
  0x5d   : > { %v219_v16 = vcombine.high %v211_v10, %v211_v10  ;;  %v220_v20 = vcombine.high %v218_v15, %v218_v15  ;;  %v234_v21 = vrot.slane %v218_v15, %v3300_v5  ;;  %v334_v24 = vcombine.high %v326_v17, %v326_v17  ;;  %p3039_p5 = scmp.lt.s32.totalorder %s4253_s17, %s3037_s7  ;;  %p3040_p7 = scmp.lt.s32.totalorder %s3038_s14, %s3032_s13 }
  0x5e   : > { %v335_v25 = vcombine.high %v333_v18, %v333_v18  ;;  %v349_v30 = vrot.slane %v333_v18, %v3300_v5  ;;  %v227_v2 = vrot.slane %v211_v10, %v3300_v5  ;;  %v449_v4 = vcombine.high %v3367_v60, %v3367_v60  ;;  %p3035_p10 = pneg %p3034_p12 }
  0x5f   : > { %v3324_v22 = vrot.slane %v219_v16, %v3300_v5  ;;  %v248_v26 = vrot.slane %v220_v20, %v3300_v5  ;;  %v250_v27 = vcombine.high %v234_v21, %v234_v21  ;;  %v272_v29 = vrot.slane %v234_v21, %v3327_v23  ;;  %p3041_p9 = por %p3040_p7, %p3039_p5 }
  0x60   : > { %v3338_v35 = vrot.slane %v334_v24, %v3300_v5  ;;  %v363_v36 = vrot.slane %v335_v25, %v3300_v5  ;;  %v365_v42 = vcombine.high %v349_v30, %v349_v30  ;;  %v387_v48 = vrot.slane %v349_v30, %v3327_v23 }
  0x61   : > { %v251_v28 = vcombine.high %v3324_v22, %v3324_v22  ;;  %v252_v31 = vcombine.high %v248_v26, %v248_v26  ;;  %v276_v33 = vrot.slane %v248_v26, %v3327_v23  ;;  %v280_v34 = vrot.slane %v250_v27, %v3327_v23  ;;  %v2855_v27 = vld [vmem:[%s3291_s27 + $0x3] ss:$0 sm:$0xff]  ;;  %p3042_p11 = pnand %p3041_p9, %p3035_p10 }
  0x62   : > { %v297_v39 = vmul.f32 %v272_v29, %v3303_v6  ;;  %v366_v43 = vcombine.high %v3338_v35, %v3338_v35  ;;  %v367_v44 = vcombine.high %v363_v36, %v363_v36  ;;  %v391_v50 = vrot.slane %v363_v36, %v3327_v23 }
  0x63   : > { %v268_v32 = vrot.slane %v251_v28, %v3327_v23  ;;  %v284_v38 = vrot.slane %v252_v31, %v3327_v23  ;;  %v298_v45 = vmul.f32 %v276_v33, %v3303_v6  ;;  %v299_v46 = vmul.f32 %v280_v34, %v3303_v6 }
  0x64   : > { %v383_v49 = vrot.slane %v366_v43, %v3327_v23  ;;  %v395_v51 = vrot.slane %v365_v42, %v3327_v23  ;;  %v399_v52 = vrot.slane %v367_v44, %v3327_v23  ;;  %v412_v53 = vmul.f32 %v3307_v8, %v387_v48 }
  0x65   : > { %v296_v41 = vmul.f32 %v268_v32, %v3303_v6  ;;  %v300_v47 = vmul.f32 %v284_v38, %v3303_v6  ;;  %v413_v56 = vmul.f32 %v3307_v8, %v391_v50  ;;  %v450_v7 = vcombine.high %v448_v54, %v448_v54 }
  0x66   : > { %v411_v55 = vmul.f32 %v3307_v8, %v383_v49  ;;  %v414_v57 = vmul.f32 %v3307_v8, %v395_v51  ;;  %v415_v58 = vmul.f32 %v3307_v8, %v399_v52  ;;  %v420_v59 = vadd.f32 %v412_v53, %v297_v39 }
  0x67   : > { %v421_v63 = vadd.f32 %v413_v56, %v298_v45  ;;  %v464_v9 = vrot.slane %v448_v54, %v3300_v5  ;;  %v3379_v13 = vrot.slane %v449_v4, %v3300_v5  ;;  %v478_v14 = vrot.slane %v450_v7, %v3300_v5 }
  0x68   : > { %v419_v62 = vadd.f32 %v411_v55, %v296_v41  ;;  %v422_v0 = vadd.f32 %v414_v57, %v299_v46  ;;  %v423_v1 = vadd.f32 %v415_v58, %v300_v47  ;;  %v549_v10 = vcombine.high %v3376_v12, %v3376_v12 }
  0x69   : > { %v480_v15 = vcombine.high %v464_v9, %v464_v9  ;;  %v342_v16 = vrot.slane %v326_v17, %v3300_v5  ;;  %v502_v18 = vrot.slane %v464_v9, %v3327_v23  ;;  %v545_v20 = vadd.f32 %v544_v11, %v430_v19 }
  0x6a   : > { %v249_v21 = vcombine.high %v227_v2, %v227_v2  ;;  %v256_v24 = vrot.slane %v227_v2, %v3327_v23  ;;  %v481_v25 = vcombine.high %v3379_v13, %v3379_v13  ;;  %v482_v26 = vcombine.high %v478_v14, %v478_v14 }
  0x6b   : > { %v260_v28 = vrot.slane %v3324_v22, %v3327_v23  ;;  %v506_v29 = vrot.slane %v478_v14, %v3327_v23  ;;  %v510_v30 = vrot.slane %v480_v15, %v3327_v23  ;;  %v527_v17 = vmul.f32 %v3342_v37, %v502_v18  ;;  %v2857_v18 = vld [vmem:[%s3291_s27 + $0x4] ss:$0 sm:$0xff] }
  0x6c   : > { %v498_v31 = vrot.slane %v481_v25, %v3327_v23  ;;  %v514_v19 = vrot.slane %v482_v26, %v3327_v23  ;;  %v3399_v32 = vrot.slane %v3376_v12, %v3300_v5  ;;  %v563_v33 = vrot.slane %v549_v10, %v3300_v5 }
  0x6d   : > { %v528_v34 = vmul.f32 %v3342_v37, %v506_v29  ;;  %v529_v22 = vmul.f32 %v3342_v37, %v510_v30  ;;  %v535_v36 = vadd.f32 %v527_v17, %v420_v59  ;;  %v659_v38 = vmul.f32 %v2855_v27, %v3376_v12 }
  0x6e   : > { %v264_v39 = vrot.slane %v249_v21, %v3327_v23  ;;  %v364_v40 = vcombine.high %v342_v16, %v342_v16  ;;  %v526_v41 = vmul.f32 %v3342_v37, %v498_v31  ;;  %v530_v42 = vmul.f32 %v3342_v37, %v514_v19 }
  0x6f   : > { %v536_v43 = vadd.f32 %v528_v34, %v421_v63  ;;  %v537_v44 = vadd.f32 %v529_v22, %v422_v0  ;;  %v564_v45 = vcombine.high %v3399_v32, %v3399_v32  ;;  %v565_v46 = vcombine.high %v563_v33, %v563_v33  ;;  %v3426_v0 = vld [vmem:[%s3283_s3 + $0x20] sm:$0xff] }
  0x70   : > { %v293_v47 = vmul.f32 %v256_v24, %v3303_v6  ;;  %v534_v48 = vadd.f32 %v526_v41, %v419_v62  ;;  %v538_v49 = vadd.f32 %v530_v42, %v423_v1  ;;  %v579_v50 = vrot.slane %v563_v33, %v3300_v5 }
  0x71   : > { %v294_v51 = vmul.f32 %v260_v28, %v3303_v6  ;;  %v3414_v52 = vrot.slane %v564_v45, %v3300_v5  ;;  %v593_v53 = vrot.slane %v565_v46, %v3300_v5  ;;  %v660_v54 = vadd.f32 %v659_v38, %v545_v20 }
  0x72   : > { %v371_v55 = vrot.slane %v342_v16, %v3327_v23  ;;  %v375_v56 = vrot.slane %v3338_v35, %v3327_v23  ;;  %v595_v57 = vcombine.high %v579_v50, %v579_v50  ;;  %v617_v58 = vrot.slane %v579_v50, %v3327_v23 }
  0x73   : > { %v379_v59 = vrot.slane %v364_v40, %v3327_v23  ;;  %v596_v61 = vcombine.high %v3414_v52, %v3414_v52  ;;  %v597_v62 = vcombine.high %v593_v53, %v593_v53  ;;  %v621_v63 = vrot.slane %v593_v53, %v3327_v23 }
  0x74   : > { %v295_v1 = vmul.f32 %v264_v39, %v3303_v6  ;;  %v625_v2 = vrot.slane %v595_v57, %v3327_v23  ;;  %v642_v35 = vmul.f32 %v3376_v12, %v617_v58  ;;  %v664_v4 = vcombine.high %v3426_v0, %v3426_v0 }
  0x75   : > { %v457_v7 = vrot.slane %v3367_v60, %v3300_v5  ;;  %v613_v9 = vrot.slane %v596_v61, %v3327_v23  ;;  %v629_v11 = vrot.slane %v597_v62, %v3327_v23  ;;  %v643_v14 = vmul.f32 %v3376_v12, %v621_v63 }
  0x76   : > { %v408_v15 = vmul.f32 %v3307_v8, %v371_v55  ;;  %v409_v6 = vmul.f32 %v3307_v8, %v375_v56  ;;  %v644_v10 = vmul.f32 %v3376_v12, %v625_v2  ;;  %v650_v16 = vadd.f32 %v642_v35, %v535_v36 }
  0x77   : > { %v410_v20 = vmul.f32 %v3307_v8, %v379_v59  ;;  %v641_v21 = vmul.f32 %v3376_v12, %v613_v9  ;;  %v645_v60 = vmul.f32 %v3376_v12, %v629_v11  ;;  %v651_v24 = vadd.f32 %v643_v14, %v536_v43  ;;  %v3453_v8 = vld [vmem:[%s3283_s3 + $0x28] sm:$0xff] }
  0x78   : > { %v479_v25 = vcombine.high %v457_v7, %v457_v7  ;;  %v652_v26 = vadd.f32 %v644_v10, %v537_v44  ;;  %v3447_v27 = vrot.slane %v3426_v0, %v3300_v5  ;;  %v678_v28 = vrot.slane %v664_v4, %v3300_v5 }
  0x79   : > { %v486_v29 = vrot.slane %v457_v7, %v3327_v23  ;;  %v649_v30 = vadd.f32 %v641_v21, %v534_v48  ;;  %v653_v17 = vadd.f32 %v645_v60, %v538_v49  ;;  %v774_v31 = vmul.f32 %v2857_v18, %v3426_v0 }
  0x7a   : > { %v679_v19 = vcombine.high %v3447_v27, %v3447_v27  ;;  %v680_v33 = vcombine.high %v678_v28, %v678_v28  ;;  %v694_v34 = vrot.slane %v678_v28, %v3300_v5  ;;  %v779_v22 = vcombine.high %v3453_v8, %v3453_v8 }
  0x7b   : > { %v416_v36 = vadd.f32 %v408_v15, %v293_v47  ;;  %v417_v38 = vadd.f32 %v409_v6, %v294_v51  ;;  %v3460_v39 = vadd.f32 %v774_v31, %v660_v54  ;;  %v418_v40 = vadd.f32 %v410_v20, %v295_v1 }
  0x7c   : > { %v3463_v41 = vrot.slane %v679_v19, %v3300_v5  ;;  %v708_v42 = vrot.slane %v680_v33, %v3300_v5  ;;  %v710_v43 = vcombine.high %v694_v34, %v694_v34  ;;  %v490_v44 = vrot.slane %v3379_v13, %v3327_v23 }
  0x7d   : > { %v494_v45 = vrot.slane %v479_v25, %v3327_v23  ;;  %v523_v46 = vmul.f32 %v3342_v37, %v486_v29  ;;  %v732_v48 = vrot.slane %v694_v34, %v3327_v23  ;;  %v3475_v50 = vrot.slane %v3453_v8, %v3300_v5 }
  0x7e   : > { %v711_v47 = vcombine.high %v3463_v41, %v3463_v41  ;;  %v712_v49 = vcombine.high %v708_v42, %v708_v42  ;;  %v793_v51 = vrot.slane %v779_v22, %v3300_v5  ;;  %v572_v53 = vrot.slane %v3399_v32, %v3300_v5 }
  0x7f   : > { %v736_v13 = vrot.slane %v708_v42, %v3327_v23  ;;  %v740_v54 = vrot.slane %v710_v43, %v3327_v23  ;;  %v757_v55 = vmul.f32 %v3426_v0, %v732_v48  ;;  %v794_v58 = vcombine.high %v3475_v50, %v3475_v50  ;;  %v3517_v43 = vld [vmem:[%s3283_s3 + $0x30] sm:$0xff] }
  0x80   : > { %v728_v56 = vrot.slane %v711_v47, %v3327_v23  ;;  %v744_v57 = vrot.slane %v712_v49, %v3327_v23  ;;  %v795_v59 = vcombine.high %v793_v51, %v793_v51  ;;  %v524_v61 = vmul.f32 %v3342_v37, %v490_v44  ;;  %v2861_v44 = vld [vmem:[%s3291_s27 + $0x6] ss:$0 sm:$0xff] }
  0x81   : > { %v758_v62 = vmul.f32 %v3426_v0, %v736_v13  ;;  %v759_v32 = vmul.f32 %v3426_v0, %v740_v54  ;;  %v765_v63 = vadd.f32 %v757_v55, %v650_v16  ;;  %v525_v1 = vmul.f32 %v3342_v37, %v494_v45  ;;  %v2859_v16 = vld [vmem:[%s3291_s27 + $0x5] ss:$0 sm:$0xff] }
  0x82   : > { %v594_v2 = vcombine.high %v572_v53, %v572_v53  ;;  %v756_v35 = vmul.f32 %v3426_v0, %v728_v56  ;;  %v760_v4 = vmul.f32 %v3426_v0, %v744_v57  ;;  %v531_v7 = vadd.f32 %v523_v46, %v416_v36  ;;  %v3535_v57 = vld [vmem:[%s3283_s3 + $0x38] sm:$0xff] }
  0x83   : > { %v766_v9 = vadd.f32 %v758_v62, %v651_v24  ;;  %v767_v11 = vadd.f32 %v759_v32, %v652_v26  ;;  %v809_v14 = vrot.slane %v793_v51, %v3300_v5  ;;  %v3495_v10 = vrot.slane %v794_v58, %v3300_v5 }
  0x84   : > { %v764_v15 = vadd.f32 %v756_v35, %v649_v30  ;;  %v768_v6 = vadd.f32 %v760_v4, %v653_v17  ;;  %v823_v18 = vrot.slane %v795_v59, %v3300_v5  ;;  %v601_v37 = vrot.slane %v572_v53, %v3327_v23 }
  0x85   : > { %v605_v20 = vrot.slane %v3414_v52, %v3327_v23  ;;  %v825_v21 = vcombine.high %v809_v14, %v809_v14  ;;  %v847_v60 = vrot.slane %v809_v14, %v3327_v23  ;;  %v609_v24 = vrot.slane %v594_v2, %v3327_v23 }
  0x86   : > { %v826_v25 = vcombine.high %v3495_v10, %v3495_v10  ;;  %v827_v26 = vcombine.high %v823_v18, %v823_v18  ;;  %v851_v28 = vrot.slane %v823_v18, %v3327_v23  ;;  %v532_v29 = vadd.f32 %v524_v61, %v417_v38 }
  0x87   : > { %v855_v30 = vrot.slane %v825_v21, %v3327_v23  ;;  %v872_v17 = vmul.f32 %v3453_v8, %v847_v60  ;;  %v889_v52 = vmul.f32 %v2859_v16, %v3453_v8  ;;  %v533_v31 = vadd.f32 %v525_v1, %v418_v40 }
  0x88   : > { %v843_v19 = vrot.slane %v826_v25, %v3327_v23  ;;  %v859_v33 = vrot.slane %v827_v26, %v3327_v23  ;;  %v873_v34 = vmul.f32 %v3453_v8, %v851_v28  ;;  %v638_v22 = vmul.f32 %v3376_v12, %v601_v37 }
  0x89   : > { %v639_v36 = vmul.f32 %v3376_v12, %v605_v20  ;;  %v874_v42 = vmul.f32 %v3453_v8, %v855_v30  ;;  %v880_v38 = vadd.f32 %v872_v17, %v765_v63  ;;  %v640_v45 = vmul.f32 %v3376_v12, %v609_v24 }
  0x8a   : > { %v871_v40 = vmul.f32 %v3453_v8, %v843_v19  ;;  %v875_v46 = vmul.f32 %v3453_v8, %v859_v33  ;;  %v881_v48 = vadd.f32 %v873_v34, %v766_v9  ;;  %v687_v47 = vrot.slane %v3447_v27, %v3300_v5 }
  0x8b   : > { %v882_v49 = vadd.f32 %v874_v42, %v767_v11  ;;  %v890_v51 = vadd.f32 %v889_v52, %v3460_v39  ;;  %v894_v53 = vcombine.high %v3517_v43, %v3517_v43  ;;  %v3530_v55 = vrot.slane %v3517_v43, %v3300_v5 }
  0x8c   : > { %v879_v13 = vadd.f32 %v871_v40, %v764_v15  ;;  %v883_v54 = vadd.f32 %v875_v46, %v768_v6  ;;  %v1004_v12 = vmul.f32 %v2861_v44, %v3517_v43  ;;  %v709_v58 = vcombine.high %v687_v47, %v687_v47  ;;  %v2863_v40 = vld [vmem:[%s3291_s27 + $0x7] ss:$0 sm:$0xff] }
  0x8d   : > { %v908_v56 = vrot.slane %v894_v53, %v3300_v5  ;;  %v909_v27 = vcombine.high %v3530_v55, %v3530_v55  ;;  %v1009_v59 = vcombine.high %v3535_v57, %v3535_v57  ;;  %v646_v61 = vadd.f32 %v638_v22, %v531_v7 }
  0x8e   : > { %v3539_v39 = vadd.f32 %v1004_v12, %v890_v51  ;;  %v647_v62 = vadd.f32 %v639_v36, %v532_v29  ;;  %v3544_v1 = vadd.f32 %v640_v45, %v533_v31  ;;  %v716_v2 = vrot.slane %v687_v47, %v3327_v23 }
  0x8f   : > { %v910_v32 = vcombine.high %v908_v56, %v908_v56  ;;  %v924_v63 = vrot.slane %v908_v56, %v3300_v5  ;;  %v3548_v35 = vrot.slane %v909_v27, %v3300_v5  ;;  %v3552_v4 = vrot.slane %v3535_v57, %v3300_v5 }
  0x90   : > { %v720_v9 = vrot.slane %v3463_v41, %v3327_v23  ;;  %v724_v15 = vrot.slane %v709_v58, %v3327_v23  ;;  %v1023_v18 = vrot.slane %v1009_v59, %v3300_v5  ;;  %v753_v60 = vmul.f32 %v3426_v0, %v716_v2 }
  0x91   : > { %v938_v7 = vrot.slane %v910_v32, %v3300_v5  ;;  %v940_v11 = vcombine.high %v924_v63, %v924_v63  ;;  %v962_v14 = vrot.slane %v924_v63, %v3327_v23  ;;  %v941_v6 = vcombine.high %v3548_v35, %v3548_v35 }
  0x92   : > { %v1024_v16 = vcombine.high %v3552_v4, %v3552_v4  ;;  %v802_v24 = vrot.slane %v3475_v50, %v3300_v5  ;;  %v1025_v26 = vcombine.high %v1023_v18, %v1023_v18  ;;  %v754_v52 = vmul.f32 %v3426_v0, %v720_v9 }
  0x93   : > { %v942_v37 = vcombine.high %v938_v7, %v938_v7  ;;  %v966_v20 = vrot.slane %v938_v7, %v3327_v23  ;;  %v970_v41 = vrot.slane %v940_v11, %v3327_v23  ;;  %v987_v21 = vmul.f32 %v3517_v43, %v962_v14  ;;  %v2865_v7 = vld [vmem:[%s3291_s27 + $0x8] ss:$0 sm:$0xff] }
  0x94   : > { %v958_v25 = vrot.slane %v941_v6, %v3327_v23  ;;  %v755_v31 = vmul.f32 %v3426_v0, %v724_v15  ;;  %v1039_v33 = vrot.slane %v1023_v18, %v3300_v5  ;;  %v3580_v36 = vrot.slane %v1024_v16, %v3300_v5 }
  0x95   : > { %v974_v28 = vrot.slane %v942_v37, %v3327_v23  ;;  %v988_v29 = vmul.f32 %v3517_v43, %v966_v20  ;;  %v989_v30 = vmul.f32 %v3517_v43, %v970_v41  ;;  %v995_v17 = vadd.f32 %v987_v21, %v880_v38 }
  0x96   : > { %v986_v19 = vmul.f32 %v3517_v43, %v958_v25  ;;  %v761_v42 = vadd.f32 %v753_v60, %v646_v61  ;;  %v1053_v38 = vrot.slane %v1025_v26, %v3300_v5  ;;  %v1055_v45 = vcombine.high %v1039_v33, %v1039_v33 }
  0x97   : > { %v990_v50 = vmul.f32 %v3517_v43, %v974_v28  ;;  %v996_v34 = vadd.f32 %v988_v29, %v881_v48  ;;  %v997_v22 = vadd.f32 %v989_v30, %v882_v49  ;;  %v824_v46 = vcombine.high %v802_v24, %v802_v24 }
  0x98   : > { %v994_v44 = vadd.f32 %v986_v19, %v879_v13  ;;  %v831_v0 = vrot.slane %v802_v24, %v3327_v23  ;;  %v1056_v51 = vcombine.high %v3580_v36, %v3580_v36  ;;  %v835_v48 = vrot.slane %v3495_v10, %v3327_v23  ;;  %v3617_v24 = vld [vmem:[%s3283_s3 + $0x48] sm:$0xff] }
  0x99   : > { %v998_v47 = vadd.f32 %v990_v50, %v883_v54  ;;  %v1057_v49 = vcombine.high %v1053_v38, %v1053_v38  ;;  %v1077_v53 = vrot.slane %v1039_v33, %v3327_v23  ;;  %v1081_v13 = vrot.slane %v1053_v38, %v3327_v23  ;;  %v3595_v54 = vld [vmem:[%s3283_s3 + $0x40] sm:$0xff] }
  0x9a   : > { %v762_v12 = vadd.f32 %v754_v52, %v647_v62  ;;  %v1073_v56 = vrot.slane %v1056_v51, %v3327_v23  ;;  %v1085_v58 = vrot.slane %v1055_v45, %v3327_v23  ;;  %v1119_v27 = vmul.f32 %v2863_v40, %v3535_v57 }
  0x9b   : > { %v1089_v59 = vrot.slane %v1057_v49, %v3327_v23  ;;  %v1102_v61 = vmul.f32 %v3535_v57, %v1077_v53  ;;  %v1103_v10 = vmul.f32 %v3535_v57, %v1081_v13  ;;  %v1124_v32 = vcombine.high %v3595_v54, %v3595_v54 }
  0x9c   : > { %v839_v63 = vrot.slane %v824_v46, %v3327_v23  ;;  %v868_v62 = vmul.f32 %v3453_v8, %v831_v0  ;;  %v1101_v2 = vmul.f32 %v3535_v57, %v1073_v56  ;;  %v1104_v9 = vmul.f32 %v3535_v57, %v1085_v58 }
  0x9d   : > { %v869_v11 = vmul.f32 %v3453_v8, %v835_v48  ;;  %v1105_v14 = vmul.f32 %v3535_v57, %v1089_v59  ;;  %v1110_v15 = vadd.f32 %v1102_v61, %v995_v17  ;;  %v1111_v6 = vadd.f32 %v1103_v10, %v996_v34 }
  0x9e   : > { %v1109_v18 = vadd.f32 %v1101_v2, %v994_v44  ;;  %v1112_v16 = vadd.f32 %v1104_v9, %v997_v22  ;;  %v1120_v37 = vadd.f32 %v1119_v27, %v3539_v39  ;;  %v3612_v20 = vrot.slane %v3595_v54, %v3300_v5 }
  0x9f   : > { %v1113_v41 = vadd.f32 %v1105_v14, %v998_v47  ;;  %v1138_v21 = vrot.slane %v1124_v32, %v3300_v5  ;;  %v1234_v60 = vmul.f32 %v2865_v7, %v3595_v54  ;;  %v917_v25 = vrot.slane %v3530_v55, %v3300_v5  ;;  %v2867_v7 = vld [vmem:[%s3291_s27 + $0x9] ss:$0 sm:$0xff] }
  0xa0   : > { %v1139_v26 = vcombine.high %v3612_v20, %v3612_v20  ;;  %v1239_v39 = vcombine.high %v3617_v24, %v3617_v24  ;;  %v763_v28 = vadd.f32 %v755_v31, %v3544_v1  ;;  %v870_v52 = vmul.f32 %v3453_v8, %v839_v63 }
  0xa1   : > { %v1140_v29 = vcombine.high %v1138_v21, %v1138_v21  ;;  %v1154_v30 = vrot.slane %v1138_v21, %v3300_v5  ;;  %v3627_v17 = vadd.f32 %v1234_v60, %v1120_v37  ;;  %v876_v19 = vadd.f32 %v868_v62, %v761_v42 }
  0xa2   : > { %v3630_v33 = vadd.f32 %v869_v11, %v762_v12  ;;  %v3633_v55 = vrot.slane %v1139_v26, %v3300_v5  ;;  %v939_v50 = vcombine.high %v917_v25, %v917_v25  ;;  %v946_v1 = vrot.slane %v917_v25, %v3327_v23 }
  0xa3   : > { %v1168_v34 = vrot.slane %v1140_v29, %v3300_v5  ;;  %v1170_v22 = vcombine.high %v1154_v30, %v1154_v30  ;;  %v1192_v44 = vrot.slane %v1154_v30, %v3327_v23  ;;  %v3642_v8 = vrot.slane %v3617_v24, %v3300_v5 }
  0xa4   : > { %v1171_v31 = vcombine.high %v3633_v55, %v3633_v55  ;;  %v1253_v42 = vrot.slane %v1239_v39, %v3300_v5  ;;  %v950_v0 = vrot.slane %v3548_v35, %v3327_v23  ;;  %v878_v56 = vadd.f32 %v870_v52, %v763_v28 }
  0xa5   : > { %v1172_v38 = vcombine.high %v1168_v34, %v1168_v34  ;;  %v1196_v45 = vrot.slane %v1168_v34, %v3327_v23  ;;  %v1200_v40 = vrot.slane %v1170_v22, %v3327_v23  ;;  %v1217_v46 = vmul.f32 %v3595_v54, %v1192_v44  ;;  %v3685_v22 = vld [vmem:[%s3283_s3 + $0x50] sm:$0xff]  ;;  %v2869_v44 = vld [vmem:[%s3291_s27 + $0xa] ss:$0 sm:$0xff] }
  0xa6   : > { %v1188_v47 = vrot.slane %v1171_v31, %v3327_v23  ;;  %v1254_v51 = vcombine.high %v3642_v8, %v3642_v8  ;;  %v1255_v48 = vcombine.high %v1253_v42, %v1253_v42  ;;  %v954_v58 = vrot.slane %v939_v50, %v3327_v23 }
  0xa7   : > { %v1204_v49 = vrot.slane %v1172_v38, %v3327_v23  ;;  %v1218_v53 = vmul.f32 %v3595_v54, %v1196_v45  ;;  %v1219_v13 = vmul.f32 %v3595_v54, %v1200_v40  ;;  %v1225_v12 = vadd.f32 %v1217_v46, %v1110_v15 }
  0xa8   : > { %v1032_v35 = vrot.slane %v3552_v4, %v3300_v5  ;;  %v1216_v27 = vmul.f32 %v3595_v54, %v1188_v47  ;;  %v1269_v32 = vrot.slane %v1253_v42, %v3300_v5  ;;  %v983_v63 = vmul.f32 %v3517_v43, %v946_v1 }
  0xa9   : > { %v1220_v59 = vmul.f32 %v3595_v54, %v1204_v49  ;;  %v1226_v61 = vadd.f32 %v1218_v53, %v1111_v6  ;;  %v1227_v10 = vadd.f32 %v1219_v13, %v1112_v16  ;;  %v3664_v2 = vrot.slane %v1254_v51, %v3300_v5  ;;  %v3702_v53 = vld [vmem:[%s3283_s3 + $0x58] sm:$0xff] }
  0xaa   : > { %v1224_v62 = vadd.f32 %v1216_v27, %v1109_v18  ;;  %v1283_v9 = vrot.slane %v1255_v48, %v3300_v5  ;;  %v984_v11 = vmul.f32 %v3517_v43, %v950_v0  ;;  %v1285_v14 = vcombine.high %v1269_v32, %v1269_v32 }
  0xab   : > { %v1228_v4 = vadd.f32 %v1220_v59, %v1113_v41  ;;  %v1307_v15 = vrot.slane %v1269_v32, %v3327_v23  ;;  %v1054_v37 = vcombine.high %v1032_v35, %v1032_v35  ;;  %v1061_v6 = vrot.slane %v1032_v35, %v3327_v23 }
  0xac   : > { %v1286_v18 = vcombine.high %v3664_v2, %v3664_v2  ;;  %v1287_v16 = vcombine.high %v1283_v9, %v1283_v9  ;;  %v1311_v21 = vrot.slane %v1283_v9, %v3327_v23  ;;  %v1315_v60 = vrot.slane %v1285_v14, %v3327_v23 }
  0xad   : > { %v1332_v25 = vmul.f32 %v3617_v24, %v1307_v15  ;;  %v1349_v41 = vmul.f32 %v2867_v7, %v3617_v24  ;;  %v985_v26 = vmul.f32 %v3517_v43, %v954_v58  ;;  %v991_v39 = vadd.f32 %v983_v63, %v876_v19 }
  0xae   : > { %v1303_v28 = vrot.slane %v1286_v18, %v3327_v23  ;;  %v1319_v29 = vrot.slane %v1287_v16, %v3327_v23  ;;  %v1065_v30 = vrot.slane %v3580_v36, %v3327_v23  ;;  %v1333_v52 = vmul.f32 %v3617_v24, %v1311_v21 }
  0xaf   : > { %v1334_v50 = vmul.f32 %v3617_v24, %v1315_v60  ;;  %v1340_v34 = vadd.f32 %v1332_v25, %v1225_v12  ;;  %v1069_v1 = vrot.slane %v1054_v37, %v3327_v23  ;;  %v1098_v43 = vmul.f32 %v3535_v57, %v1061_v6 }
  0xb0   : > { %v1331_v19 = vmul.f32 %v3617_v24, %v1303_v28  ;;  %v1335_v31 = vmul.f32 %v3617_v24, %v1319_v29  ;;  %v1341_v42 = vadd.f32 %v1333_v52, %v1226_v61  ;;  %v1350_v36 = vadd.f32 %v1349_v41, %v3627_v17 }
  0xb1   : > { %v1342_v38 = vadd.f32 %v1334_v50, %v1227_v10  ;;  %v1354_v45 = vcombine.high %v3685_v22, %v3685_v22  ;;  %v1361_v0 = vrot.slane %v3685_v22, %v3300_v5  ;;  %v1464_v47 = vmul.f32 %v2869_v44, %v3685_v22 }
  0xb2   : > { %v1339_v40 = vadd.f32 %v1331_v19, %v1224_v62  ;;  %v1343_v46 = vadd.f32 %v1335_v31, %v1228_v4  ;;  %v992_v51 = vadd.f32 %v984_v11, %v3630_v33  ;;  %v1099_v48 = vmul.f32 %v3535_v57, %v1065_v30 }
  0xb3   : > { %v1368_v49 = vrot.slane %v1354_v45, %v3300_v5  ;;  %v1147_v17 = vrot.slane %v3612_v20, %v3300_v5  ;;  %v1369_v13 = vcombine.high %v1361_v0, %v1361_v0  ;;  %v3706_v12 = vadd.f32 %v1464_v47, %v1350_v36  ;;  %v2871_v36 = vld [vmem:[%s3291_s27 + $0xb] ss:$0 sm:$0xff] }
  0xb4   : > { %v1469_v58 = vcombine.high %v3702_v53, %v3702_v53  ;;  %v993_v35 = vadd.f32 %v985_v26, %v878_v56  ;;  %v1100_v27 = vmul.f32 %v3535_v57, %v1069_v1  ;;  %v1106_v61 = vadd.f32 %v1098_v43, %v991_v39 }
  0xb5   : > { %v1370_v59 = vcombine.high %v1368_v49, %v1368_v49  ;;  %v1384_v33 = vrot.slane %v1368_v49, %v3300_v5  ;;  %v1169_v10 = vcombine.high %v1147_v17, %v1147_v17  ;;  %v3713_v32 = vrot.slane %v1369_v13, %v3300_v5 }
  0xb6   : > { %v3717_v20 = vrot.slane %v3702_v53, %v3300_v5  ;;  %v3719_v63 = vadd.f32 %v1099_v48, %v992_v51  ;;  %v1176_v57 = vrot.slane %v1147_v17, %v3327_v23  ;;  %v1483_v11 = vrot.slane %v1469_v58, %v3300_v5 }
  0xb7   : > { %v1398_v62 = vrot.slane %v1370_v59, %v3300_v5  ;;  %v1400_v9 = vcombine.high %v1384_v33, %v1384_v33  ;;  %v1422_v56 = vrot.slane %v1384_v33, %v3327_v23  ;;  %v1401_v7 = vcombine.high %v3713_v32, %v3713_v32 }
  0xb8   : > { %v1484_v4 = vcombine.high %v3717_v20, %v3717_v20  ;;  %v1180_v18 = vrot.slane %v3633_v55, %v3327_v23  ;;  %v1184_v16 = vrot.slane %v1169_v10, %v3327_v23  ;;  %v1485_v60 = vcombine.high %v1483_v11, %v1483_v11 }
  0xb9   : > { %v1402_v14 = vcombine.high %v1398_v62, %v1398_v62  ;;  %v1426_v15 = vrot.slane %v1398_v62, %v3327_v23  ;;  %v1430_v37 = vrot.slane %v1400_v9, %v3327_v23  ;;  %v1447_v6 = vmul.f32 %v3685_v22, %v1422_v56  ;;  %v2873_v9 = vld [vmem:[%s3291_s27 + $0xc] ss:$0 sm:$0xff] }
  0xba   : > { %v1418_v21 = vrot.slane %v1401_v7, %v3327_v23  ;;  %v1108_v28 = vadd.f32 %v1100_v27, %v993_v35  ;;  %v1262_v29 = vrot.slane %v3642_v8, %v3300_v5  ;;  %v1499_v55 = vrot.slane %v1483_v11, %v3300_v5 }
  0xbb   : > { %v1434_v25 = vrot.slane %v1402_v14, %v3327_v23  ;;  %v1448_v41 = vmul.f32 %v3685_v22, %v1426_v15  ;;  %v1449_v26 = vmul.f32 %v3685_v22, %v1430_v37  ;;  %v1455_v39 = vadd.f32 %v1447_v6, %v1340_v34 }
  0xbc   : > { %v1446_v30 = vmul.f32 %v3685_v22, %v1418_v21  ;;  %v3745_v1 = vrot.slane %v1484_v4, %v3300_v5  ;;  %v1213_v43 = vmul.f32 %v3595_v54, %v1176_v57  ;;  %v1513_v34 = vrot.slane %v1485_v60, %v3300_v5  ;;  %v3784_v21 = vld [vmem:[%s3283_s3 + $0x68] sm:$0xff] }
  0xbd   : > { %v1450_v52 = vmul.f32 %v3685_v22, %v1434_v25  ;;  %v1456_v50 = vadd.f32 %v1448_v41, %v1341_v42  ;;  %v1457_v44 = vadd.f32 %v1449_v26, %v1342_v38  ;;  %v1515_v31 = vcombine.high %v1499_v55, %v1499_v55 }
  0xbe   : > { %v1454_v19 = vadd.f32 %v1446_v30, %v1339_v40  ;;  %v1214_v8 = vmul.f32 %v3595_v54, %v1180_v18  ;;  %v1215_v45 = vmul.f32 %v3595_v54, %v1184_v16  ;;  %v1516_v42 = vcombine.high %v3745_v1, %v3745_v1 }
  0xbf   : > { %v1458_v47 = vadd.f32 %v1450_v52, %v1343_v46  ;;  %v1291_v38 = vrot.slane %v1262_v29, %v3327_v23  ;;  %v1517_v51 = vcombine.high %v1513_v34, %v1513_v34  ;;  %v1537_v48 = vrot.slane %v1499_v55, %v3327_v23  ;;  %v3764_v46 = vld [vmem:[%s3283_s3 + $0x60] sm:$0xff] }
  0xc0   : > { %v1541_v40 = vrot.slane %v1513_v34, %v3327_v23  ;;  %v3758_v49 = vrot.slane %v1361_v0, %v3300_v5  ;;  %v1533_v17 = vrot.slane %v1516_v42, %v3327_v23  ;;  %v1545_v13 = vrot.slane %v1515_v31, %v3327_v23 }
  0xc1   : > { %v1579_v54 = vmul.f32 %v2871_v36, %v3702_v53  ;;  %v1549_v58 = vrot.slane %v1517_v51, %v3327_v23  ;;  %v1562_v35 = vmul.f32 %v3702_v53, %v1537_v48  ;;  %v1584_v59 = vcombine.high %v3764_v46, %v3764_v46 }
  0xc2   : > { %v1563_v27 = vmul.f32 %v3702_v53, %v1541_v40  ;;  %v1221_v33 = vadd.f32 %v1213_v43, %v1106_v61  ;;  %v1284_v0 = vcombine.high %v1262_v29, %v1262_v29  ;;  %v1561_v10 = vmul.f32 %v3702_v53, %v1533_v17 }
  0xc3   : > { %v1564_v62 = vmul.f32 %v3702_v53, %v1545_v13  ;;  %v1328_v56 = vmul.f32 %v3617_v24, %v1291_v38  ;;  %v1565_v57 = vmul.f32 %v3702_v53, %v1549_v58  ;;  %v1570_v7 = vadd.f32 %v1562_v35, %v1455_v39 }
  0xc4   : > { %v1571_v11 = vadd.f32 %v1563_v27, %v1456_v50  ;;  %v1569_v4 = vadd.f32 %v1561_v10, %v1454_v19  ;;  %v1580_v15 = vadd.f32 %v1579_v54, %v3706_v12  ;;  %v1591_v61 = vrot.slane %v3764_v46, %v3300_v5 }
  0xc5   : > { %v1572_v14 = vadd.f32 %v1564_v62, %v1457_v44  ;;  %v1406_v37 = vrot.slane %v3758_v49, %v3327_v23  ;;  %v1573_v6 = vadd.f32 %v1565_v57, %v1458_v47  ;;  %v1598_v18 = vrot.slane %v1584_v59, %v3300_v5 }
  0xc6   : > { %v1694_v16 = vmul.f32 %v2873_v9, %v3764_v46  ;;  %v3787_v60 = vadd.f32 %v1214_v8, %v3719_v63  ;;  %v3791_v25 = vrot.slane %v3717_v20, %v3300_v5  ;;  %v1599_v12 = vcombine.high %v1591_v61, %v1591_v61 }
  0xc7   : > { %v1699_v41 = vcombine.high %v3784_v21, %v3784_v21  ;;  %v3795_v26 = vadd.f32 %v1215_v45, %v1108_v28  ;;  %v1600_v39 = vcombine.high %v1598_v18, %v1598_v18  ;;  %v1614_v29 = vrot.slane %v1598_v18, %v3300_v5 }
  0xc8   : > { %v3798_v30 = vadd.f32 %v1694_v16, %v1580_v15  ;;  %v1295_v55 = vrot.slane %v3664_v2, %v3327_v23  ;;  %v1299_v63 = vrot.slane %v1284_v0, %v3327_v23  ;;  %v1336_v52 = vadd.f32 %v1328_v56, %v1221_v33  ;;  %v2875_v15 = vld [vmem:[%s3291_s27 + $0xd] ss:$0 sm:$0xff] }
  0xc9   : > { %v3804_v20 = vrot.slane %v1599_v12, %v3300_v5  ;;  %v1443_v50 = vmul.f32 %v3685_v22, %v1406_v37  ;;  %v1628_v44 = vrot.slane %v1600_v39, %v3300_v5  ;;  %v1630_v28 = vcombine.high %v1614_v29, %v1614_v29 }
  0xca   : > { %v1652_v43 = vrot.slane %v1614_v29, %v3327_v23  ;;  %v1521_v19 = vrot.slane %v3791_v25, %v3327_v23  ;;  %v1706_v2 = vrot.slane %v3784_v21, %v3300_v5  ;;  %v1713_v31 = vrot.slane %v1699_v41, %v3300_v5 }
  0xcb   : > { %v1631_v34 = vcombine.high %v3804_v20, %v3804_v20  ;;  %v1632_v36 = vcombine.high %v1628_v44, %v1628_v44  ;;  %v1656_v8 = vrot.slane %v1628_v44, %v3327_v23  ;;  %v1660_v45 = vrot.slane %v1630_v28, %v3327_v23 }
  0xcc   : > { %v1677_v47 = vmul.f32 %v3764_v46, %v1652_v43  ;;  %v3820_v42 = vrot.slane %v1591_v61, %v3300_v5  ;;  %v1714_v51 = vcombine.high %v1706_v2, %v1706_v2  ;;  %v1715_v48 = vcombine.high %v1713_v31, %v1713_v31  ;;  %v3859_v43 = vld [vmem:[%s3283_s3 + $0x70] sm:$0xff] }
  0xcd   : > { %v1648_v38 = vrot.slane %v1631_v34, %v3327_v23  ;;  %v1664_v40 = vrot.slane %v1632_v36, %v3327_v23  ;;  %v1678_v17 = vmul.f32 %v3764_v46, %v1656_v8  ;;  %v1679_v13 = vmul.f32 %v3764_v46, %v1660_v45 }
  0xce   : > { %v1685_v54 = vadd.f32 %v1677_v47, %v1570_v7  ;;  %v1329_v58 = vmul.f32 %v3617_v24, %v1295_v55  ;;  %v1451_v35 = vadd.f32 %v1443_v50, %v1336_v52  ;;  %v1558_v27 = vmul.f32 %v3702_v53, %v1521_v19  ;;  %v2877_v19 = vld [vmem:[%s3291_s27 + $0xe] ss:$0 sm:$0xff] }
  0xcf   : > { %v1676_v59 = vmul.f32 %v3764_v46, %v1648_v38  ;;  %v1680_v33 = vmul.f32 %v3764_v46, %v1664_v40  ;;  %v1686_v0 = vadd.f32 %v1678_v17, %v1571_v11  ;;  %v1687_v10 = vadd.f32 %v1679_v13, %v1572_v14 }
  0xd0   : > { %v1729_v62 = vrot.slane %v1713_v31, %v3300_v5  ;;  %v1636_v9 = vrot.slane %v3820_v42, %v3327_v23  ;;  %v3834_v57 = vrot.slane %v1714_v51, %v3300_v5  ;;  %v1743_v7 = vrot.slane %v1715_v48, %v3300_v5 }
  0xd1   : > { %v1684_v56 = vadd.f32 %v1676_v59, %v1569_v4  ;;  %v1688_v61 = vadd.f32 %v1680_v33, %v1573_v6  ;;  %v3839_v37 = vrot.slane %v1706_v2, %v3300_v5  ;;  %v1330_v14 = vmul.f32 %v3617_v24, %v1299_v63 }
  0xd2   : > { %v1745_v18 = vcombine.high %v1729_v62, %v1729_v62  ;;  %v1767_v11 = vrot.slane %v1729_v62, %v3327_v23  ;;  %v1399_v16 = vcombine.high %v3758_v49, %v3758_v49  ;;  %v1746_v4 = vcombine.high %v3834_v57, %v3834_v57 }
  0xd3   : > { %v1747_v12 = vcombine.high %v1743_v7, %v1743_v7  ;;  %v1771_v41 = vrot.slane %v1743_v7, %v3327_v23  ;;  %v1809_v29 = vmul.f32 %v2875_v15, %v3784_v21  ;;  %v1566_v55 = vadd.f32 %v1558_v27, %v1451_v35  ;;  %v3877_v27 = vld [vmem:[%s3283_s3 + $0x78] sm:$0xff] }
  0xd4   : > { %v1775_v6 = vrot.slane %v1745_v18, %v3327_v23  ;;  %v1792_v39 = vmul.f32 %v3784_v21, %v1767_v11  ;;  %v1673_v24 = vmul.f32 %v3764_v46, %v1636_v9  ;;  %v1763_v63 = vrot.slane %v1746_v4, %v3327_v23 }
  0xd5   : > { %v1779_v49 = vrot.slane %v1747_v12, %v3327_v23  ;;  %v1751_v52 = vrot.slane %v3839_v37, %v3327_v23  ;;  %v1793_v50 = vmul.f32 %v3784_v21, %v1771_v41  ;;  %v1410_v34 = vrot.slane %v3713_v32, %v3327_v23 }
  0xd6   : > { %v1794_v44 = vmul.f32 %v3784_v21, %v1775_v6  ;;  %v1800_v28 = vadd.f32 %v1792_v39, %v1685_v54  ;;  %v1414_v2 = vrot.slane %v1399_v16, %v3327_v23  ;;  %v1791_v31 = vmul.f32 %v3784_v21, %v1763_v63 }
  0xd7   : > { %v1795_v36 = vmul.f32 %v3784_v21, %v1779_v49  ;;  %v1801_v8 = vadd.f32 %v1793_v50, %v1686_v0  ;;  %v1810_v47 = vadd.f32 %v1809_v29, %v3798_v30  ;;  %v1814_v38 = vcombine.high %v3859_v43, %v3859_v43 }
  0xd8   : > { %v1802_v45 = vadd.f32 %v1794_v44, %v1687_v10  ;;  %v1799_v51 = vadd.f32 %v1791_v31, %v1684_v56  ;;  %v1821_v40 = vrot.slane %v3859_v43, %v3300_v5  ;;  %v1924_v32 = vmul.f32 %v2877_v19, %v3859_v43 }
  0xd9   : > { %v1803_v48 = vadd.f32 %v1795_v36, %v1688_v61  ;;  %v1337_v17 = vadd.f32 %v1329_v58, %v3787_v60  ;;  %v1681_v13 = vadd.f32 %v1673_v24, %v1566_v55  ;;  %v1788_v54 = vmul.f32 %v3784_v21, %v1751_v52 }
  0xda   : > { %v1828_v35 = vrot.slane %v1814_v38, %v3300_v5  ;;  %v1829_v30 = vcombine.high %v1821_v40, %v1821_v40  ;;  %v3880_v59 = vrot.slane %v1821_v40, %v3300_v5  ;;  %v3882_v33 = vadd.f32 %v1924_v32, %v1810_v47 }
  0xdb   : > { %v1929_v0 = vcombine.high %v3877_v27, %v3877_v27  ;;  %v3887_v10 = vadd.f32 %v1330_v14, %v3795_v26  ;;  %v1444_v60 = vmul.f32 %v3685_v22, %v1410_v34  ;;  %v3892_v9 = vmul.f32 %v3685_v22, %v1414_v2 }
  0xdc   : > { %v1830_v58 = vcombine.high %v1828_v35, %v1828_v35  ;;  %v1844_v62 = vrot.slane %v1828_v35, %v3300_v5  ;;  %v3895_v56 = vrot.slane %v1829_v30, %v3300_v5  ;;  %v1866_v7 = vrot.slane %v3880_v59, %v3327_v23 }
  0xdd   : > { %v1936_v15 = vrot.slane %v3877_v27, %v3300_v5  ;;  %v1514_v26 = vcombine.high %v3791_v25, %v3791_v25  ;;  %v1796_v14 = vadd.f32 %v1788_v54, %v1681_v13  ;;  %v1943_v16 = vrot.slane %v1929_v0, %v3300_v5  ;;  %v2879_v13 = vld [vmem:[%s3291_s27 + $0xf] ss:$0 sm:$0xff] }
  0xde   : > { %v1858_v61 = vrot.slane %v1830_v58, %v3300_v5  ;;  %v1860_v18 = vcombine.high %v1844_v62, %v1844_v62  ;;  %v1882_v11 = vrot.slane %v1844_v62, %v3327_v23  ;;  %v1861_v22 = vcombine.high %v3895_v56, %v3895_v56 }
  0xdf   : > { %v1944_v4 = vcombine.high %v1936_v15, %v1936_v15  ;;  %v1903_v29 = vmul.f32 %v3859_v43, %v1866_v7  ;;  %v1945_v55 = vcombine.high %v1943_v16, %v1943_v16  ;;  %v3914_v24 = vrot.slane %v1936_v15, %v3300_v5 }
  0xe0   : > { %v1862_v12 = vcombine.high %v1858_v61, %v1858_v61  ;;  %v1886_v41 = vrot.slane %v1858_v61, %v3327_v23  ;;  %v1890_v6 = vrot.slane %v1860_v18, %v3327_v23  ;;  %v1907_v39 = vmul.f32 %v3859_v43, %v1882_v11 }
  0xe1   : > { %v1878_v25 = vrot.slane %v1861_v22, %v3327_v23  ;;  %v1452_v44 = vadd.f32 %v1444_v60, %v1337_v17  ;;  %v1525_v19 = vrot.slane %v3745_v1, %v3327_v23  ;;  %v1959_v2 = vrot.slane %v1943_v16, %v3300_v5 }
  0xe2   : > { %v1894_v63 = vrot.slane %v1862_v12, %v3327_v23  ;;  %v1908_v49 = vmul.f32 %v3859_v43, %v1886_v41  ;;  %v1909_v52 = vmul.f32 %v3859_v43, %v1890_v6  ;;  %v1915_v50 = vadd.f32 %v1907_v39, %v1800_v28 }
  0xe3   : > { %v1906_v34 = vmul.f32 %v3859_v43, %v1878_v25  ;;  %v3925_v38 = vrot.slane %v1944_v4, %v3300_v5  ;;  %v1529_v40 = vrot.slane %v1514_v26, %v3327_v23  ;;  %v1973_v28 = vrot.slane %v1945_v55, %v3300_v5 }
  0xe4   : > { %v1910_v31 = vmul.f32 %v3859_v43, %v1894_v63  ;;  %v1916_v36 = vadd.f32 %v1908_v49, %v1801_v8  ;;  %v1917_v47 = vadd.f32 %v1909_v52, %v1802_v45  ;;  %v1975_v17 = vcombine.high %v1959_v2, %v1959_v2 }
  0xe5   : > { %v1914_v32 = vadd.f32 %v1906_v34, %v1799_v51  ;;  %v1911_v54 = vadd.f32 %v1903_v29, %v1796_v14  ;;  %v1976_v35 = vcombine.high %v3925_v38, %v3925_v38  ;;  %v1981_v30 = vrot.slane %v3914_v24, %v3327_v23 }
  0xe6   : > { %v1918_v1 = vadd.f32 %v1910_v31, %v1803_v48  ;;  %v1559_v8 = vmul.f32 %v3702_v53, %v1525_v19  ;;  %v1977_v45 = vcombine.high %v1973_v28, %v1973_v28  ;;  %v1997_v0 = vrot.slane %v1959_v2, %v3327_v23 }
  0xe7   : > { %v2001_v60 = vrot.slane %v1973_v28, %v3327_v23  ;;  %v1993_v51 = vrot.slane %v1976_v35, %v3327_v23  ;;  %v2005_v5 = vrot.slane %v1975_v17, %v3327_v23  ;;  %v2018_v58 = vmul.f32 %v3877_v27, %v1981_v30 }
  0xe8   : > { %v2039_v48 = vmul.f32 %v2879_v13, %v3877_v27  ;;  %v1629_v62 = vcombine.high %v3820_v42, %v3820_v42  ;;  %v2009_v7 = vrot.slane %v1977_v45, %v3327_v23  ;;  %v2022_v15 = vmul.f32 %v3877_v27, %v1997_v0 }
  0xe9   : > { %v2023_v26 = vmul.f32 %v3877_v27, %v2001_v60  ;;  %v1640_v61 = vrot.slane %v3804_v20, %v3327_v23  ;;  %v2021_v18 = vmul.f32 %v3877_v27, %v1993_v51  ;;  %v2024_v11 = vmul.f32 %v3877_v27, %v2005_v5 }
  0xea   : > { %v2026_v14 = vadd.f32 %v2018_v58, %v1911_v54  ;;  %v2025_v22 = vmul.f32 %v3877_v27, %v2009_v7  ;;  %v3951_v16 = vadd.f32 %v2022_v15, %v1915_v50  ;;  %v3960_v41 = vadd.f32 %v2039_v48, %v3882_v33 }
  0xeb   : > { %v3953_v4 = vadd.f32 %v2023_v26, %v1916_v36  ;;  %v3955_v42 = vadd.f32 %v2021_v18, %v1914_v32  ;;  %v3957_v12 = vadd.f32 %v2024_v11, %v1917_v47  ;;  %v1453_v20 = vadd.f32 %v3892_v9, %v3887_v10 }
  0xec   : > { %2956 = vrcp.f32 %v2026_v14  ;;  %v1560_v6 = vmul.f32 %v3702_v53, %v1529_v40  ;;  %v1644_v39 = vrot.slane %v1629_v62, %v3327_v23  ;;  %v3966_v25 = vadd.f32 %v2025_v22, %v1918_v1 }
  0xed   : > { %v1567_v29 = vadd.f32 %v1559_v8, %v1452_v44  ;;  %v1674_v55 = vmul.f32 %v3764_v46, %v1640_v61  ;;  %v1744_v63 = vcombine.high %v3839_v37, %v3839_v37  ;;  %v1755_v33 = vrot.slane %v3834_v57, %v3327_v23 }
  0xee   : > { %v1568_v49 = vadd.f32 %v1560_v6, %v1453_v20  ;;  %v1675_v52 = vmul.f32 %v3764_v46, %v1644_v39  ;;  %v1859_v9 = vcombine.high %v3880_v59, %v3880_v59  ;;  %v1870_v44 = vrot.slane %v3895_v56, %v3327_v23 }
  0xef   : > { %v1682_v50 = vadd.f32 %v1674_v55, %v1567_v29  ;;  %v1759_v10 = vrot.slane %v1744_v63, %v3327_v23  ;;  %v1789_v53 = vmul.f32 %v3784_v21, %v1755_v33  ;;  %v1974_v31 = vcombine.high %v3914_v24, %v3914_v24 }
  0xf0   : > { %v1683_v34 = vadd.f32 %v1675_v52, %v1568_v49  ;;  %v1874_v57 = vrot.slane %v1859_v9, %v3327_v23  ;;  %v1904_v46 = vmul.f32 %v3859_v43, %v1870_v44  ;;  %v1985_v36 = vrot.slane %v3925_v38, %v3327_v23 }
  0xf1   : > { %v1790_v37 = vmul.f32 %v3784_v21, %v1759_v10  ;;  %v1797_v2 = vadd.f32 %v1789_v53, %v1682_v50  ;;  %v1989_v28 = vrot.slane %v1974_v31, %v3327_v23  ;;  %v2090_v0 = vrot.slane %v3951_v16, %v3327_v23 }
  0xf2   : > { %v1905_v56 = vmul.f32 %v3859_v43, %v1874_v57  ;;  %v2019_v21 = vmul.f32 %v3877_v27, %v1985_v36  ;;  %v2101_v60 = vrot.slane %v3953_v4, %v3327_v23  ;;  %v2112_v11 = vrot.slane %v3957_v12, %v3327_v23 }
  0xf3   : > { %v1798_v40 = vadd.f32 %v1790_v37, %v1683_v34  ;;  %v1912_v32 = vadd.f32 %v1904_v46, %v1797_v2  ;;  %v2020_v1 = vmul.f32 %v3877_v27, %v1989_v28  ;;  %v2123_v6 = vrot.slane %v3966_v25, %v3327_v23 }
  0xf4   : > { %v4028_v52 = vsub.s32 1, %v3297_v3 }
  0xf5   : > { %v1913_v54 = vadd.f32 %v1905_v56, %v1798_v40  ;;  %v2027_v35 = vadd.f32 %v2019_v21, %v1912_v32 }
  0xf6   : > { %v2957_v19 = vpop.eup %2956 }
  0xf7   : > { %v2042_v47 = vmul.f32 %v2957_v19, %v2026_v14  ;;  %v2028_v8 = vadd.f32 %v2020_v1, %v1913_v54  ;;  %v2057_v43 = vrot.slane %v2027_v35, %v3327_v23 }
  0xf9   : > { %v2043_v59 = vsub.f32 2.0, %v2042_v47  ;;  %v2068_v56 = vrot.slane %v2028_v8, %v3327_v23 }
  0xfb   : > { %v2044_v17 = vmul.f32 %v2957_v19, %v2043_v59 }
  0xfd   : > { %v2045_v13 = vmul.f32 %v2044_v17, %v2026_v14 }
  0xff   : > { %v2046_v24 = vsub.f32 2.0, %v2045_v13 }
 0x101   : > { %v2047_v30 = vmul.f32 %v2046_v24, %v2044_v17 }
 0x103   : > { %v2051_v38 = vrot.slane %v2047_v30, %v3327_v23  ;;  %v3993_v45 = vmul.f32 %v2047_v30, %v3960_v41 }
 0x105   : > { %v4000_v51 = vmul.f32 %v2051_v38, %v2026_v14  ;;  %v2060_v27 = vmul.f32 %v3993_v45, %v2027_v35  ;;  %v2071_v5 = vmul.f32 %v3993_v45, %v2028_v8  ;;  %v2082_v58 = vmul.f32 %v3993_v45, %v3955_v42 }
 0x106   : > { %v2093_v48 = vmul.f32 %v3993_v45, %v3951_v16  ;;  %v2104_v62 = vmul.f32 %v3993_v45, %v3953_v4  ;;  %v2115_v7 = vmul.f32 %v3993_v45, %v3957_v12  ;;  %v2126_v15 = vmul.f32 %v3993_v45, %v3966_v25 }
 0x107   : > { %v2058_v26 = vmul.f32 %v2057_v43, %v4000_v51  ;;  %v2062_v61 = vrot.slane %v2060_v27, 7  ;;  %v2073_v18 = vrot.slane %v2071_v5, 6  ;;  %v2084_v14 = vrot.slane %v2082_v58, 5 }
 0x108   : > { %v2091_v22 = vmul.f32 %v2090_v0, %v4000_v51  ;;  %v2095_v20 = vrot.slane %v2093_v48, 4  ;;  %v2102_v50 = vmul.f32 %v2101_v60, %v4000_v51  ;;  %v2106_v10 = vrot.slane %v2104_v62, 3 }
 0x109   : > { %v2059_v39 = vsub.f32 %v2027_v35, %v2058_v26  ;;  %v2064_v29 = vsub.f32 %v3960_v41, %v2062_v61  ;;  %v2075_v55 = vsub.f32 %v3960_v41, %v2073_v18  ;;  %v2086_v63 = vsub.f32 %v3960_v41, %v2084_v14 }
 0x10a   : > { %v4024_v33 = vsub.f32 %v3951_v16, %v2091_v22  ;;  %v2097_v49 = vsub.f32 %v3960_v41, %v2095_v20  ;;  %v2113_v53 = vmul.f32 %v2112_v11, %v4000_v51  ;;  %v2117_v9 = vrot.slane %v2115_v7, 2 }
 0x10b   : > { %v2124_v44 = vmul.f32 %v2123_v6, %v4000_v51  ;;  %v2128_v19 = vrot.slane %v2126_v15, 1  ;;  %2958 = vrcp.f32 %v2059_v39  ;;  %v2147_v34 = vrot.slane %v4000_v51, %v4028_v52 }
 0x10c   : > { %v2103_v16 = vsub.f32 %v3953_v4, %v2102_v50  ;;  %v2108_v37 = vsub.f32 %v3960_v41, %v2106_v10  ;;  %v2114_v2 = vsub.f32 %v3957_v12, %v2113_v53  ;;  %v2119_v57 = vsub.f32 %v3960_v41, %v2117_v9 }
 0x10d   : > { %v2125_v46 = vsub.f32 %v3966_v25, %v2124_v44  ;;  %v2130_v31 = vsub.f32 %v3960_v41, %v2128_v19  ;;  %v2069_v28 = vmul.f32 %v2068_v56, %v4000_v51  ;;  %v2079_v12 = vrot.slane %v3955_v42, %v3327_v23 }
 0x10e   : > { %v2191_v36 = vrot.slane %v2103_v16, %v4028_v52  ;;  %v2202_v47 = vrot.slane %v2114_v2, %v4028_v52  ;;  %v4070_v20 = vsub.s32 2, %v3297_v3 }
 0x10f   : > { %v2213_v59 = vrot.slane %v2125_v46, %v4028_v52  ;;  %v2070_v17 = vsub.f32 %v2028_v8, %v2069_v28  ;;  %v2080_v41 = vmul.f32 %v2079_v12, %v4000_v51 }
 0x111   : > { %v2081_v1 = vsub.f32 %v3955_v42, %v2080_v41  ;;  %v2158_v30 = vrot.slane %v2070_v17, %v4028_v52 }
 0x115   : > { %v2959_v40 = vpop.eup %2958 }
 0x116   : > { %v2132_v4 = vmul.f32 %v2959_v40, %v2059_v39 }
 0x118   : > { %v2133_v32 = vsub.f32 2.0, %v2132_v4 }
 0x11a   : > { %v2134_v21 = vmul.f32 %v2959_v40, %v2133_v32  ;;  %v2169_v40 = vrot.slane %v2081_v1, %v4028_v52 }
 0x11c   : > { %v2135_v25 = vmul.f32 %v2134_v21, %v2059_v39 }
 0x11e   : > { %v2136_v13 = vsub.f32 2.0, %v2135_v25 }
 0x120   : > { %v2137_v54 = vmul.f32 %v2136_v13, %v2134_v21 }
 0x122   : > { %v2141_v35 = vrot.slane %v2137_v54, %v4028_v52  ;;  %v4051_v24 = vmul.f32 %v2137_v54, %v2064_v29 }
 0x124   : > { %v4054_v38 = vmul.f32 %v2141_v35, %v2059_v39  ;;  %v2150_v23 = vmul.f32 %v4051_v24, %v4000_v51  ;;  %v2161_v43 = vmul.f32 %v4051_v24, %v2070_v17  ;;  %v2172_v8 = vmul.f32 %v4051_v24, %v2081_v1 }
 0x125   : > { %v2183_v0 = vmul.f32 %v4051_v24, %v4024_v33  ;;  %v2194_v42 = vmul.f32 %v4051_v24, %v2103_v16  ;;  %v2205_v60 = vmul.f32 %v4051_v24, %v2114_v2  ;;  %v2216_v27 = vmul.f32 %v4051_v24, %v2125_v46 }
 0x126   : > { %v2148_v5 = vmul.f32 %v2147_v34, %v4054_v38  ;;  %v2152_v58 = vrot.slane %v2150_v23, 1  ;;  %v2159_v48 = vmul.f32 %v2158_v30, %v4054_v38  ;;  %v2163_v62 = vrot.slane %v2161_v43, 7 }
 0x127   : > { %v2174_v7 = vrot.slane %v2172_v8, 6  ;;  %v2185_v15 = vrot.slane %v2183_v0, 5  ;;  %v2192_v6 = vmul.f32 %v2191_v36, %v4054_v38  ;;  %v2196_v39 = vrot.slane %v2194_v42, 4 }
 0x128   : > { %v2149_v26 = vsub.f32 %v4000_v51, %v2148_v5  ;;  %v2154_v61 = vsub.f32 %v3993_v45, %v2152_v58  ;;  %v2160_v18 = vsub.f32 %v2070_v17, %v2159_v48  ;;  %v2165_v11 = vsub.f32 %v2075_v55, %v2163_v62 }
 0x129   : > { %v2176_v14 = vsub.f32 %v2086_v63, %v2174_v7  ;;  %v2187_v22 = vsub.f32 %v2097_v49, %v2185_v15  ;;  %v2203_v29 = vmul.f32 %v2202_v47, %v4054_v38  ;;  %v2207_v50 = vrot.slane %v2205_v60, 3 }
 0x12a   : > { %v2214_v10 = vmul.f32 %v2213_v59, %v4054_v38  ;;  %v2218_v53 = vrot.slane %v2216_v27, 2  ;;  %2960 = vrcp.f32 %v2160_v18  ;;  %v2237_v51 = vrot.slane %v2149_v26, %v4070_v20 }
 0x12b   : > { %v4076_v45 = vsub.f32 %v2103_v16, %v2192_v6  ;;  %v2198_v55 = vsub.f32 %v2108_v37, %v2196_v39  ;;  %v2204_v63 = vsub.f32 %v2114_v2, %v2203_v29  ;;  %v2209_v49 = vsub.f32 %v2119_v57, %v2207_v50 }
 0x12c   : > { %v2215_v9 = vsub.f32 %v2125_v46, %v2214_v10  ;;  %v2220_v44 = vsub.f32 %v2130_v31, %v2218_v53  ;;  %v2248_v19 = vrot.slane %v4054_v38, %v4070_v20  ;;  %v2170_v16 = vmul.f32 %v2169_v40, %v4054_v38 }
 0x12d   : > { %v2292_v34 = vrot.slane %v2204_v63, %v4070_v20  ;;  %v2180_v37 = vrot.slane %v4024_v33, %v4028_v52 }
 0x12e   : > { %v2303_v36 = vrot.slane %v2215_v9, %v4070_v20  ;;  %v2171_v46 = vsub.f32 %v2081_v1, %v2170_v16 }
 0x12f   : > { %v2181_v31 = vmul.f32 %v2180_v37, %v4054_v38 }
 0x130   : > { %v2259_v25 = vrot.slane %v2171_v46, %v4070_v20 }
 0x131   : > { %v2182_v21 = vsub.f32 %v4024_v33, %v2181_v31 }
 0x134   : > { %v2961_v47 = vpop.eup %2960 }
 0x135   : > { %v2222_v59 = vmul.f32 %v2961_v47, %v2160_v18 }
 0x137   : > { %v2223_v56 = vsub.f32 2.0, %v2222_v59 }
 0x139   : > { %v2224_v4 = vmul.f32 %v2961_v47, %v2223_v56  ;;  %v2281_v47 = vrot.slane %v4076_v45, %v4070_v20 }
 0x13b   : > { %v2225_v2 = vmul.f32 %v2224_v4, %v2160_v18 }
 0x13d   : > { %v2226_v57 = vsub.f32 2.0, %v2225_v2 }
 0x13f   : > { %v2227_v32 = vmul.f32 %v2226_v57, %v2224_v4 }
 0x141   : > { %v2231_v28 = vrot.slane %v2227_v32, %v4070_v20  ;;  %v4088_v12 = vmul.f32 %v2227_v32, %v2165_v11 }
 0x143   : > { %v4092_v17 = vmul.f32 %v2231_v28, %v2160_v18  ;;  %v2240_v41 = vmul.f32 %v4088_v12, %v2149_v26  ;;  %v2251_v52 = vmul.f32 %v4088_v12, %v4054_v38  ;;  %v2262_v13 = vmul.f32 %v4088_v12, %v2171_v46 }
 0x144   : > { %v2273_v54 = vmul.f32 %v4088_v12, %v2182_v21  ;;  %v2284_v1 = vmul.f32 %v4088_v12, %v4076_v45  ;;  %v2295_v35 = vmul.f32 %v4088_v12, %v2204_v63  ;;  %v2306_v33 = vmul.f32 %v4088_v12, %v2215_v9 }
 0x145   : > { %v2238_v30 = vmul.f32 %v2237_v51, %v4092_v17  ;;  %v2242_v23 = vrot.slane %v2240_v41, 2  ;;  %v2249_v43 = vmul.f32 %v2248_v19, %v4092_v17  ;;  %v2253_v8 = vrot.slane %v2251_v52, 1 }
 0x146   : > { %v2260_v0 = vmul.f32 %v2259_v25, %v4092_v17  ;;  %v2264_v42 = vrot.slane %v2262_v13, 7  ;;  %v2275_v60 = vrot.slane %v2273_v54, 6  ;;  %v4109_v18 = vsub.s32 3, %v3297_v3 }
 0x147   : > { %v2239_v27 = vsub.f32 %v2149_v26, %v2238_v30  ;;  %v2244_v5 = vsub.f32 %v2154_v61, %v2242_v23  ;;  %v2250_v58 = vsub.f32 %v4054_v38, %v2249_v43  ;;  %v2255_v48 = vsub.f32 %v4051_v24, %v2253_v8 }
 0x148   : > { %v2261_v62 = vsub.f32 %v2171_v46, %v2260_v0  ;;  %v2266_v7 = vsub.f32 %v2176_v14, %v2264_v42  ;;  %v2277_v15 = vsub.f32 %v2187_v22, %v2275_v60  ;;  %v2286_v11 = vrot.slane %v2284_v1, 5 }
 0x149   : > { %v2293_v6 = vmul.f32 %v2292_v34, %v4092_v17  ;;  %v2297_v39 = vrot.slane %v2295_v35, 4  ;;  %v2304_v29 = vmul.f32 %v2303_v36, %v4092_v17  ;;  %v2308_v50 = vrot.slane %v2306_v33, 3 }
 0x14a   : > { %2962 = vrcp.f32 %v2261_v62  ;;  %v2327_v26 = vrot.slane %v2239_v27, %v4109_v18  ;;  %v2288_v61 = vsub.f32 %v2198_v55, %v2286_v11  ;;  %v2338_v14 = vrot.slane %v2250_v58, %v4109_v18 }
 0x14b   : > { %v2294_v38 = vsub.f32 %v2204_v63, %v2293_v6  ;;  %v2299_v10 = vsub.f32 %v2209_v49, %v2297_v39  ;;  %v2305_v24 = vsub.f32 %v2215_v9, %v2304_v29  ;;  %v2310_v53 = vsub.f32 %v2220_v44, %v2308_v50 }
 0x14c   : > { %v2349_v22 = vrot.slane %v4092_v17, %v4109_v18  ;;  %v2270_v36 = vrot.slane %v2182_v21, %v4070_v20  ;;  %v2282_v49 = vmul.f32 %v2281_v47, %v4092_v17  ;;  %v4131_v46 = vsub.s32 4, %v3297_v3 }
 0x14d   : > { %v2393_v51 = vrot.slane %v2305_v24, %v4109_v18  ;;  %v2382_v57 = vrot.slane %v2294_v38, %v4109_v18 }
 0x14e   : > { %v2271_v63 = vmul.f32 %v2270_v36, %v4092_v17  ;;  %v2283_v56 = vsub.f32 %v4076_v45, %v2282_v49 }
 0x150   : > { %v2272_v40 = vsub.f32 %v2182_v21, %v2271_v63  ;;  %v2371_v20 = vrot.slane %v2283_v56, %v4109_v18 }
 0x152   : > { %v2360_v2 = vrot.slane %v2272_v40, %v4109_v18 }
 0x154   : > { %v2963_v19 = vpop.eup %2962 }
 0x155   : > { %v2312_v34 = vmul.f32 %v2963_v19, %v2261_v62 }
 0x157   : > { %v2313_v59 = vsub.f32 2.0, %v2312_v34 }
 0x159   : > { %v2314_v55 = vmul.f32 %v2963_v19, %v2313_v59 }
 0x15b   : > { %v2315_v9 = vmul.f32 %v2314_v55, %v2261_v62 }
 0x15d   : > { %v2316_v44 = vsub.f32 2.0, %v2315_v9 }
 0x15f   : > { %v2317_v4 = vmul.f32 %v2316_v44, %v2314_v55 }
 0x161   : > { %v2321_v16 = vrot.slane %v2317_v4, %v4109_v18  ;;  %v4125_v37 = vmul.f32 %v2317_v4, %v2266_v7 }
 0x163   : > { %v4133_v31 = vmul.f32 %v2321_v16, %v2261_v62  ;;  %v2330_v32 = vmul.f32 %v4125_v37, %v2239_v27  ;;  %v2341_v45 = vmul.f32 %v4125_v37, %v2250_v58  ;;  %v2352_v28 = vmul.f32 %v4125_v37, %v4092_v17 }
 0x164   : > { %v2363_v21 = vmul.f32 %v4125_v37, %v2272_v40  ;;  %v2374_v25 = vmul.f32 %v4125_v37, %v2283_v56  ;;  %v2385_v41 = vmul.f32 %v4125_v37, %v2294_v38  ;;  %v2396_v52 = vmul.f32 %v4125_v37, %v2305_v24 }
 0x165   : > { %v2328_v13 = vmul.f32 %v2327_v26, %v4133_v31  ;;  %v2332_v54 = vrot.slane %v2330_v32, 3  ;;  %v2339_v1 = vmul.f32 %v2338_v14, %v4133_v31  ;;  %v2343_v35 = vrot.slane %v2341_v45, 2 }
 0x166   : > { %v2350_v33 = vmul.f32 %v2349_v22, %v4133_v31  ;;  %v2354_v30 = vrot.slane %v2352_v28, 1  ;;  %v2361_v23 = vmul.f32 %v2360_v2, %v4133_v31  ;;  %v2365_v43 = vrot.slane %v2363_v21, 7 }
 0x167   : > { %v2329_v8 = vsub.f32 %v2239_v27, %v2328_v13  ;;  %v2334_v0 = vsub.f32 %v2244_v5, %v2332_v54  ;;  %v2340_v42 = vsub.f32 %v2250_v58, %v2339_v1  ;;  %v2345_v60 = vsub.f32 %v2255_v48, %v2343_v35 }
 0x168   : > { %v2351_v62 = vsub.f32 %v4092_v17, %v2350_v33  ;;  %v2356_v7 = vsub.f32 %v4088_v12, %v2354_v30  ;;  %v2362_v18 = vsub.f32 %v2272_v40, %v2361_v23  ;;  %v2367_v11 = vsub.f32 %v2277_v15, %v2365_v43 }
 0x169   : > { %v2372_v6 = vmul.f32 %v2371_v20, %v4133_v31  ;;  %v2376_v39 = vrot.slane %v2374_v25, 6  ;;  %v2383_v29 = vmul.f32 %v2382_v57, %v4133_v31  ;;  %v2387_v50 = vrot.slane %v2385_v41, 5 }
 0x16a   : > { %v2394_v26 = vmul.f32 %v2393_v51, %v4133_v31  ;;  %v2398_v14 = vrot.slane %v2396_v52, 4  ;;  %2964 = vrcp.f32 %v2362_v18  ;;  %v2417_v27 = vrot.slane %v2329_v8, %v4131_v46 }
 0x16b   : > { %v2373_v5 = vsub.f32 %v2283_v56, %v2372_v6  ;;  %v2378_v58 = vsub.f32 %v2288_v61, %v2376_v39  ;;  %v2384_v48 = vsub.f32 %v2294_v38, %v2383_v29  ;;  %v2389_v17 = vsub.f32 %v2299_v10, %v2387_v50 }
 0x16c   : > { %v2395_v22 = vsub.f32 %v2305_v24, %v2394_v26  ;;  %v2400_v12 = vsub.f32 %v2310_v53, %v2398_v14  ;;  %v2428_v15 = vrot.slane %v2340_v42, %v4131_v46  ;;  %v2439_v19 = vrot.slane %v2351_v62, %v4131_v46 }
 0x16d   : > { %v2450_v34 = vrot.slane %v4133_v31, %v4131_v46  ;;  %v2461_v10 = vrot.slane %v2373_v5, %v4131_v46  ;;  %v2472_v24 = vrot.slane %v2384_v48, %v4131_v46 }
 0x16e   : > { %v2483_v53 = vrot.slane %v2395_v22, %v4131_v46 }
 0x174   : > { %v2965_v36 = vpop.eup %2964 }
 0x175   : > { %v2402_v47 = vmul.f32 %v2965_v36, %v2362_v18 }
 0x177   : > { %v2403_v51 = vsub.f32 2.0, %v2402_v47 }
 0x179   : > { %v2404_v59 = vmul.f32 %v2965_v36, %v2403_v51 }
 0x17b   : > { %v2405_v55 = vmul.f32 %v2404_v59, %v2362_v18 }
 0x17d   : > { %v2406_v63 = vsub.f32 2.0, %v2405_v55 }
 0x17f   : > { %v2407_v49 = vmul.f32 %v2406_v63, %v2404_v59 }
 0x181   : > { %v2411_v61 = vrot.slane %v2407_v49, %v4131_v46  ;;  %v4158_v38 = vmul.f32 %v2407_v49, %v2367_v11 }
 0x183   : > { %v4163_v9 = vmul.f32 %v2411_v61, %v2362_v18  ;;  %v2420_v44 = vmul.f32 %v4158_v38, %v2329_v8  ;;  %v2431_v40 = vmul.f32 %v4158_v38, %v2340_v42  ;;  %v2442_v56 = vmul.f32 %v4158_v38, %v2351_v62 }
 0x184   : > { %v2453_v4 = vmul.f32 %v4158_v38, %v4133_v31  ;;  %v2464_v16 = vmul.f32 %v4158_v38, %v2373_v5  ;;  %v2475_v2 = vmul.f32 %v4158_v38, %v2384_v48  ;;  %v2486_v20 = vmul.f32 %v4158_v38, %v2395_v22 }
 0x185   : > { %v2418_v57 = vmul.f32 %v2417_v27, %v4163_v9  ;;  %v2422_v46 = vrot.slane %v2420_v44, 4  ;;  %v2429_v32 = vmul.f32 %v2428_v15, %v4163_v9  ;;  %v2433_v45 = vrot.slane %v2431_v40, 3 }
 0x186   : > { %v2440_v28 = vmul.f32 %v2439_v19, %v4163_v9  ;;  %v2444_v21 = vrot.slane %v2442_v56, 2  ;;  %v2451_v25 = vmul.f32 %v2450_v34, %v4163_v9  ;;  %v2455_v41 = vrot.slane %v2453_v4, 1 }
 0x187   : > { %v2419_v52 = vsub.f32 %v2329_v8, %v2418_v57  ;;  %v2424_v13 = vsub.f32 %v2334_v0, %v2422_v46  ;;  %v2430_v54 = vsub.f32 %v2340_v42, %v2429_v32  ;;  %v2435_v1 = vsub.f32 %v2345_v60, %v2433_v45 }
 0x188   : > { %v2441_v35 = vsub.f32 %v2351_v62, %v2440_v28  ;;  %v2446_v33 = vsub.f32 %v2356_v7, %v2444_v21  ;;  %v2452_v30 = vsub.f32 %v4133_v31, %v2451_v25  ;;  %v2457_v23 = vsub.f32 %v4125_v37, %v2455_v41 }
 0x189   : > { %v2462_v43 = vmul.f32 %v2461_v10, %v4163_v9  ;;  %v2466_v18 = vrot.slane %v2464_v16, 7  ;;  %v2473_v11 = vmul.f32 %v2472_v24, %v4163_v9  ;;  %v2477_v6 = vrot.slane %v2475_v2, 6 }
 0x18a   : > { %v2484_v39 = vmul.f32 %v2483_v53, %v4163_v9  ;;  %v2488_v29 = vrot.slane %v2486_v20, 5  ;;  %v2500_v15 = vsub.s32 5, %v3297_v3 }
 0x18b   : > { %v2463_v50 = vsub.f32 %v2373_v5, %v2462_v43  ;;  %v2468_v8 = vsub.f32 %v2378_v58, %v2466_v18  ;;  %v2474_v0 = vsub.f32 %v2384_v48, %v2473_v11  ;;  %v2479_v42 = vsub.f32 %v2389_v17, %v2477_v6 }
 0x18c   : > { %v2485_v60 = vsub.f32 %v2395_v22, %v2484_v39  ;;  %v2490_v62 = vsub.f32 %v2400_v12, %v2488_v29  ;;  %v2507_v34 = vrot.slane %v2419_v52, %v2500_v15  ;;  %v2518_v5 = vrot.slane %v2430_v54, %v2500_v15 }
 0x18d   : > { %2966 = vrcp.f32 %v2463_v50  ;;  %v2529_v58 = vrot.slane %v2441_v35, %v2500_v15  ;;  %v2540_v48 = vrot.slane %v2452_v30, %v2500_v15  ;;  %v2551_v17 = vrot.slane %v4163_v9, %v2500_v15 }
 0x18e   : > { %v2562_v22 = vrot.slane %v2474_v0, %v2500_v15  ;;  %v2573_v12 = vrot.slane %v2485_v60, %v2500_v15 }
 0x197   : > { %v2967_v7 = vpop.eup %2966 }
 0x198   : > { %v2492_v31 = vmul.f32 %v2967_v7, %v2463_v50 }
 0x19a   : > { %v2493_v26 = vsub.f32 2.0, %v2492_v31 }
 0x19c   : > { %v2494_v37 = vmul.f32 %v2967_v7, %v2493_v26  ;;  %v2590_v26 = vsub.s32 6, %v3297_v3 }
 0x19e   : > { %v2495_v14 = vmul.f32 %v2494_v37, %v2463_v50 }
 0x1a0   : > { %v2496_v27 = vsub.f32 2.0, %v2495_v14 }
 0x1a2   : > { %v2497_v19 = vmul.f32 %v2496_v27, %v2494_v37 }
 0x1a4   : > { %v2501_v36 = vrot.slane %v2497_v19, %v2500_v15  ;;  %v4183_v47 = vmul.f32 %v2497_v19, %v2468_v8 }
 0x1a6   : > { %v4186_v51 = vmul.f32 %v2501_v36, %v2463_v50  ;;  %v2510_v59 = vmul.f32 %v4183_v47, %v2419_v52  ;;  %v2521_v55 = vmul.f32 %v4183_v47, %v2430_v54  ;;  %v2532_v63 = vmul.f32 %v4183_v47, %v2441_v35 }
 0x1a7   : > { %v2543_v49 = vmul.f32 %v4183_v47, %v2452_v30  ;;  %v2554_v61 = vmul.f32 %v4183_v47, %v4163_v9  ;;  %v2565_v10 = vmul.f32 %v4183_v47, %v2474_v0  ;;  %v2576_v24 = vmul.f32 %v4183_v47, %v2485_v60 }
 0x1a8   : > { %v2508_v53 = vmul.f32 %v2507_v34, %v4186_v51  ;;  %v2512_v44 = vrot.slane %v2510_v59, 5  ;;  %v2519_v40 = vmul.f32 %v2518_v5, %v4186_v51  ;;  %v2523_v56 = vrot.slane %v2521_v55, 4 }
 0x1a9   : > { %v2530_v4 = vmul.f32 %v2529_v58, %v4186_v51  ;;  %v2534_v16 = vrot.slane %v2532_v63, 3  ;;  %v2541_v2 = vmul.f32 %v2540_v48, %v4186_v51  ;;  %v2545_v20 = vrot.slane %v2543_v49, 2 }
 0x1aa   : > { %v4200_v57 = vsub.f32 %v2419_v52, %v2508_v53  ;;  %v2514_v46 = vsub.f32 %v2424_v13, %v2512_v44  ;;  %v4202_v32 = vsub.f32 %v2430_v54, %v2519_v40  ;;  %v2525_v45 = vsub.f32 %v2435_v1, %v2523_v56 }
 0x1ab   : > { %v4204_v28 = vsub.f32 %v2441_v35, %v2530_v4  ;;  %v2536_v21 = vsub.f32 %v2446_v33, %v2534_v16  ;;  %v4206_v25 = vsub.f32 %v2452_v30, %v2541_v2  ;;  %v2547_v41 = vsub.f32 %v2457_v23, %v2545_v20 }
 0x1ac   : > { %v2552_v43 = vmul.f32 %v2551_v17, %v4186_v51  ;;  %v2556_v18 = vrot.slane %v2554_v61, 1  ;;  %v2563_v11 = vmul.f32 %v2562_v22, %v4186_v51  ;;  %v2567_v6 = vrot.slane %v2565_v10, 7 }
 0x1ad   : > { %v2574_v39 = vmul.f32 %v2573_v12, %v4186_v51  ;;  %v2578_v52 = vrot.slane %v2576_v24, 6  ;;  %v2597_v14 = vrot.slane %v4200_v57, %v2590_v26 }
 0x1ae   : > { %v4212_v13 = vsub.f32 %v4163_v9, %v2552_v43  ;;  %v2558_v54 = vsub.f32 %v4158_v38, %v2556_v18  ;;  %v2564_v1 = vsub.f32 %v2474_v0, %v2563_v11  ;;  %v2569_v35 = vsub.f32 %v2479_v42, %v2567_v6 }
 0x1af   : > { %v2575_v33 = vsub.f32 %v2485_v60, %v2574_v39  ;;  %v2580_v30 = vsub.f32 %v2490_v62, %v2578_v52  ;;  %v2608_v38 = vrot.slane %v4202_v32, %v2590_v26  ;;  %v2619_v0 = vrot.slane %v4204_v28, %v2590_v26 }
 0x1b0   : > { %2968 = vrcp.f32 %v2564_v1  ;;  %v2630_v42 = vrot.slane %v4206_v25, %v2590_v26  ;;  %v2641_v60 = vrot.slane %v4212_v13, %v2590_v26  ;;  %v2652_v62 = vrot.slane %v4186_v51, %v2590_v26 }
 0x1b1   : > { %v2663_v15 = vrot.slane %v2575_v33, %v2590_v26 }
 0x1ba   : > { %v2969_v23 = vpop.eup %2968 }
 0x1bb   : > { %v2582_v29 = vmul.f32 %v2969_v23, %v2564_v1 }
 0x1bd   : > { %v2583_v50 = vsub.f32 2.0, %v2582_v29 }
 0x1bf   : > { %v2584_v8 = vmul.f32 %v2969_v23, %v2583_v50 }
 0x1c1   : > { %v2585_v7 = vmul.f32 %v2584_v8, %v2564_v1 }
 0x1c3   : > { %v2586_v31 = vsub.f32 2.0, %v2585_v7 }
 0x1c5   : > { %v2587_v37 = vmul.f32 %v2586_v31, %v2584_v8 }
 0x1c7   : > { %v2591_v9 = vrot.slane %v2587_v37, %v2590_v26  ;;  %v4217_v27 = vmul.f32 %v2587_v37, %v2569_v35 }
 0x1c9   : > { %v2592_v19 = vmul.f32 %v2591_v9, %v2564_v1  ;;  %v2600_v3 = vmul.f32 %v4217_v27, %v4200_v57  ;;  %v2611_v34 = vmul.f32 %v4217_v27, %v4202_v32  ;;  %v2622_v36 = vmul.f32 %v4217_v27, %v4204_v28 }
 0x1ca   : > { %v2633_v5 = vmul.f32 %v4217_v27, %v4206_v25  ;;  %v2644_v58 = vmul.f32 %v4217_v27, %v4212_v13  ;;  %v2655_v48 = vmul.f32 %v4217_v27, %v4186_v51  ;;  %v2666_v17 = vmul.f32 %v4217_v27, %v2575_v33 }
 0x1cb   : > { %v2598_v22 = vmul.f32 %v2597_v14, %v2592_v19  ;;  %v2602_v12 = vrot.slane %v2600_v3, 6  ;;  %v2609_v59 = vmul.f32 %v2608_v38, %v2592_v19  ;;  %v2613_v55 = vrot.slane %v2611_v34, 5 }
 0x1cc   : > { %v2620_v63 = vmul.f32 %v2619_v0, %v2592_v19  ;;  %v2624_v49 = vrot.slane %v2622_v36, 4  ;;  %v2631_v61 = vmul.f32 %v2630_v42, %v2592_v19  ;;  %v2635_v10 = vrot.slane %v2633_v5, 3 }
 0x1cd   : > { %v2599_v24 = vsub.f32 %v4200_v57, %v2598_v22  ;;  %v2604_v53 = vsub.f32 %v2514_v46, %v2602_v12  ;;  %v2610_v44 = vsub.f32 %v4202_v32, %v2609_v59  ;;  %v2615_v40 = vsub.f32 %v2525_v45, %v2613_v55 }
 0x1ce   : > { %v2621_v56 = vsub.f32 %v4204_v28, %v2620_v63  ;;  %v2626_v4 = vsub.f32 %v2536_v21, %v2624_v49  ;;  %v2632_v16 = vsub.f32 %v4206_v25, %v2631_v61  ;;  %v2637_v2 = vsub.f32 %v2547_v41, %v2635_v10 }
 0x1cf   : > { %v2642_v20 = vmul.f32 %v2641_v60, %v2592_v19  ;;  %v2646_v43 = vrot.slane %v2644_v58, 2  ;;  %v2653_v18 = vmul.f32 %v2652_v62, %v2592_v19  ;;  %v2657_v11 = vrot.slane %v2655_v48, 1 }
 0x1d0   : > { %v2664_v6 = vmul.f32 %v2663_v15, %v2592_v19  ;;  %v2668_v39 = vrot.slane %v2666_v17, 7 }
 0x1d1   : > { %v2643_v52 = vsub.f32 %v4212_v13, %v2642_v20  ;;  %v2648_v1 = vsub.f32 %v2558_v54, %v2646_v43  ;;  %v2654_v57 = vsub.f32 %v4186_v51, %v2653_v18  ;;  %v2659_v46 = vsub.f32 %v4183_v47, %v2657_v11 }
 0x1d2   : > { %v2665_v32 = vsub.f32 %v2575_v33, %v2664_v6  ;;  %v2670_v45 = vsub.f32 %v2580_v30, %v2668_v39 }
 0x1d4   : > { %2970 = vrcp.f32 %v2665_v32 }
 0x1de   : > { %v2971_v28 = vpop.eup %2970 }
 0x1df   : > { %v2672_v21 = vmul.f32 %v2971_v28, %v2665_v32 }
 0x1e1   : > { %v2673_v25 = vsub.f32 2.0, %v2672_v21 }
 0x1e3   : > { %v2674_v41 = vmul.f32 %v2971_v28, %v2673_v25 }
 0x1e5   : > { %v2675_v35 = vmul.f32 %v2674_v41, %v2665_v32 }
 0x1e7   : > { %v2676_v23 = vsub.f32 2.0, %v2675_v35 }
 0x1e9   : > { %v2677_v29 = vmul.f32 %v2676_v23, %v2674_v41 }
 0x1eb   : > { %v2678_v50 = vmul.f32 %v2677_v29, %v2670_v45 }
 0x1ed   : > { %v2679_v8 = vmul.f32 %v2678_v50, %v2599_v24  ;;  %v2684_v7 = vmul.f32 %v2678_v50, %v2610_v44  ;;  %v2689_v13 = vmul.f32 %v2678_v50, %v2621_v56  ;;  %v2694_v54 = vmul.f32 %v2678_v50, %v2632_v16 }
 0x1ee   : > { %v2699_v31 = vmul.f32 %v2678_v50, %v2643_v52  ;;  %v2704_v51 = vmul.f32 %v2678_v50, %v2654_v57  ;;  %v2709_v26 = vmul.f32 %v2678_v50, %v2592_v19 }
 0x1ef   : > { %v2681_v47 = vrot.slane %v2679_v8, 7  ;;  %v2686_v33 = vrot.slane %v2684_v7, 6  ;;  %v2691_v30 = vrot.slane %v2689_v13, 5  ;;  %v2696_v37 = vrot.slane %v2694_v54, 4 }
 0x1f0   : > { %v2701_v14 = vrot.slane %v2699_v31, 3  ;;  %v2706_v9 = vrot.slane %v2704_v51, 2  ;;  %v2711_v38 = vrot.slane %v2709_v26, 1 }
 0x1f1   : > { %v2683_v0 = vsub.f32 %v2604_v53, %v2681_v47  ;;  %v2688_v42 = vsub.f32 %v2615_v40, %v2686_v33  ;;  %v2693_v60 = vsub.f32 %v2626_v4, %v2691_v30  ;;  %v2698_v62 = vsub.f32 %v2637_v2, %v2696_v37 }
 0x1f2   : > { %v2703_v15 = vsub.f32 %v2648_v1, %v2701_v14  ;;  %v2708_v3 = vsub.f32 %v2659_v46, %v2706_v9  ;;  %v2713_v34 = vsub.f32 %v4217_v27, %v2711_v38 }
 0x1f3   : > { %v2715_v19 = vsel %vm2714_vm0, %v2683_v0, %v2688_v42 }
 0x1f4   : > { %v2717_v36 = vsel %vm2716_vm1, %v2715_v19, %v2693_v60 }
 0x1f5   : > { %v2719_v5 = vsel %vm2718_vm2, %v2717_v36, %v2698_v62 }
 0x1f6   : > { %v2721_v58 = vsel %vm2720_vm3, %v2719_v5, %v2703_v15 }
 0x1f7   : > { %v2723_v48 = vsel %vm2722_vm4, %v2721_v58, %v2708_v3 }
 0x1f8   : > { %v2725_v17 = vsel %vm2724_vm5, %v2723_v48, %v2713_v34 }
 0x1f9   : > { %v2727_v27 = vsel %vm2726_vm6, %v2725_v17, %v2678_v50 }
 0x1fa   : > { %2728 = vst [vmem:[%s201_s8] sm:$0xff] %v2727_v27 }
 0x1fb   : > { %3045 = shalt.err (!%p3042_p11)
}
 0x1fc   : > { %s3046_s16 = scalar_lea.hbm %s4251_s25, 128  ;;  %s3050_s19 = scalar_lea.hbm %s4297_s2, 256 }
 0x1fd   : > { %p3047_p3 = scmp.ne.s32.totalorder %s4251_s25, %s3046_s16  ;;  %p3051_p2 = scmp.lt.u32.totalorder %s4251_s25, %s4297_s2 }
 0x1fe   : > { %p3052_p4 = scmp.lt.u32.totalorder %s3050_s19, %s3046_s16  ;;  %p3054_p13 = scmp.lt.u32.totalorder %s3046_s16, %s4251_s25 }
 0x1ff   : > { %p3048_p8 = pnand %p3047_p3, %p4307_p1 }
 0x200   : > { %p3053_p6 = por %p3052_p4, %p3051_p2 }
 0x201   : > { %p3049_p0 = pneg %p3048_p8 }
 0x202   : > { %p3055_p12 = por %p3054_p13, %p3053_p6 }
 0x204   : > { %p3056_p10 = pnand %p3055_p12, %p3049_p0 }
 0x206   : > { %3059 = shalt.err (!%p3056_p10)
}
 0x207   : > { %2890 = dma.vmem_to_hbm [thread:$0]  (%p4307_p1), %s4253_s17, 128, %s4251_s25, %s2730_s29  }
 0x208 PF: > { %s2755_s26 = sand.u32 1, %s3090_s9   ;;  %p4308_p5 = scmp.ne.s32.totalorder %s4303_s22, 0 }
 0x209   : > { %p4309_p7 = scmp.ge.s32.totalorder %s3102_s12, 2  ;;  %s2756_s27 = scalar_lea.sflag [#allocation4], %s2755_s26 }
 0x20b   : > { %p2900_p9 = pnand %p4309_p7, %p4308_p5 }
 0x20d   : > { %3085 = dma.done.wait (!%p2900_p9), %s2756_s27, 128  }
 0x20e   : > { %3087 = vsyncadd (!%p2900_p9), %s2756_s27, 4294967168  ;;  %p18_p11 = scmp.ge.s32.totalorder %s3150_s15, 4   ;;  %s4310_s9 = smov %s3094_s10 }
 0x20f   : > { %s4311_s10 = smov %s3098_s11  ;;  %s4312_s11 = smov %s3162_s18 }
 0x210   : > { %s4313_s12 = smov %s3150_s15  ;;  %20 = sbr.rel (!%p18_p11) target bundleno = 7 (0x7), region = 101 }
 0x217   :  { %2761 = vsyncpa [#allocation3], 1 }
 0x218   :  { %2763 = vsyncpa [#allocation3 + $0x1], 1 }
 0x219   :  { %2764 = vsyncpa [#allocation6], 1 }
 0x21a   :  { %2766 = vsyncpa [#allocation6 + $0x1], 1 }
 0x21b   :  { %2767 = vsyncpa [#allocation4], 1 }
 0x21c   :  { %2769 = vsyncpa [#allocation4 + $0x1], 1 }

</bundles_post_ra>
